<compile_context>
chip_gen: v7x
topology: tpu7x:2x2x1
jax: 0.10.0
libtpu: 0.0.40
codegen_flags: <defaults>
</compile_context>

<pallas_src>
import math

import jax
import jax.numpy as jnp
from jax.experimental import pallas as pl
from jax.experimental.pallas import tpu as pltpu

# ----------------------------- model config ---------------------------------
D_MODEL = 128
N_HEAD = 16
HEAD_DIM = D_MODEL // N_HEAD          # 8
FFN_DIM = 512 * 2                     # 1024, as in the PyTorch module
NUM_LAYERS = 2
EMB_DIM = 100                         # BPEmb('ml') vector dim -> in_fc(100, d_model)
VOCAB = 1000                          # synthetic vocab (stand-in for bpemb vectors)
MAX_LEN = 100
N_CLASSES = 7
SCALE = math.sqrt(D_MODEL // N_HEAD)  # MultiHeadAttn(scale=True)
LN_EPS = 1e-5
NEG_INF = -1e30                       # finite "masked" value (avoids -inf NaN hazard)


# ----------------------------- fused Pallas kernel ---------------------------
def _layernorm(x, g, b):
    mu = jnp.mean(x, axis=-1, keepdims=True)
    xc = x - mu
    var = jnp.mean(xc * xc, axis=-1, keepdims=True)
    return xc * jax.lax.rsqrt(var + LN_EPS) * g + b


def _fused_forward_kernel(
    emb_ref, bias_ref, pe_ref,
    pselk_ref, pselv_ref, bmk_ref, bmv_ref,
    in_w_ref, in_b_ref,
    wqkv_ref, fc_w_ref, fc_b_ref,
    ln1_g_ref, ln1_b_ref, ln2_g_ref, ln2_b_ref,
    w1_ref, b1_ref, w2_ref, b2_ref,
    out_w_ref, out_b_ref,
    o_ref,
):
    f32 = jnp.float32
    bf16 = jnp.bfloat16

    # ---- in_fc + positional encoding:  x = x + (x + pe)  =  2x + pe ----
    emb = emb_ref[0]                                            # (L, EMB_DIM) f32
    x = jnp.dot(emb.astype(bf16), in_w_ref[...],
                preferred_element_type=f32) + in_b_ref[...]     # (L, D)
    x = 2.0 * x + pe_ref[...]

    # attention constants (loaded once, reused by both layers)
    attn_bias = bias_ref[0]                                     # (1, H*L) additive key mask
    pselk = pselk_ref[...]                                      # (L, H*L)  column selector
    pselv = pselv_ref[...]                                      # (H*L, L)  row selector
    bmk = bmk_ref[...]                                          # (D, H*L)  block-diag mask
    bmv = bmv_ref[...]                                          # (H*L, D)  block-diag mask
    bmv_b = bmv.astype(bf16)

    for l in range(NUM_LAYERS):
        # -------------------- multi-head self-attention ---------------------
        residual = x
        xb = x.astype(bf16)
        qkv = jnp.dot(xb, wqkv_ref[l], preferred_element_type=f32)    # (L, 3D)
        q = qkv[:, :D_MODEL]              # 1/sqrt(hd) already folded into Wq
        k = qkv[:, D_MODEL:2 * D_MODEL]
        v = qkv[:, 2 * D_MODEL:]

        # Block-diagonal expansion of K: K_bd[d, h*L+j] = k[j, d] iff d in head h.
        # One lane-dense (L, H*L) matmul then gives all per-head score matrices.
        k_bd = (jnp.dot(k.T, pselk, preferred_element_type=f32) * bmk).astype(bf16)
        s = jnp.dot(q.astype(bf16), k_bd, preferred_element_type=f32)  # (L, H*L)
        s = s + attn_bias                                              # key padding mask
        s = s - jnp.max(s, axis=-1, keepdims=True)   # per-row shift; softmax-invariant per head
        p = jnp.exp(s).astype(bf16)

        # Block-diagonal expansion of V and per-head softmax denominators.
        v_bd = (jnp.dot(pselv, v, preferred_element_type=f32) * bmv).astype(bf16)
        num = jnp.dot(p, v_bd, preferred_element_type=f32)             # (L, D)
        den = jnp.dot(p, bmv_b, preferred_element_type=f32)            # (L, D) group sums
        den = jnp.maximum(den, 1e-20)
        attn = num * pl.reciprocal(den, approx=True)                   # softmax-normalized

        o = jnp.dot(attn.astype(bf16), fc_w_ref[l],
                    preferred_element_type=f32) + fc_b_ref[l]          # self_attn.fc
        x = _layernorm(o + residual, ln1_g_ref[l], ln1_b_ref[l])       # after_norm=True

        # ------------------------------- FFN --------------------------------
        residual = x
        h = jnp.dot(x.astype(bf16), w1_ref[l],
                    preferred_element_type=f32) + b1_ref[l]
        h = jnp.maximum(h, 0.0)                                        # ReLU
        h = jnp.dot(h.astype(bf16), w2_ref[l],
                    preferred_element_type=f32) + b2_ref[l]
        x = _layernorm(residual + h, ln2_g_ref[l], ln2_b_ref[l])

    # ------------------------------- out_fc ---------------------------------
    logits = jnp.dot(x.astype(bf16), out_w_ref[...],
                     preferred_element_type=f32) + out_b_ref[...]
    o_ref[0] = logits


# ------------------------------ model glue -----------------------------------
def make_positional_encoding(d_model, max_len=MAX_LEN):
    position = jnp.arange(max_len, dtype=jnp.float32)[:, None]                 # (L, 1)
    div_term = jnp.exp(
        jnp.arange(0, d_model, 2, dtype=jnp.float32) * (-math.log(10000.0) / d_model)
    )                                                                          # (D/2,)
    ang = position * div_term[None, :]                                         # (L, D/2)
    pe = jnp.stack([jnp.sin(ang), jnp.cos(ang)], axis=-1).reshape(max_len, d_model)
    return pe                                                                  # (L, D)


def init_params(key):
    def dense(k, shape, std=0.02):
        return jax.random.normal(k, shape, dtype=jnp.float32) * std

    keys = jax.random.split(key, 4 + NUM_LAYERS * 4)
    ki = iter(keys)
    params = {
        # synthetic stand-in for bpemb_ml.vectors (frozen embedding)
        "emb": dense(next(ki), (VOCAB, EMB_DIM), 0.1),
        "in_w": dense(next(ki), (EMB_DIM, D_MODEL)),
        "in_b": jnp.zeros((1, D_MODEL), jnp.float32),
        "out_w": dense(next(ki), (D_MODEL, N_CLASSES)),
        "out_b": jnp.zeros((1, N_CLASSES), jnp.float32),
        "layers": [],
    }
    for _ in range(NUM_LAYERS):
        params["layers"].append({
            "wqkv": dense(next(ki), (D_MODEL, 3 * D_MODEL)),   # qkv_linear (bias=False)
            "fc_w": dense(next(ki), (D_MODEL, D_MODEL)),
            "fc_b": jnp.zeros((1, D_MODEL), jnp.float32),
            "ln1_g": jnp.ones((1, D_MODEL), jnp.float32),
            "ln1_b": jnp.zeros((1, D_MODEL), jnp.float32),
            "ln2_g": jnp.ones((1, D_MODEL), jnp.float32),
            "ln2_b": jnp.zeros((1, D_MODEL), jnp.float32),
            "ffn_w1": dense(next(ki), (D_MODEL, FFN_DIM)),
            "ffn_b1": jnp.zeros((1, FFN_DIM), jnp.float32),
            "ffn_w2": dense(next(ki), (FFN_DIM, D_MODEL)),
            "ffn_b2": jnp.zeros((1, D_MODEL), jnp.float32),
        })
    return params


def prepare_params(params):
    """Stack per-layer weights, cast matmul operands to bf16, fold attn scale into Wq."""
    bf = lambda x: x.astype(jnp.bfloat16)
    stack = lambda name: jnp.stack([lp[name] for lp in params["layers"]], axis=0)

    wqkv = stack("wqkv")
    wqkv = wqkv.at[:, :, :D_MODEL].multiply(1.0 / SCALE)   # fold 1/sqrt(head_dim) into Wq

    return {
        "emb": params["emb"],
        "in_w": bf(params["in_w"]), "in_b": params["in_b"],
        "out_w": bf(params["out_w"]), "out_b": params["out_b"],
        "wqkv": bf(wqkv),
        "fc_w": bf(stack("fc_w")), "fc_b": stack("fc_b"),
        "ln1_g": stack("ln1_g"), "ln1_b": stack("ln1_b"),
        "ln2_g": stack("ln2_g"), "ln2_b": stack("ln2_b"),
        "w1": bf(stack("ffn_w1")), "b1": stack("ffn_b1"),
        "w2": bf(stack("ffn_w2")), "b2": stack("ffn_b2"),
    }


def tener_forward(tokens, mask, kp, pe):
    B, L = tokens.shape
    HL = N_HEAD * L

    # frozen-embedding lookup stays in XLA (tiny gather; no clean Pallas equivalent)
    emb = jnp.take(kp["emb"], tokens, axis=0)                         # (B, L, EMB_DIM)

    # additive key-padding bias, tiled per head: (B, 1, H*L)
    key_bias = jnp.where(jnp.tile(mask, (1, N_HEAD))[:, None, :] == 0,
                         jnp.float32(NEG_INF), jnp.float32(0.0))

    # constant selection / block-diagonal matrices for lane-dense per-head attention
    c = jnp.arange(HL)
    d = jnp.arange(D_MODEL)
    j = jnp.arange(L)
    psel_k = (c[None, :] % L == j[:, None]).astype(jnp.float32)               # (L, HL)
    psel_v = (c[:, None] % L == j[None, :]).astype(jnp.float32)               # (HL, L)
    bm_k = (d[:, None] // HEAD_DIM == c[None, :] // L).astype(jnp.float32)    # (D, HL)
    bm_v = (c[:, None] // L == d[None, :] // HEAD_DIM).astype(jnp.float32)    # (HL, D)

    pe_l = pe[:L]

    def full(shape):
        return pl.BlockSpec(shape, lambda b: (0,) * len(shape))

    def per_batch(shape):
        return pl.BlockSpec(shape, lambda b: (b, 0, 0))

    in_specs = [
        per_batch((1, L, EMB_DIM)),                    # emb
        per_batch((1, 1, HL)),                         # key bias
        full((L, D_MODEL)),                            # pe
        full((L, HL)),                                 # psel_k
        full((HL, L)),                                 # psel_v
        full((D_MODEL, HL)),                           # bm_k
        full((HL, D_MODEL)),                           # bm_v
        full((EMB_DIM, D_MODEL)),                      # in_w
        full((1, D_MODEL)),                            # in_b
        full((NUM_LAYERS, D_MODEL, 3 * D_MODEL)),      # wqkv
        full((NUM_LAYERS, D_MODEL, D_MODEL)),          # fc_w
        full((NUM_LAYERS, 1, D_MODEL)),                # fc_b
        full((NUM_LAYERS, 1, D_MODEL)),                # ln1_g
        full((NUM_LAYERS, 1, D_MODEL)),                # ln1_b
        full((NUM_LAYERS, 1, D_MODEL)),                # ln2_g
        full((NUM_LAYERS, 1, D_MODEL)),                # ln2_b
        full((NUM_LAYERS, D_MODEL, FFN_DIM)),          # w1
        full((NUM_LAYERS, 1, FFN_DIM)),                # b1
        full((NUM_LAYERS, FFN_DIM, D_MODEL)),          # w2
        full((NUM_LAYERS, 1, D_MODEL)),                # b2
        full((D_MODEL, N_CLASSES)),                    # out_w
        full((1, N_CLASSES)),                          # out_b
    ]

    # TODO(synk): at realistic B*L (e.g. 32x100) add an M-row-tile grid axis and set
    # vmem_limit_bytes so the FFN hidden slab stays within v7x/v5e VMEM budgets.
    return pl.pallas_call(
        _fused_forward_kernel,
        grid=(B,),
        in_specs=in_specs,
        out_specs=pl.BlockSpec((1, L, N_CLASSES), lambda b: (b, 0, 0)),
        out_shape=jax.ShapeDtypeStruct((B, L, N_CLASSES), jnp.float32),
        compiler_params=pltpu.CompilerParams(dimension_semantics=("parallel",)),
    )(emb, key_bias, pe_l, psel_k, psel_v, bm_k, bm_v,
      kp["in_w"], kp["in_b"],
      kp["wqkv"], kp["fc_w"], kp["fc_b"],
      kp["ln1_g"], kp["ln1_b"], kp["ln2_g"], kp["ln2_b"],
      kp["w1"], kp["b1"], kp["w2"], kp["b2"],
      kp["out_w"], kp["out_b"])


# ----------------------------------- main ------------------------------------
if __name__ == "__main__":
    B, L = 2, 8

    key = jax.random.PRNGKey(0)
    tok_key, _ = jax.random.split(key)
    tokens = jax.random.randint(tok_key, (B, L), 0, VOCAB, dtype=jnp.int32)
    mask = jnp.ones((B, L), jnp.int32)
    mask = mask.at[1, 6:].set(0)      # pad out the tail of the second sequence

    params = init_params(jax.random.PRNGKey(42))
    kparams = prepare_params(params)
    pe = make_positional_encoding(D_MODEL, MAX_LEN)

    fwd = jax.jit(tener_forward)
    out = jax.block_until_ready(fwd(tokens, mask, kparams, pe))

    assert out.shape == (B, L, N_CLASSES)
    assert bool(jnp.all(jnp.isfinite(out)))
    print("KERNEL_OK")
</pallas_src>

<mosaic_0001>
module attributes {stable_mosaic.version = 11 : i64} {
  func.func @_fused_forward_kernel(%arg0: i32, %arg1: memref<1x8x100xf32, #tpu.memory_space<vmem>>, %arg2: memref<1x1x128xf32, #tpu.memory_space<vmem>>, %arg3: memref<8x128xf32, #tpu.memory_space<vmem>>, %arg4: memref<8x128xf32, #tpu.memory_space<vmem>>, %arg5: memref<128x8xf32, #tpu.memory_space<vmem>>, %arg6: memref<128x128xf32, #tpu.memory_space<vmem>>, %arg7: memref<128x128xf32, #tpu.memory_space<vmem>>, %arg8: memref<100x128xbf16, #tpu.memory_space<vmem>>, %arg9: memref<1x128xf32, #tpu.memory_space<vmem>>, %arg10: memref<2x128x384xbf16, #tpu.memory_space<vmem>>, %arg11: memref<2x128x128xbf16, #tpu.memory_space<vmem>>, %arg12: memref<2x1x128xf32, #tpu.memory_space<vmem>>, %arg13: memref<2x1x128xf32, #tpu.memory_space<vmem>>, %arg14: memref<2x1x128xf32, #tpu.memory_space<vmem>>, %arg15: memref<2x1x128xf32, #tpu.memory_space<vmem>>, %arg16: memref<2x1x128xf32, #tpu.memory_space<vmem>>, %arg17: memref<2x128x1024xbf16, #tpu.memory_space<vmem>>, %arg18: memref<2x1x1024xf32, #tpu.memory_space<vmem>>, %arg19: memref<2x1024x128xbf16, #tpu.memory_space<vmem>>, %arg20: memref<2x1x128xf32, #tpu.memory_space<vmem>>, %arg21: memref<128x7xbf16, #tpu.memory_space<vmem>>, %arg22: memref<1x7xf32, #tpu.memory_space<vmem>>, %arg23: memref<1x8x7xf32, #tpu.memory_space<vmem>>) attributes {dimension_semantics = [#tpu.dimension_semantics<parallel>], iteration_bounds = array<i64: 2>, scalar_prefetch = 0 : i64, scratch_operands = 0 : i64, tpu.core_type = #tpu.core_type<tc>, window_params = [{transform_indices = @transform_0, window_bounds = array<i64: 1, 8, 100>}, {transform_indices = @transform_1, window_bounds = array<i64: 1, 1, 128>}, {pipeline_mode = #tpu.pipeline_mode<synchronous>, transform_indices = @transform_2, window_bounds = array<i64: 8, 128>}, {pipeline_mode = #tpu.pipeline_mode<synchronous>, transform_indices = @transform_3, window_bounds = array<i64: 8, 128>}, {pipeline_mode = #tpu.pipeline_mode<synchronous>, transform_indices = @transform_4, window_bounds = array<i64: 128, 8>}, {pipeline_mode = #tpu.pipeline_mode<synchronous>, transform_indices = @transform_5, window_bounds = array<i64: 128, 128>}, {pipeline_mode = #tpu.pipeline_mode<synchronous>, transform_indices = @transform_6, window_bounds = array<i64: 128, 128>}, {pipeline_mode = #tpu.pipeline_mode<synchronous>, transform_indices = @transform_7, window_bounds = array<i64: 100, 128>}, {pipeline_mode = #tpu.pipeline_mode<synchronous>, transform_indices = @transform_8, window_bounds = array<i64: 1, 128>}, {pipeline_mode = #tpu.pipeline_mode<synchronous>, transform_indices = @transform_9, window_bounds = array<i64: 2, 128, 384>}, {pipeline_mode = #tpu.pipeline_mode<synchronous>, transform_indices = @transform_10, window_bounds = array<i64: 2, 128, 128>}, {pipeline_mode = #tpu.pipeline_mode<synchronous>, transform_indices = @transform_11, window_bounds = array<i64: 2, 1, 128>}, {pipeline_mode = #tpu.pipeline_mode<synchronous>, transform_indices = @transform_12, window_bounds = array<i64: 2, 1, 128>}, {pipeline_mode = #tpu.pipeline_mode<synchronous>, transform_indices = @transform_13, window_bounds = array<i64: 2, 1, 128>}, {pipeline_mode = #tpu.pipeline_mode<synchronous>, transform_indices = @transform_14, window_bounds = array<i64: 2, 1, 128>}, {pipeline_mode = #tpu.pipeline_mode<synchronous>, transform_indices = @transform_15, window_bounds = array<i64: 2, 1, 128>}, {pipeline_mode = #tpu.pipeline_mode<synchronous>, transform_indices = @transform_16, window_bounds = array<i64: 2, 128, 1024>}, {pipeline_mode = #tpu.pipeline_mode<synchronous>, transform_indices = @transform_17, window_bounds = array<i64: 2, 1, 1024>}, {pipeline_mode = #tpu.pipeline_mode<synchronous>, transform_indices = @transform_18, window_bounds = array<i64: 2, 1024, 128>}, {pipeline_mode = #tpu.pipeline_mode<synchronous>, transform_indices = @transform_19, window_bounds = array<i64: 2, 1, 128>}, {pipeline_mode = #tpu.pipeline_mode<synchronous>, transform_indices = @transform_20, window_bounds = array<i64: 128, 7>}, {pipeline_mode = #tpu.pipeline_mode<synchronous>, transform_indices = @transform_21, window_bounds = array<i64: 1, 7>}, {transform_indices = @transform_22, window_bounds = array<i64: 1, 8, 7>}]} {
    %c0 = arith.constant 0 : index
    %c0_0 = arith.constant 0 : index
    %c0_1 = arith.constant 0 : index
    %0 = vector.load %arg1[%c0, %c0_0, %c0_1] : memref<1x8x100xf32, #tpu.memory_space<vmem>>, vector<1x8x100xf32>
    %1 = vector.shape_cast %0 : vector<1x8x100xf32> to vector<8x100xf32>
    %2 = arith.truncf %1 : vector<8x100xf32> to vector<8x100xbf16>
    %c0_2 = arith.constant 0 : index
    %c0_3 = arith.constant 0 : index
    %3 = vector.load %arg8[%c0_2, %c0_3] : memref<100x128xbf16, #tpu.memory_space<vmem>>, vector<100x128xbf16>
    %cst = arith.constant dense<0.000000e+00> : vector<8x128xf32>
    %4 = tpu.matmul %2, %3, %cst {dimension_numbers = #tpu.dot_dimension_numbers<[1], [0], [0], [1], [0, 0, 1, 1], [], []>} : vector<8x100xbf16>, vector<100x128xbf16>, vector<8x128xf32> -> vector<8x128xf32>
    %c0_4 = arith.constant 0 : index
    %c0_5 = arith.constant 0 : index
    %5 = vector.load %arg9[%c0_4, %c0_5] : memref<1x128xf32, #tpu.memory_space<vmem>>, vector<1x128xf32>
    %6 = vector.broadcast %5 : vector<1x128xf32> to vector<8x128xf32>
    %7 = arith.addf %4, %6 : vector<8x128xf32>
    %cst_6 = arith.constant 2.000000e+00 : f32
    %8 = vector.broadcast %cst_6 : f32 to vector<8x128xf32>
    %9 = arith.mulf %8, %7 : vector<8x128xf32>
    %c0_7 = arith.constant 0 : index
    %c0_8 = arith.constant 0 : index
    %10 = vector.load %arg3[%c0_7, %c0_8] : memref<8x128xf32, #tpu.memory_space<vmem>>, vector<8x128xf32>
    %11 = arith.addf %9, %10 : vector<8x128xf32>
    %c0_9 = arith.constant 0 : index
    %c0_10 = arith.constant 0 : index
    %c0_11 = arith.constant 0 : index
    %12 = vector.load %arg2[%c0_9, %c0_10, %c0_11] : memref<1x1x128xf32, #tpu.memory_space<vmem>>, vector<1x1x128xf32>
    %13 = vector.shape_cast %12 : vector<1x1x128xf32> to vector<1x128xf32>
    %c0_12 = arith.constant 0 : index
    %c0_13 = arith.constant 0 : index
    %14 = vector.load %arg4[%c0_12, %c0_13] : memref<8x128xf32, #tpu.memory_space<vmem>>, vector<8x128xf32>
    %c0_14 = arith.constant 0 : index
    %c0_15 = arith.constant 0 : index
    %15 = vector.load %arg5[%c0_14, %c0_15] : memref<128x8xf32, #tpu.memory_space<vmem>>, vector<128x8xf32>
    %c0_16 = arith.constant 0 : index
    %c0_17 = arith.constant 0 : index
    %16 = vector.load %arg6[%c0_16, %c0_17] : memref<128x128xf32, #tpu.memory_space<vmem>>, vector<128x128xf32>
    %c0_18 = arith.constant 0 : index
    %c0_19 = arith.constant 0 : index
    %17 = vector.load %arg7[%c0_18, %c0_19] : memref<128x128xf32, #tpu.memory_space<vmem>>, vector<128x128xf32>
    %18 = arith.truncf %17 : vector<128x128xf32> to vector<128x128xbf16>
    %19 = arith.truncf %11 : vector<8x128xf32> to vector<8x128xbf16>
    %c0_20 = arith.constant 0 : index
    %c0_21 = arith.constant 0 : index
    %c0_22 = arith.constant 0 : index
    %20 = vector.load %arg10[%c0_20, %c0_21, %c0_22] : memref<2x128x384xbf16, #tpu.memory_space<vmem>>, vector<1x128x384xbf16>
    %21 = vector.shape_cast %20 : vector<1x128x384xbf16> to vector<128x384xbf16>
    %cst_23 = arith.constant dense<0.000000e+00> : vector<8x384xf32>
    %22 = tpu.matmul %19, %21, %cst_23 {dimension_numbers = #tpu.dot_dimension_numbers<[1], [0], [0], [1], [0, 0, 1, 1], [], []>} : vector<8x128xbf16>, vector<128x384xbf16>, vector<8x384xf32> -> vector<8x384xf32>
    %23 = vector.extract_strided_slice %22 {offsets = [0, 0], sizes = [8, 128], strides = [1, 1]} : vector<8x384xf32> to vector<8x128xf32>
    %24 = vector.extract_strided_slice %22 {offsets = [0, 128], sizes = [8, 128], strides = [1, 1]} : vector<8x384xf32> to vector<8x128xf32>
    %25 = vector.extract_strided_slice %22 {offsets = [0, 256], sizes = [8, 128], strides = [1, 1]} : vector<8x384xf32> to vector<8x128xf32>
    %26 = tpu.transpose %24, [1, 0] : vector<8x128xf32> -> vector<128x8xf32>
    %cst_24 = arith.constant dense<0.000000e+00> : vector<128x128xf32>
    %27 = tpu.matmul %26, %14, %cst_24 {dimension_numbers = #tpu.dot_dimension_numbers<[1], [0], [0], [1], [0, 0, 1, 1], [], []>} : vector<128x8xf32>, vector<8x128xf32>, vector<128x128xf32> -> vector<128x128xf32>
    %28 = arith.mulf %27, %16 : vector<128x128xf32>
    %29 = arith.truncf %28 : vector<128x128xf32> to vector<128x128xbf16>
    %30 = arith.truncf %23 : vector<8x128xf32> to vector<8x128xbf16>
    %cst_25 = arith.constant dense<0.000000e+00> : vector<8x128xf32>
    %31 = tpu.matmul %30, %29, %cst_25 {dimension_numbers = #tpu.dot_dimension_numbers<[1], [0], [0], [1], [0, 0, 1, 1], [], []>} : vector<8x128xbf16>, vector<128x128xbf16>, vector<8x128xf32> -> vector<8x128xf32>
    %32 = vector.broadcast %13 : vector<1x128xf32> to vector<8x128xf32>
    %33 = arith.addf %31, %32 : vector<8x128xf32>
    %cst_26 = arith.constant dense<0xFF800000> : vector<8xf32>
    %34 = vector.multi_reduction <maximumf>, %33, %cst_26 [1] : vector<8x128xf32> to vector<8xf32>
    %35 = vector.shape_cast %34 : vector<8xf32> to vector<8x1xf32>
    %36 = vector.broadcast %35 : vector<8x1xf32> to vector<8x128xf32>
    %37 = arith.subf %33, %36 : vector<8x128xf32>
    %38 = math.exp %37 : vector<8x128xf32>
    %39 = arith.truncf %38 : vector<8x128xf32> to vector<8x128xbf16>
    %cst_27 = arith.constant dense<0.000000e+00> : vector<128x128xf32>
    %40 = tpu.matmul %15, %25, %cst_27 {dimension_numbers = #tpu.dot_dimension_numbers<[1], [0], [0], [1], [0, 0, 1, 1], [], []>} : vector<128x8xf32>, vector<8x128xf32>, vector<128x128xf32> -> vector<128x128xf32>
    %41 = arith.mulf %40, %17 : vector<128x128xf32>
    %42 = arith.truncf %41 : vector<128x128xf32> to vector<128x128xbf16>
    %cst_28 = arith.constant dense<0.000000e+00> : vector<8x128xf32>
    %43 = tpu.matmul %39, %42, %cst_28 {dimension_numbers = #tpu.dot_dimension_numbers<[1], [0], [0], [1], [0, 0, 1, 1], [], []>} : vector<8x128xbf16>, vector<128x128xbf16>, vector<8x128xf32> -> vector<8x128xf32>
    %cst_29 = arith.constant dense<0.000000e+00> : vector<8x128xf32>
    %44 = tpu.matmul %39, %18, %cst_29 {dimension_numbers = #tpu.dot_dimension_numbers<[1], [0], [0], [1], [0, 0, 1, 1], [], []>} : vector<8x128xbf16>, vector<128x128xbf16>, vector<8x128xf32> -> vector<8x128xf32>
    %cst_30 = arith.constant 9.99999968E-21 : f32
    %45 = vector.broadcast %cst_30 : f32 to vector<8x128xf32>
    %46 = arith.maximumf %44, %45 : vector<8x128xf32>
    %47 = tpu.reciprocal %46 {approx = true} : vector<8x128xf32> -> vector<8x128xf32>
    %48 = arith.mulf %43, %47 : vector<8x128xf32>
    %49 = arith.truncf %48 : vector<8x128xf32> to vector<8x128xbf16>
    %c0_31 = arith.constant 0 : index
    %c0_32 = arith.constant 0 : index
    %c0_33 = arith.constant 0 : index
    %50 = vector.load %arg11[%c0_31, %c0_32, %c0_33] : memref<2x128x128xbf16, #tpu.memory_space<vmem>>, vector<1x128x128xbf16>
    %51 = vector.shape_cast %50 : vector<1x128x128xbf16> to vector<128x128xbf16>
    %cst_34 = arith.constant dense<0.000000e+00> : vector<8x128xf32>
    %52 = tpu.matmul %49, %51, %cst_34 {dimension_numbers = #tpu.dot_dimension_numbers<[1], [0], [0], [1], [0, 0, 1, 1], [], []>} : vector<8x128xbf16>, vector<128x128xbf16>, vector<8x128xf32> -> vector<8x128xf32>
    %c0_35 = arith.constant 0 : index
    %c0_36 = arith.constant 0 : index
    %c0_37 = arith.constant 0 : index
    %53 = vector.load %arg12[%c0_35, %c0_36, %c0_37] : memref<2x1x128xf32, #tpu.memory_space<vmem>>, vector<1x1x128xf32>
    %54 = vector.shape_cast %53 : vector<1x1x128xf32> to vector<1x128xf32>
    %55 = vector.broadcast %54 : vector<1x128xf32> to vector<8x128xf32>
    %56 = arith.addf %52, %55 : vector<8x128xf32>
    %57 = arith.addf %56, %11 : vector<8x128xf32>
    %c0_38 = arith.constant 0 : index
    %c0_39 = arith.constant 0 : index
    %c0_40 = arith.constant 0 : index
    %58 = vector.load %arg13[%c0_38, %c0_39, %c0_40] : memref<2x1x128xf32, #tpu.memory_space<vmem>>, vector<1x1x128xf32>
    %59 = vector.shape_cast %58 : vector<1x1x128xf32> to vector<1x128xf32>
    %c0_41 = arith.constant 0 : index
    %c0_42 = arith.constant 0 : index
    %c0_43 = arith.constant 0 : index
    %60 = vector.load %arg14[%c0_41, %c0_42, %c0_43] : memref<2x1x128xf32, #tpu.memory_space<vmem>>, vector<1x1x128xf32>
    %61 = vector.shape_cast %60 : vector<1x1x128xf32> to vector<1x128xf32>
    %cst_44 = arith.constant dense<0.000000e+00> : vector<8xf32>
    %62 = vector.multi_reduction <add>, %57, %cst_44 [1] : vector<8x128xf32> to vector<8xf32>
    %63 = vector.shape_cast %62 : vector<8xf32> to vector<8x1xf32>
    %cst_45 = arith.constant 1.280000e+02 : f32
    %64 = vector.broadcast %cst_45 : f32 to vector<8x1xf32>
    %65 = arith.divf %63, %64 : vector<8x1xf32>
    %66 = vector.broadcast %65 : vector<8x1xf32> to vector<8x128xf32>
    %67 = arith.subf %57, %66 : vector<8x128xf32>
    %68 = arith.mulf %67, %67 : vector<8x128xf32>
    %cst_46 = arith.constant dense<0.000000e+00> : vector<8xf32>
    %69 = vector.multi_reduction <add>, %68, %cst_46 [1] : vector<8x128xf32> to vector<8xf32>
    %70 = vector.shape_cast %69 : vector<8xf32> to vector<8x1xf32>
    %cst_47 = arith.constant 1.280000e+02 : f32
    %71 = vector.broadcast %cst_47 : f32 to vector<8x1xf32>
    %72 = arith.divf %70, %71 : vector<8x1xf32>
    %cst_48 = arith.constant 9.99999974E-6 : f32
    %73 = vector.broadcast %cst_48 : f32 to vector<8x1xf32>
    %74 = arith.addf %72, %73 : vector<8x1xf32>
    %75 = math.rsqrt %74 : vector<8x1xf32>
    %76 = vector.broadcast %75 : vector<8x1xf32> to vector<8x128xf32>
    %77 = arith.mulf %67, %76 : vector<8x128xf32>
    %78 = vector.broadcast %59 : vector<1x128xf32> to vector<8x128xf32>
    %79 = arith.mulf %77, %78 : vector<8x128xf32>
    %80 = vector.broadcast %61 : vector<1x128xf32> to vector<8x128xf32>
    %81 = arith.addf %79, %80 : vector<8x128xf32>
    %82 = arith.truncf %81 : vector<8x128xf32> to vector<8x128xbf16>
    %c0_49 = arith.constant 0 : index
    %c0_50 = arith.constant 0 : index
    %c0_51 = arith.constant 0 : index
    %83 = vector.load %arg17[%c0_49, %c0_50, %c0_51] : memref<2x128x1024xbf16, #tpu.memory_space<vmem>>, vector<1x128x1024xbf16>
    %84 = vector.shape_cast %83 : vector<1x128x1024xbf16> to vector<128x1024xbf16>
    %cst_52 = arith.constant dense<0.000000e+00> : vector<8x1024xf32>
    %85 = tpu.matmul %82, %84, %cst_52 {dimension_numbers = #tpu.dot_dimension_numbers<[1], [0], [0], [1], [0, 0, 1, 1], [], []>} : vector<8x128xbf16>, vector<128x1024xbf16>, vector<8x1024xf32> -> vector<8x1024xf32>
    %c0_53 = arith.constant 0 : index
    %c0_54 = arith.constant 0 : index
    %c0_55 = arith.constant 0 : index
    %86 = vector.load %arg18[%c0_53, %c0_54, %c0_55] : memref<2x1x1024xf32, #tpu.memory_space<vmem>>, vector<1x1x1024xf32>
    %87 = vector.shape_cast %86 : vector<1x1x1024xf32> to vector<1x1024xf32>
    %88 = vector.broadcast %87 : vector<1x1024xf32> to vector<8x1024xf32>
    %89 = arith.addf %85, %88 : vector<8x1024xf32>
    %cst_56 = arith.constant 0.000000e+00 : f32
    %90 = vector.broadcast %cst_56 : f32 to vector<8x1024xf32>
    %91 = arith.maximumf %89, %90 : vector<8x1024xf32>
    %92 = arith.truncf %91 : vector<8x1024xf32> to vector<8x1024xbf16>
    %c0_57 = arith.constant 0 : index
    %c0_58 = arith.constant 0 : index
    %c0_59 = arith.constant 0 : index
    %93 = vector.load %arg19[%c0_57, %c0_58, %c0_59] : memref<2x1024x128xbf16, #tpu.memory_space<vmem>>, vector<1x1024x128xbf16>
    %94 = vector.shape_cast %93 : vector<1x1024x128xbf16> to vector<1024x128xbf16>
    %cst_60 = arith.constant dense<0.000000e+00> : vector<8x128xf32>
    %95 = tpu.matmul %92, %94, %cst_60 {dimension_numbers = #tpu.dot_dimension_numbers<[1], [0], [0], [1], [0, 0, 1, 1], [], []>} : vector<8x1024xbf16>, vector<1024x128xbf16>, vector<8x128xf32> -> vector<8x128xf32>
    %c0_61 = arith.constant 0 : index
    %c0_62 = arith.constant 0 : index
    %c0_63 = arith.constant 0 : index
    %96 = vector.load %arg20[%c0_61, %c0_62, %c0_63] : memref<2x1x128xf32, #tpu.memory_space<vmem>>, vector<1x1x128xf32>
    %97 = vector.shape_cast %96 : vector<1x1x128xf32> to vector<1x128xf32>
    %98 = vector.broadcast %97 : vector<1x128xf32> to vector<8x128xf32>
    %99 = arith.addf %95, %98 : vector<8x128xf32>
    %100 = arith.addf %81, %99 : vector<8x128xf32>
    %c0_64 = arith.constant 0 : index
    %c0_65 = arith.constant 0 : index
    %c0_66 = arith.constant 0 : index
    %101 = vector.load %arg15[%c0_64, %c0_65, %c0_66] : memref<2x1x128xf32, #tpu.memory_space<vmem>>, vector<1x1x128xf32>
    %102 = vector.shape_cast %101 : vector<1x1x128xf32> to vector<1x128xf32>
    %c0_67 = arith.constant 0 : index
    %c0_68 = arith.constant 0 : index
    %c0_69 = arith.constant 0 : index
    %103 = vector.load %arg16[%c0_67, %c0_68, %c0_69] : memref<2x1x128xf32, #tpu.memory_space<vmem>>, vector<1x1x128xf32>
    %104 = vector.shape_cast %103 : vector<1x1x128xf32> to vector<1x128xf32>
    %cst_70 = arith.constant dense<0.000000e+00> : vector<8xf32>
    %105 = vector.multi_reduction <add>, %100, %cst_70 [1] : vector<8x128xf32> to vector<8xf32>
    %106 = vector.shape_cast %105 : vector<8xf32> to vector<8x1xf32>
    %cst_71 = arith.constant 1.280000e+02 : f32
    %107 = vector.broadcast %cst_71 : f32 to vector<8x1xf32>
    %108 = arith.divf %106, %107 : vector<8x1xf32>
    %109 = vector.broadcast %108 : vector<8x1xf32> to vector<8x128xf32>
    %110 = arith.subf %100, %109 : vector<8x128xf32>
    %111 = arith.mulf %110, %110 : vector<8x128xf32>
    %cst_72 = arith.constant dense<0.000000e+00> : vector<8xf32>
    %112 = vector.multi_reduction <add>, %111, %cst_72 [1] : vector<8x128xf32> to vector<8xf32>
    %113 = vector.shape_cast %112 : vector<8xf32> to vector<8x1xf32>
    %cst_73 = arith.constant 1.280000e+02 : f32
    %114 = vector.broadcast %cst_73 : f32 to vector<8x1xf32>
    %115 = arith.divf %113, %114 : vector<8x1xf32>
    %cst_74 = arith.constant 9.99999974E-6 : f32
    %116 = vector.broadcast %cst_74 : f32 to vector<8x1xf32>
    %117 = arith.addf %115, %116 : vector<8x1xf32>
    %118 = math.rsqrt %117 : vector<8x1xf32>
    %119 = vector.broadcast %118 : vector<8x1xf32> to vector<8x128xf32>
    %120 = arith.mulf %110, %119 : vector<8x128xf32>
    %121 = vector.broadcast %102 : vector<1x128xf32> to vector<8x128xf32>
    %122 = arith.mulf %120, %121 : vector<8x128xf32>
    %123 = vector.broadcast %104 : vector<1x128xf32> to vector<8x128xf32>
    %124 = arith.addf %122, %123 : vector<8x128xf32>
    %125 = arith.truncf %124 : vector<8x128xf32> to vector<8x128xbf16>
    %c1 = arith.constant 1 : index
    %c0_75 = arith.constant 0 : index
    %c0_76 = arith.constant 0 : index
    %126 = vector.load %arg10[%c1, %c0_75, %c0_76] : memref<2x128x384xbf16, #tpu.memory_space<vmem>>, vector<1x128x384xbf16>
    %127 = vector.shape_cast %126 : vector<1x128x384xbf16> to vector<128x384xbf16>
    %cst_77 = arith.constant dense<0.000000e+00> : vector<8x384xf32>
    %128 = tpu.matmul %125, %127, %cst_77 {dimension_numbers = #tpu.dot_dimension_numbers<[1], [0], [0], [1], [0, 0, 1, 1], [], []>} : vector<8x128xbf16>, vector<128x384xbf16>, vector<8x384xf32> -> vector<8x384xf32>
    %129 = vector.extract_strided_slice %128 {offsets = [0, 0], sizes = [8, 128], strides = [1, 1]} : vector<8x384xf32> to vector<8x128xf32>
    %130 = vector.extract_strided_slice %128 {offsets = [0, 128], sizes = [8, 128], strides = [1, 1]} : vector<8x384xf32> to vector<8x128xf32>
    %131 = vector.extract_strided_slice %128 {offsets = [0, 256], sizes = [8, 128], strides = [1, 1]} : vector<8x384xf32> to vector<8x128xf32>
    %132 = tpu.transpose %130, [1, 0] : vector<8x128xf32> -> vector<128x8xf32>
    %cst_78 = arith.constant dense<0.000000e+00> : vector<128x128xf32>
    %133 = tpu.matmul %132, %14, %cst_78 {dimension_numbers = #tpu.dot_dimension_numbers<[1], [0], [0], [1], [0, 0, 1, 1], [], []>} : vector<128x8xf32>, vector<8x128xf32>, vector<128x128xf32> -> vector<128x128xf32>
    %134 = arith.mulf %133, %16 : vector<128x128xf32>
    %135 = arith.truncf %134 : vector<128x128xf32> to vector<128x128xbf16>
    %136 = arith.truncf %129 : vector<8x128xf32> to vector<8x128xbf16>
    %cst_79 = arith.constant dense<0.000000e+00> : vector<8x128xf32>
    %137 = tpu.matmul %136, %135, %cst_79 {dimension_numbers = #tpu.dot_dimension_numbers<[1], [0], [0], [1], [0, 0, 1, 1], [], []>} : vector<8x128xbf16>, vector<128x128xbf16>, vector<8x128xf32> -> vector<8x128xf32>
    %138 = vector.broadcast %13 : vector<1x128xf32> to vector<8x128xf32>
    %139 = arith.addf %137, %138 : vector<8x128xf32>
    %cst_80 = arith.constant dense<0xFF800000> : vector<8xf32>
    %140 = vector.multi_reduction <maximumf>, %139, %cst_80 [1] : vector<8x128xf32> to vector<8xf32>
    %141 = vector.shape_cast %140 : vector<8xf32> to vector<8x1xf32>
    %142 = vector.broadcast %141 : vector<8x1xf32> to vector<8x128xf32>
    %143 = arith.subf %139, %142 : vector<8x128xf32>
    %144 = math.exp %143 : vector<8x128xf32>
    %145 = arith.truncf %144 : vector<8x128xf32> to vector<8x128xbf16>
    %cst_81 = arith.constant dense<0.000000e+00> : vector<128x128xf32>
    %146 = tpu.matmul %15, %131, %cst_81 {dimension_numbers = #tpu.dot_dimension_numbers<[1], [0], [0], [1], [0, 0, 1, 1], [], []>} : vector<128x8xf32>, vector<8x128xf32>, vector<128x128xf32> -> vector<128x128xf32>
    %147 = arith.mulf %146, %17 : vector<128x128xf32>
    %148 = arith.truncf %147 : vector<128x128xf32> to vector<128x128xbf16>
    %cst_82 = arith.constant dense<0.000000e+00> : vector<8x128xf32>
    %149 = tpu.matmul %145, %148, %cst_82 {dimension_numbers = #tpu.dot_dimension_numbers<[1], [0], [0], [1], [0, 0, 1, 1], [], []>} : vector<8x128xbf16>, vector<128x128xbf16>, vector<8x128xf32> -> vector<8x128xf32>
    %cst_83 = arith.constant dense<0.000000e+00> : vector<8x128xf32>
    %150 = tpu.matmul %145, %18, %cst_83 {dimension_numbers = #tpu.dot_dimension_numbers<[1], [0], [0], [1], [0, 0, 1, 1], [], []>} : vector<8x128xbf16>, vector<128x128xbf16>, vector<8x128xf32> -> vector<8x128xf32>
    %cst_84 = arith.constant 9.99999968E-21 : f32
    %151 = vector.broadcast %cst_84 : f32 to vector<8x128xf32>
    %152 = arith.maximumf %150, %151 : vector<8x128xf32>
    %153 = tpu.reciprocal %152 {approx = true} : vector<8x128xf32> -> vector<8x128xf32>
    %154 = arith.mulf %149, %153 : vector<8x128xf32>
    %155 = arith.truncf %154 : vector<8x128xf32> to vector<8x128xbf16>
    %c1_85 = arith.constant 1 : index
    %c0_86 = arith.constant 0 : index
    %c0_87 = arith.constant 0 : index
    %156 = vector.load %arg11[%c1_85, %c0_86, %c0_87] : memref<2x128x128xbf16, #tpu.memory_space<vmem>>, vector<1x128x128xbf16>
    %157 = vector.shape_cast %156 : vector<1x128x128xbf16> to vector<128x128xbf16>
    %cst_88 = arith.constant dense<0.000000e+00> : vector<8x128xf32>
    %158 = tpu.matmul %155, %157, %cst_88 {dimension_numbers = #tpu.dot_dimension_numbers<[1], [0], [0], [1], [0, 0, 1, 1], [], []>} : vector<8x128xbf16>, vector<128x128xbf16>, vector<8x128xf32> -> vector<8x128xf32>
    %c1_89 = arith.constant 1 : index
    %c0_90 = arith.constant 0 : index
    %c0_91 = arith.constant 0 : index
    %159 = vector.load %arg12[%c1_89, %c0_90, %c0_91] : memref<2x1x128xf32, #tpu.memory_space<vmem>>, vector<1x1x128xf32>
    %160 = vector.shape_cast %159 : vector<1x1x128xf32> to vector<1x128xf32>
    %161 = vector.broadcast %160 : vector<1x128xf32> to vector<8x128xf32>
    %162 = arith.addf %158, %161 : vector<8x128xf32>
    %163 = arith.addf %162, %124 : vector<8x128xf32>
    %c1_92 = arith.constant 1 : index
    %c0_93 = arith.constant 0 : index
    %c0_94 = arith.constant 0 : index
    %164 = vector.load %arg13[%c1_92, %c0_93, %c0_94] : memref<2x1x128xf32, #tpu.memory_space<vmem>>, vector<1x1x128xf32>
    %165 = vector.shape_cast %164 : vector<1x1x128xf32> to vector<1x128xf32>
    %c1_95 = arith.constant 1 : index
    %c0_96 = arith.constant 0 : index
    %c0_97 = arith.constant 0 : index
    %166 = vector.load %arg14[%c1_95, %c0_96, %c0_97] : memref<2x1x128xf32, #tpu.memory_space<vmem>>, vector<1x1x128xf32>
    %167 = vector.shape_cast %166 : vector<1x1x128xf32> to vector<1x128xf32>
    %cst_98 = arith.constant dense<0.000000e+00> : vector<8xf32>
    %168 = vector.multi_reduction <add>, %163, %cst_98 [1] : vector<8x128xf32> to vector<8xf32>
    %169 = vector.shape_cast %168 : vector<8xf32> to vector<8x1xf32>
    %cst_99 = arith.constant 1.280000e+02 : f32
    %170 = vector.broadcast %cst_99 : f32 to vector<8x1xf32>
    %171 = arith.divf %169, %170 : vector<8x1xf32>
    %172 = vector.broadcast %171 : vector<8x1xf32> to vector<8x128xf32>
    %173 = arith.subf %163, %172 : vector<8x128xf32>
    %174 = arith.mulf %173, %173 : vector<8x128xf32>
    %cst_100 = arith.constant dense<0.000000e+00> : vector<8xf32>
    %175 = vector.multi_reduction <add>, %174, %cst_100 [1] : vector<8x128xf32> to vector<8xf32>
    %176 = vector.shape_cast %175 : vector<8xf32> to vector<8x1xf32>
    %cst_101 = arith.constant 1.280000e+02 : f32
    %177 = vector.broadcast %cst_101 : f32 to vector<8x1xf32>
    %178 = arith.divf %176, %177 : vector<8x1xf32>
    %cst_102 = arith.constant 9.99999974E-6 : f32
    %179 = vector.broadcast %cst_102 : f32 to vector<8x1xf32>
    %180 = arith.addf %178, %179 : vector<8x1xf32>
    %181 = math.rsqrt %180 : vector<8x1xf32>
    %182 = vector.broadcast %181 : vector<8x1xf32> to vector<8x128xf32>
    %183 = arith.mulf %173, %182 : vector<8x128xf32>
    %184 = vector.broadcast %165 : vector<1x128xf32> to vector<8x128xf32>
    %185 = arith.mulf %183, %184 : vector<8x128xf32>
    %186 = vector.broadcast %167 : vector<1x128xf32> to vector<8x128xf32>
    %187 = arith.addf %185, %186 : vector<8x128xf32>
    %188 = arith.truncf %187 : vector<8x128xf32> to vector<8x128xbf16>
    %c1_103 = arith.constant 1 : index
    %c0_104 = arith.constant 0 : index
    %c0_105 = arith.constant 0 : index
    %189 = vector.load %arg17[%c1_103, %c0_104, %c0_105] : memref<2x128x1024xbf16, #tpu.memory_space<vmem>>, vector<1x128x1024xbf16>
    %190 = vector.shape_cast %189 : vector<1x128x1024xbf16> to vector<128x1024xbf16>
    %cst_106 = arith.constant dense<0.000000e+00> : vector<8x1024xf32>
    %191 = tpu.matmul %188, %190, %cst_106 {dimension_numbers = #tpu.dot_dimension_numbers<[1], [0], [0], [1], [0, 0, 1, 1], [], []>} : vector<8x128xbf16>, vector<128x1024xbf16>, vector<8x1024xf32> -> vector<8x1024xf32>
    %c1_107 = arith.constant 1 : index
    %c0_108 = arith.constant 0 : index
    %c0_109 = arith.constant 0 : index
    %192 = vector.load %arg18[%c1_107, %c0_108, %c0_109] : memref<2x1x1024xf32, #tpu.memory_space<vmem>>, vector<1x1x1024xf32>
    %193 = vector.shape_cast %192 : vector<1x1x1024xf32> to vector<1x1024xf32>
    %194 = vector.broadcast %193 : vector<1x1024xf32> to vector<8x1024xf32>
    %195 = arith.addf %191, %194 : vector<8x1024xf32>
    %cst_110 = arith.constant 0.000000e+00 : f32
    %196 = vector.broadcast %cst_110 : f32 to vector<8x1024xf32>
    %197 = arith.maximumf %195, %196 : vector<8x1024xf32>
    %198 = arith.truncf %197 : vector<8x1024xf32> to vector<8x1024xbf16>
    %c1_111 = arith.constant 1 : index
    %c0_112 = arith.constant 0 : index
    %c0_113 = arith.constant 0 : index
    %199 = vector.load %arg19[%c1_111, %c0_112, %c0_113] : memref<2x1024x128xbf16, #tpu.memory_space<vmem>>, vector<1x1024x128xbf16>
    %200 = vector.shape_cast %199 : vector<1x1024x128xbf16> to vector<1024x128xbf16>
    %cst_114 = arith.constant dense<0.000000e+00> : vector<8x128xf32>
    %201 = tpu.matmul %198, %200, %cst_114 {dimension_numbers = #tpu.dot_dimension_numbers<[1], [0], [0], [1], [0, 0, 1, 1], [], []>} : vector<8x1024xbf16>, vector<1024x128xbf16>, vector<8x128xf32> -> vector<8x128xf32>
    %c1_115 = arith.constant 1 : index
    %c0_116 = arith.constant 0 : index
    %c0_117 = arith.constant 0 : index
    %202 = vector.load %arg20[%c1_115, %c0_116, %c0_117] : memref<2x1x128xf32, #tpu.memory_space<vmem>>, vector<1x1x128xf32>
    %203 = vector.shape_cast %202 : vector<1x1x128xf32> to vector<1x128xf32>
    %204 = vector.broadcast %203 : vector<1x128xf32> to vector<8x128xf32>
    %205 = arith.addf %201, %204 : vector<8x128xf32>
    %206 = arith.addf %187, %205 : vector<8x128xf32>
    %c1_118 = arith.constant 1 : index
    %c0_119 = arith.constant 0 : index
    %c0_120 = arith.constant 0 : index
    %207 = vector.load %arg15[%c1_118, %c0_119, %c0_120] : memref<2x1x128xf32, #tpu.memory_space<vmem>>, vector<1x1x128xf32>
    %208 = vector.shape_cast %207 : vector<1x1x128xf32> to vector<1x128xf32>
    %c1_121 = arith.constant 1 : index
    %c0_122 = arith.constant 0 : index
    %c0_123 = arith.constant 0 : index
    %209 = vector.load %arg16[%c1_121, %c0_122, %c0_123] : memref<2x1x128xf32, #tpu.memory_space<vmem>>, vector<1x1x128xf32>
    %210 = vector.shape_cast %209 : vector<1x1x128xf32> to vector<1x128xf32>
    %cst_124 = arith.constant dense<0.000000e+00> : vector<8xf32>
    %211 = vector.multi_reduction <add>, %206, %cst_124 [1] : vector<8x128xf32> to vector<8xf32>
    %212 = vector.shape_cast %211 : vector<8xf32> to vector<8x1xf32>
    %cst_125 = arith.constant 1.280000e+02 : f32
    %213 = vector.broadcast %cst_125 : f32 to vector<8x1xf32>
    %214 = arith.divf %212, %213 : vector<8x1xf32>
    %215 = vector.broadcast %214 : vector<8x1xf32> to vector<8x128xf32>
    %216 = arith.subf %206, %215 : vector<8x128xf32>
    %217 = arith.mulf %216, %216 : vector<8x128xf32>
    %cst_126 = arith.constant dense<0.000000e+00> : vector<8xf32>
    %218 = vector.multi_reduction <add>, %217, %cst_126 [1] : vector<8x128xf32> to vector<8xf32>
    %219 = vector.shape_cast %218 : vector<8xf32> to vector<8x1xf32>
    %cst_127 = arith.constant 1.280000e+02 : f32
    %220 = vector.broadcast %cst_127 : f32 to vector<8x1xf32>
    %221 = arith.divf %219, %220 : vector<8x1xf32>
    %cst_128 = arith.constant 9.99999974E-6 : f32
    %222 = vector.broadcast %cst_128 : f32 to vector<8x1xf32>
    %223 = arith.addf %221, %222 : vector<8x1xf32>
    %224 = math.rsqrt %223 : vector<8x1xf32>
    %225 = vector.broadcast %224 : vector<8x1xf32> to vector<8x128xf32>
    %226 = arith.mulf %216, %225 : vector<8x128xf32>
    %227 = vector.broadcast %208 : vector<1x128xf32> to vector<8x128xf32>
    %228 = arith.mulf %226, %227 : vector<8x128xf32>
    %229 = vector.broadcast %210 : vector<1x128xf32> to vector<8x128xf32>
    %230 = arith.addf %228, %229 : vector<8x128xf32>
    %231 = arith.truncf %230 : vector<8x128xf32> to vector<8x128xbf16>
    %c0_129 = arith.constant 0 : index
    %c0_130 = arith.constant 0 : index
    %232 = vector.load %arg21[%c0_129, %c0_130] : memref<128x7xbf16, #tpu.memory_space<vmem>>, vector<128x7xbf16>
    %cst_131 = arith.constant dense<0.000000e+00> : vector<8x7xf32>
    %233 = tpu.matmul %231, %232, %cst_131 {dimension_numbers = #tpu.dot_dimension_numbers<[1], [0], [0], [1], [0, 0, 1, 1], [], []>} : vector<8x128xbf16>, vector<128x7xbf16>, vector<8x7xf32> -> vector<8x7xf32>
    %c0_132 = arith.constant 0 : index
    %c0_133 = arith.constant 0 : index
    %234 = vector.load %arg22[%c0_132, %c0_133] : memref<1x7xf32, #tpu.memory_space<vmem>>, vector<1x7xf32>
    %235 = vector.broadcast %234 : vector<1x7xf32> to vector<8x7xf32>
    %236 = arith.addf %233, %235 : vector<8x7xf32>
    %c0_134 = arith.constant 0 : index
    %c0_135 = arith.constant 0 : index
    %c0_136 = arith.constant 0 : index
    %237 = vector.load %arg23[%c0_134, %c0_135, %c0_136] : memref<1x8x7xf32, #tpu.memory_space<vmem>>, vector<1x8x7xf32>
    %238 = vector.shape_cast %237 : vector<1x8x7xf32> to vector<8x7xf32>
    %239 = vector.shape_cast %236 : vector<8x7xf32> to vector<1x8x7xf32>
    tpu.vector_store %arg23[%c0_134, %c0_135, %c0_136], %239 {strides = array<i32>} : memref<1x8x7xf32, #tpu.memory_space<vmem>>, vector<1x8x7xf32>,
    return
  }
  func.func @transform_0(%arg0: i32) -> (i32, i32, i32) {
    %c0_i32 = arith.constant 0 : i32
    %c0_i32_0 = arith.constant 0 : i32
    %c0_i32_1 = arith.constant 0 : i32
    return %arg0, %c0_i32, %c0_i32_0 : i32, i32, i32
  }
  func.func @transform_1(%arg0: i32) -> (i32, i32, i32) {
    %c0_i32 = arith.constant 0 : i32
    %c0_i32_0 = arith.constant 0 : i32
    %c0_i32_1 = arith.constant 0 : i32
    return %arg0, %c0_i32, %c0_i32_0 : i32, i32, i32
  }
  func.func @transform_2(%arg0: i32) -> (i32, i32) {
    %c0_i32 = arith.constant 0 : i32
    %c0_i32_0 = arith.constant 0 : i32
    %c0_i32_1 = arith.constant 0 : i32
    return %c0_i32, %c0_i32_0 : i32, i32
  }
  func.func @transform_3(%arg0: i32) -> (i32, i32) {
    %c0_i32 = arith.constant 0 : i32
    %c0_i32_0 = arith.constant 0 : i32
    %c0_i32_1 = arith.constant 0 : i32
    return %c0_i32, %c0_i32_0 : i32, i32
  }
  func.func @transform_4(%arg0: i32) -> (i32, i32) {
    %c0_i32 = arith.constant 0 : i32
    %c0_i32_0 = arith.constant 0 : i32
    %c0_i32_1 = arith.constant 0 : i32
    return %c0_i32, %c0_i32_0 : i32, i32
  }
  func.func @transform_5(%arg0: i32) -> (i32, i32) {
    %c0_i32 = arith.constant 0 : i32
    %c0_i32_0 = arith.constant 0 : i32
    %c0_i32_1 = arith.constant 0 : i32
    return %c0_i32, %c0_i32_0 : i32, i32
  }
  func.func @transform_6(%arg0: i32) -> (i32, i32) {
    %c0_i32 = arith.constant 0 : i32
    %c0_i32_0 = arith.constant 0 : i32
    %c0_i32_1 = arith.constant 0 : i32
    return %c0_i32, %c0_i32_0 : i32, i32
  }
  func.func @transform_7(%arg0: i32) -> (i32, i32) {
    %c0_i32 = arith.constant 0 : i32
    %c0_i32_0 = arith.constant 0 : i32
    %c0_i32_1 = arith.constant 0 : i32
    return %c0_i32, %c0_i32_0 : i32, i32
  }
  func.func @transform_8(%arg0: i32) -> (i32, i32) {
    %c0_i32 = arith.constant 0 : i32
    %c0_i32_0 = arith.constant 0 : i32
    %c0_i32_1 = arith.constant 0 : i32
    return %c0_i32, %c0_i32_0 : i32, i32
  }
  func.func @transform_9(%arg0: i32) -> (i32, i32, i32) {
    %c0_i32 = arith.constant 0 : i32
    %c0_i32_0 = arith.constant 0 : i32
    %c0_i32_1 = arith.constant 0 : i32
    %c0_i32_2 = arith.constant 0 : i32
    return %c0_i32, %c0_i32_0, %c0_i32_1 : i32, i32, i32
  }
  func.func @transform_10(%arg0: i32) -> (i32, i32, i32) {
    %c0_i32 = arith.constant 0 : i32
    %c0_i32_0 = arith.constant 0 : i32
    %c0_i32_1 = arith.constant 0 : i32
    %c0_i32_2 = arith.constant 0 : i32
    return %c0_i32, %c0_i32_0, %c0_i32_1 : i32, i32, i32
  }
  func.func @transform_11(%arg0: i32) -> (i32, i32, i32) {
    %c0_i32 = arith.constant 0 : i32
    %c0_i32_0 = arith.constant 0 : i32
    %c0_i32_1 = arith.constant 0 : i32
    %c0_i32_2 = arith.constant 0 : i32
    return %c0_i32, %c0_i32_0, %c0_i32_1 : i32, i32, i32
  }
  func.func @transform_12(%arg0: i32) -> (i32, i32, i32) {
    %c0_i32 = arith.constant 0 : i32
    %c0_i32_0 = arith.constant 0 : i32
    %c0_i32_1 = arith.constant 0 : i32
    %c0_i32_2 = arith.constant 0 : i32
    return %c0_i32, %c0_i32_0, %c0_i32_1 : i32, i32, i32
  }
  func.func @transform_13(%arg0: i32) -> (i32, i32, i32) {
    %c0_i32 = arith.constant 0 : i32
    %c0_i32_0 = arith.constant 0 : i32
    %c0_i32_1 = arith.constant 0 : i32
    %c0_i32_2 = arith.constant 0 : i32
    return %c0_i32, %c0_i32_0, %c0_i32_1 : i32, i32, i32
  }
  func.func @transform_14(%arg0: i32) -> (i32, i32, i32) {
    %c0_i32 = arith.constant 0 : i32
    %c0_i32_0 = arith.constant 0 : i32
    %c0_i32_1 = arith.constant 0 : i32
    %c0_i32_2 = arith.constant 0 : i32
    return %c0_i32, %c0_i32_0, %c0_i32_1 : i32, i32, i32
  }
  func.func @transform_15(%arg0: i32) -> (i32, i32, i32) {
    %c0_i32 = arith.constant 0 : i32
    %c0_i32_0 = arith.constant 0 : i32
    %c0_i32_1 = arith.constant 0 : i32
    %c0_i32_2 = arith.constant 0 : i32
    return %c0_i32, %c0_i32_0, %c0_i32_1 : i32, i32, i32
  }
  func.func @transform_16(%arg0: i32) -> (i32, i32, i32) {
    %c0_i32 = arith.constant 0 : i32
    %c0_i32_0 = arith.constant 0 : i32
    %c0_i32_1 = arith.constant 0 : i32
    %c0_i32_2 = arith.constant 0 : i32
    return %c0_i32, %c0_i32_0, %c0_i32_1 : i32, i32, i32
  }
  func.func @transform_17(%arg0: i32) -> (i32, i32, i32) {
    %c0_i32 = arith.constant 0 : i32
    %c0_i32_0 = arith.constant 0 : i32
    %c0_i32_1 = arith.constant 0 : i32
    %c0_i32_2 = arith.constant 0 : i32
    return %c0_i32, %c0_i32_0, %c0_i32_1 : i32, i32, i32
  }
  func.func @transform_18(%arg0: i32) -> (i32, i32, i32) {
    %c0_i32 = arith.constant 0 : i32
    %c0_i32_0 = arith.constant 0 : i32
    %c0_i32_1 = arith.constant 0 : i32
    %c0_i32_2 = arith.constant 0 : i32
    return %c0_i32, %c0_i32_0, %c0_i32_1 : i32, i32, i32
  }
  func.func @transform_19(%arg0: i32) -> (i32, i32, i32) {
    %c0_i32 = arith.constant 0 : i32
    %c0_i32_0 = arith.constant 0 : i32
    %c0_i32_1 = arith.constant 0 : i32
    %c0_i32_2 = arith.constant 0 : i32
    return %c0_i32, %c0_i32_0, %c0_i32_1 : i32, i32, i32
  }
  func.func @transform_20(%arg0: i32) -> (i32, i32) {
    %c0_i32 = arith.constant 0 : i32
    %c0_i32_0 = arith.constant 0 : i32
    %c0_i32_1 = arith.constant 0 : i32
    return %c0_i32, %c0_i32_0 : i32, i32
  }
  func.func @transform_21(%arg0: i32) -> (i32, i32) {
    %c0_i32 = arith.constant 0 : i32
    %c0_i32_0 = arith.constant 0 : i32
    %c0_i32_1 = arith.constant 0 : i32
    return %c0_i32, %c0_i32_0 : i32, i32
  }
  func.func @transform_22(%arg0: i32) -> (i32, i32, i32) {
    %c0_i32 = arith.constant 0 : i32
    %c0_i32_0 = arith.constant 0 : i32
    %c0_i32_1 = arith.constant 0 : i32
    return %arg0, %c0_i32, %c0_i32_0 : i32, i32, i32
  }
}

</mosaic_0001>

<bundles_post_ra>
// kernel: tener_forward.1
= control target key start
LH: loop header
LB: loop body
LE: loop exit
PB: predicated region body
PF: predicated region fallthrough
CT: control target
= control target key end

     0   :  { %s9863_s0 = inlined_call_operand.vmem [shape: f32[2,8,100], index: 0, kind: input, shape index: {}]   ;;  %s9864_s1 = inlined_call_operand.vmem [shape: f32[2,1,128], index: 1, kind: input, shape index: {}]   ;;  %s9865_s2 = inlined_call_operand.vmem [shape: f32[8,128], index: 2, kind: input, shape index: {}]   ;;  %s9866_s3 = inlined_call_operand.vmem [shape: f32[8,128], index: 3, kind: input, shape index: {}]   ;;  %s9867_s4 = inlined_call_operand.vmem [shape: f32[128,8], index: 4, kind: input, shape index: {}]   ;;  %s9868_s5 = inlined_call_operand.vmem [shape: f32[128,128], index: 5, kind: input, shape index: {}, may-alias: {5,6}]   ;;  %s9869_s6 = inlined_call_operand.vmem [shape: f32[128,128], index: 6, kind: input, shape index: {}, may-alias: {5,6}]   ;;  %s9870_s7 = inlined_call_operand.vmem [shape: bf16[100,128], index: 7, kind: input, shape index: {}]   ;;  %s9871_s8 = inlined_call_operand.vmem [shape: f32[1,128], index: 8, kind: input, shape index: {}]   ;;  %s9872_s9 = inlined_call_operand.vmem [shape: bf16[2,128,384], index: 9, kind: input, shape index: {}]   ;;  %s9873_s10 = inlined_call_operand.hbm [shape: bf16[2,128,128], index: 10, kind: input, shape index: {}]   ;;  %s9874_s11 = inlined_call_operand.hbm [shape: f32[2,1,128], index: 11, kind: input, shape index: {}]   ;;  %s9875_s12 = inlined_call_operand.hbm [shape: f32[2,1,128], index: 12, kind: input, shape index: {}]   ;;  %s9876_s13 = inlined_call_operand.hbm [shape: f32[2,1,128], index: 13, kind: input, shape index: {}]   ;;  %s9877_s14 = inlined_call_operand.hbm [shape: f32[2,1,128], index: 14, kind: input, shape index: {}]   ;;  %s9878_s15 = inlined_call_operand.hbm [shape: f32[2,1,128], index: 15, kind: input, shape index: {}]   ;;  %s9879_s16 = inlined_call_operand.vmem [shape: bf16[2,128,1024], index: 16, kind: input, shape index: {}]   ;;  %s9880_s17 = inlined_call_operand.hbm [shape: f32[2,1,1024], index: 17, kind: input, shape index: {}]   ;;  %s9881_s18 = inlined_call_operand.vmem [shape: bf16[2,1024,128], index: 18, kind: input, shape index: {}]   ;;  %s9882_s19 = inlined_call_operand.hbm [shape: f32[2,1,128], index: 19, kind: input, shape index: {}]   ;;  %s9883_s20 = inlined_call_operand.vmem [shape: bf16[128,7], index: 20, kind: input, shape index: {}]   ;;  %s9884_s21 = inlined_call_operand.hbm [shape: f32[1,7], index: 21, kind: input, shape index: {}]   ;;  %s9885_s22 = inlined_call_operand.vmem [shape: f32[2,8,7], index: 22, kind: output, shape index: {}]  }
   0x1   :  { %9898 = sst [smem:[#allocation22_spill]] %s9863_s0 }
   0x2   :  { %9899 = sst [smem:[#allocation23_spill]] %s9864_s1 }
   0x3   :  { %9900 = sst [smem:[#allocation24_spill]] %s9865_s2 }
   0x4   :  { %9901 = sst [smem:[#allocation25_spill]] %s9866_s3 }
   0x5   :  { %9902 = sst [smem:[#allocation26_spill]] %s9867_s4 }
   0x6   :  { %9903 = sst [smem:[#allocation27_spill]] %s9868_s5 }
   0x7   :  { %9904 = sst [smem:[#allocation28_spill]] %s9869_s6 }
   0x8   :  { %9905 = sst [smem:[#allocation29_spill]] %s9879_s16 }
   0x9   :  { %9906 = sst [smem:[#allocation30_spill]] %s9881_s18 }
   0xa   :  { %9907 = sst [smem:[#allocation31_spill]] %s9883_s20 }
   0xb   :  { %9908 = sst [smem:[#allocation32_spill]] %s9885_s22 }
   0xc   :  { %27 = vsyncpa [#allocation3], 0 }
   0xd   :  { %28 = vsyncpa [#allocation5], 0 }
   0xe   :  { %29 = vsyncpa [#allocation8], 0 }
   0xf   :  { %30 = vsyncpa [#allocation11], 0 }
  0x10   :  { %31 = vsyncpa [#allocation14], 0  ;;  %s7981_s3 = smov 0  }
  0x11 LB: > { %9909 = sst [smem:[#allocation21_spill]] %s7846_s3  ;;  %s7848_s28 = smov [#allocation4]   ;;  %s7846_s3 = sphi %s7981_s3, %s37_s3  }
  0x12   : > { %s589_s29 = sshll.u32 %s7848_s28, 4  ;;  %s7987_s30 = sadd.s32 4294967295, %s7846_s3   ;;  %s7992_s29 = int_to_ptr.vmem [resolvable:$true] %s589_s29 }
  0x13   : > { %p5814_p0 = scmp.ge.s32.totalorder %s7846_s3, 1  ;;  %p540_p1 = scmp.lt.s32.totalorder %s7846_s3, 3 }
  0x14   : > { %p9894_p2 = scmp.eq.s32.totalorder %s7987_s30, 0  ;;  %s7849_s0 = smov [#allocation7]  }
  0x15   : > { %p7994_p3 = pnand %p5814_p0, %p540_p1  ;;  %s615_s23 = sshll.u32 %s7849_s0, 4  ;;  %s8000_s23 = int_to_ptr.vmem [resolvable:$true] %s615_s23 }
  0x16   : > { %s7850_s5 = smov [#allocation10]   ;;  %s7851_s6 = smov [#allocation13]  }
  0x17   : > { %s9910_s4 = scalar_select %p7994_p3, 1, 0 }
  0x18   : > { %p7207_p4 = pneg %p7994_p3  ;;  %s641_s24 = sshll.u32 %s7850_s5, 4  ;;  %s8008_s24 = int_to_ptr.vmem [resolvable:$true] %s641_s24 }
  0x19   : > { %s8010_s25 = sshll.u32 %s7851_s6, 4  ;;  %s7568_s27 = scalar_lea.hbm %s9874_s11, 32  ;;  %s674_s25 = int_to_ptr.vmem [resolvable:$true] %s8010_s25 }
  0x1a   : > { %p8004_p5 = pnand %p9894_p2, %p7207_p4  ;;  %p7569_p6 = scmp.ne.s32.totalorder %s9874_s11, %s7568_s27 }
  0x1b   : > { %p7575_p10 = scmp.lt.u32.totalorder %s7568_s27, %s9874_s11 }
  0x1c   : > { %p8020_p7 = pneg %p8004_p5 }
  0x1e   : > { %p7571_p8 = pnand %p8020_p7, %p7569_p6 }
  0x20   : > { %p7572_p9 = pneg %p7571_p8 }
  0x22   : > { %p7577_p11 = pnand %p7575_p10, %p7572_p9 }
  0x24   : > { %7580 = shalt.err (!%p7577_p11)
}
  0x25   : > { %s7581_s26 = scalar_lea.vmem %s7992_s29, 32  ;;  %p7589_p1 = scmp.lt.s32.totalorder %s7992_s29, %s7992_s29 }
  0x26   : > { %p7582_p12 = scmp.ne.s32.totalorder %s7992_s29, %s7581_s26  ;;  %p7590_p4 = scmp.lt.s32.totalorder %s7581_s26, %s7581_s26 }
  0x28   : > { %p7584_p13 = pnand %p7582_p12, %p8020_p7  ;;  %p7591_p6 = por %p7590_p4, %p7589_p1 }
  0x2a   : > { %p7585_p0 = pneg %p7584_p13 }
  0x2c   : > { %p7592_p8 = pnand %p7591_p6, %p7585_p0 }
  0x2e   : > { %7595 = shalt.err (!%p7592_p8)
}
  0x2f   : > { %s9896_s2 = smov 16   ;;  %s7853_s27 = smov 1  }
  0x30   : > { %7213 = dma.hbm_to_vmem [thread:$0]  (!%p8004_p5), %s9874_s11, 32, %s7992_s29, [#allocation5], %s9896_s2, %s9896_s2, %s7853_s27  }
  0x31   : > { %s7596_s26 = scalar_lea.hbm %s9876_s13, 32 }
  0x32   : > { %p7597_p9 = scmp.ne.s32.totalorder %s9876_s13, %s7596_s26  ;;  %p7603_p12 = scmp.lt.u32.totalorder %s7596_s26, %s9876_s13 }
  0x34   : > { %p7599_p10 = pnand %p7597_p9, %p8020_p7 }
  0x36   : > { %p7600_p11 = pneg %p7599_p10 }
  0x38   : > { %p7605_p13 = pnand %p7603_p12, %p7600_p11 }
  0x3a   : > { %7608 = shalt.err (!%p7605_p13)
}
  0x3b   : > { %s7609_s29 = scalar_lea.vmem %s8000_s23, 32  ;;  %p7617_p6 = scmp.lt.s32.totalorder %s8000_s23, %s8000_s23 }
  0x3c   : > { %p7610_p0 = scmp.ne.s32.totalorder %s8000_s23, %s7609_s29  ;;  %p7618_p8 = scmp.lt.s32.totalorder %s7609_s29, %s7609_s29 }
  0x3e   : > { %p7612_p1 = pnand %p7610_p0, %p8020_p7  ;;  %p7619_p9 = por %p7618_p8, %p7617_p6 }
  0x40   : > { %p7613_p4 = pneg %p7612_p1 }
  0x42   : > { %p7620_p10 = pnand %p7619_p9, %p7613_p4 }
  0x44   : > { %7623 = shalt.err (!%p7620_p10)
}
  0x45   : > { %7219 = dma.hbm_to_vmem [thread:$0]  (!%p8004_p5), %s9876_s13, 32, %s8000_s23, [#allocation8], %s9896_s2, %s9896_s2, %s7853_s27  }
  0x46   : > { %s7624_s28 = scalar_lea.hbm %s9878_s15, 32 }
  0x47   : > { %p7625_p11 = scmp.ne.s32.totalorder %s9878_s15, %s7624_s28  ;;  %p7631_p0 = scmp.lt.u32.totalorder %s7624_s28, %s9878_s15 }
  0x49   : > { %p7627_p12 = pnand %p7625_p11, %p8020_p7 }
  0x4b   : > { %p7628_p13 = pneg %p7627_p12 }
  0x4d   : > { %p7633_p1 = pnand %p7631_p0, %p7628_p13 }
  0x4f   : > { %7636 = shalt.err (!%p7633_p1)
}
  0x50   : > { %s7637_s23 = scalar_lea.vmem %s8008_s24, 32  ;;  %p7645_p9 = scmp.lt.s32.totalorder %s8008_s24, %s8008_s24 }
  0x51   : > { %p7638_p4 = scmp.ne.s32.totalorder %s8008_s24, %s7637_s23  ;;  %p7646_p10 = scmp.lt.s32.totalorder %s7637_s23, %s7637_s23 }
  0x53   : > { %p7640_p6 = pnand %p7638_p4, %p8020_p7  ;;  %p7647_p11 = por %p7646_p10, %p7645_p9 }
  0x55   : > { %p7641_p8 = pneg %p7640_p6 }
  0x57   : > { %p7648_p12 = pnand %p7647_p11, %p7641_p8 }
  0x59   : > { %7651 = shalt.err (!%p7648_p12)
}
  0x5a   : > { %7225 = dma.hbm_to_vmem [thread:$0]  (!%p8004_p5), %s9878_s15, 32, %s8008_s24, [#allocation11], %s9896_s2, %s9896_s2, %s7853_s27  }
  0x5b   : > { %s7652_s22 = scalar_lea.hbm %s9882_s19, 32 }
  0x5c   : > { %p7653_p13 = scmp.ne.s32.totalorder %s9882_s19, %s7652_s22  ;;  %p7659_p4 = scmp.lt.u32.totalorder %s7652_s22, %s9882_s19 }
  0x5e   : > { %p7655_p0 = pnand %p7653_p13, %p8020_p7 }
  0x60   : > { %p7656_p1 = pneg %p7655_p0 }
  0x62   : > { %p7661_p6 = pnand %p7659_p4, %p7656_p1 }
  0x64   : > { %7664 = shalt.err (!%p7661_p6)
}
  0x65   : > { %s7665_s26 = scalar_lea.vmem %s674_s25, 32  ;;  %p7673_p11 = scmp.lt.s32.totalorder %s674_s25, %s674_s25 }
  0x66   : > { %p7666_p8 = scmp.ne.s32.totalorder %s674_s25, %s7665_s26  ;;  %p7674_p12 = scmp.lt.s32.totalorder %s7665_s26, %s7665_s26 }
  0x68   : > { %p7668_p9 = pnand %p7666_p8, %p8020_p7  ;;  %p7675_p2 = por %p7674_p12, %p7673_p11 }
  0x6a   : > { %p7669_p10 = pneg %p7668_p9 }
  0x6c   : > { %p7676_p3 = pnand %p7675_p2, %p7669_p10 }
  0x6e   : > { %7679 = shalt.err (!%p7676_p3)
}
  0x6f   : > { %7231 = dma.hbm_to_vmem [thread:$0]  (!%p8004_p5), %s9882_s19, 32, %s674_s25, [#allocation14], %s9896_s2, %s9896_s2, %s7853_s27  }
  0x70   : > { %s7854_s29 = smov [#allocation2]   ;;  %s7680_s22 = scalar_lea.hbm %s9873_s10, 2048 }
  0x71   : > { %s576_s16 = sshll.u32 %s7854_s29, 4  ;;  %p7681_p2 = scmp.ne.s32.totalorder %s9873_s10, %s7680_s22  ;;  %s577_s16 = int_to_ptr.vmem [resolvable:$true] %s576_s16 }
  0x72   : > { %p7687_p0 = scmp.lt.u32.totalorder %s7680_s22, %s9873_s10 }
  0x73   : > { %p7683_p3 = pnand %p7681_p2, %p8020_p7 }
  0x75   : > { %p7684_p13 = pneg %p7683_p3 }
  0x77   : > { %p7689_p1 = pnand %p7687_p0, %p7684_p13 }
  0x79   : > { %7692 = shalt.err (!%p7689_p1)
}
  0x7a   : > { %s7693_s25 = scalar_lea.vmem %s577_s16, 2048  ;;  %p7701_p9 = scmp.lt.s32.totalorder %s577_s16, %s577_s16 }
  0x7b   : > { %p7694_p4 = scmp.ne.s32.totalorder %s577_s16, %s7693_s25  ;;  %p7702_p10 = scmp.lt.s32.totalorder %s7693_s25, %s7693_s25 }
  0x7d   : > { %p7696_p6 = pnand %p7694_p4, %p8020_p7  ;;  %p7703_p11 = por %p7702_p10, %p7701_p9 }
  0x7f   : > { %p7697_p8 = pneg %p7696_p6 }
  0x81   : > { %p7704_p12 = pnand %p7703_p11, %p7697_p8 }
  0x83   : > { %7707 = shalt.err (!%p7704_p12)
}
  0x84   : > { %s7855_s26 = smov 64   ;;  %s7856_s24 = smov 4  }
  0x85   : > { %7210 = dma.hbm_to_vmem [thread:$0]  (!%p8004_p5), %s9873_s10, 2048, %s577_s16, [#allocation3], %s7855_s26, %s7855_s26, %s7856_s24  }
  0x86   : > { %s7857_s18 = smov [#allocation6]   ;;  %s7858_s22 = smov [#allocation9]  }
  0x87   : > { %s602_s20 = sshll.u32 %s7857_s18, 4  ;;  %s628_s28 = sshll.u32 %s7858_s22, 4  ;;  %s603_s20 = int_to_ptr.vmem [resolvable:$true] %s602_s20  ;;  %s8136_s28 = int_to_ptr.vmem [resolvable:$true] %s628_s28 }
  0x88   : > { %s7708_s6 = scalar_lea.hbm %s9875_s12, 32 }
  0x89   : > { %p7709_p2 = scmp.ne.s32.totalorder %s9875_s12, %s7708_s6  ;;  %p7715_p0 = scmp.lt.u32.totalorder %s7708_s6, %s9875_s12 }
  0x8b   : > { %p7711_p3 = pnand %p7709_p2, %p8020_p7 }
  0x8d   : > { %p7712_p13 = pneg %p7711_p3 }
  0x8f   : > { %p7717_p1 = pnand %p7715_p0, %p7712_p13 }
  0x91   : > { %7720 = shalt.err (!%p7717_p1)
}
  0x92   : > { %s7721_s26 = scalar_lea.vmem %s603_s20, 32  ;;  %p7729_p9 = scmp.lt.s32.totalorder %s603_s20, %s603_s20 }
  0x93   : > { %p7722_p4 = scmp.ne.s32.totalorder %s603_s20, %s7721_s26  ;;  %p7730_p10 = scmp.lt.s32.totalorder %s7721_s26, %s7721_s26 }
  0x95   : > { %p7724_p6 = pnand %p7722_p4, %p8020_p7  ;;  %p7731_p11 = por %p7730_p10, %p7729_p9 }
  0x97   : > { %p7725_p8 = pneg %p7724_p6 }
  0x99   : > { %p7732_p12 = pnand %p7731_p11, %p7725_p8 }
  0x9b   : > { %7735 = shalt.err (!%p7732_p12)
}
  0x9c   : > { %s9913_s2 = smov 16   ;;  %s7736_s0 = scalar_lea.hbm %s9877_s14, 32 }
  0x9d   : > { %7216 = dma.hbm_to_vmem [thread:$0]  (!%p8004_p5), %s9875_s12, 32, %s603_s20, [#allocation5], %s9913_s2, %s9913_s2, %s7853_s27  }
  0x9e   : > { %p7737_p2 = scmp.ne.s32.totalorder %s9877_s14, %s7736_s0  ;;  %p7743_p0 = scmp.lt.u32.totalorder %s7736_s0, %s9877_s14 }
  0xa0   : > { %p7739_p3 = pnand %p7737_p2, %p8020_p7 }
  0xa2   : > { %p7740_p13 = pneg %p7739_p3 }
  0xa4   : > { %p7745_p1 = pnand %p7743_p0, %p7740_p13 }
  0xa6   : > { %7748 = shalt.err (!%p7745_p1)
}
  0xa7   : > { %s7749_s20 = scalar_lea.vmem %s8136_s28, 32  ;;  %p7757_p9 = scmp.lt.s32.totalorder %s8136_s28, %s8136_s28 }
  0xa8   : > { %p7750_p4 = scmp.ne.s32.totalorder %s8136_s28, %s7749_s20  ;;  %p7758_p10 = scmp.lt.s32.totalorder %s7749_s20, %s7749_s20 }
  0xaa   : > { %p7752_p6 = pnand %p7750_p4, %p8020_p7  ;;  %p7759_p11 = por %p7758_p10, %p7757_p9 }
  0xac   : > { %p7753_p8 = pneg %p7752_p6 }
  0xae   : > { %p7760_p12 = pnand %p7759_p11, %p7753_p8 }
  0xb0   : > { %7763 = shalt.err (!%p7760_p12)
}
  0xb1   : > { %7222 = dma.hbm_to_vmem [thread:$0]  (!%p8004_p5), %s9877_s14, 32, %s8136_s28, [#allocation8], %s9913_s2, %s9913_s2, %s7853_s27  }
  0xb2   : > { %s7859_s24 = smov [#allocation12]   ;;  %s7764_s0 = scalar_lea.hbm %s9880_s17, 256 }
  0xb3   : > { %s657_s29 = sshll.u32 %s7859_s24, 4  ;;  %p7765_p2 = scmp.ne.s32.totalorder %s9880_s17, %s7764_s0  ;;  %s658_s29 = int_to_ptr.vmem [resolvable:$true] %s657_s29 }
  0xb4   : > { %p7771_p0 = scmp.lt.u32.totalorder %s7764_s0, %s9880_s17 }
  0xb5   : > { %p7767_p3 = pnand %p7765_p2, %p8020_p7 }
  0xb7   : > { %p7768_p13 = pneg %p7767_p3 }
  0xb9   : > { %p7773_p1 = pnand %p7771_p0, %p7768_p13 }
  0xbb   : > { %7776 = shalt.err (!%p7773_p1)
}
  0xbc   : > { %s7777_s27 = scalar_lea.vmem %s658_s29, 256  ;;  %p7785_p9 = scmp.lt.s32.totalorder %s658_s29, %s658_s29 }
  0xbd   : > { %p7778_p4 = scmp.ne.s32.totalorder %s658_s29, %s7777_s27  ;;  %p7786_p10 = scmp.lt.s32.totalorder %s7777_s27, %s7777_s27 }
  0xbf   : > { %p7780_p6 = pnand %p7778_p4, %p8020_p7  ;;  %p7787_p11 = por %p7786_p10, %p7785_p9 }
  0xc1   : > { %p7781_p8 = pneg %p7780_p6 }
  0xc3   : > { %p7788_p12 = pnand %p7787_p11, %p7781_p8 }
  0xc5   : > { %7791 = shalt.err (!%p7788_p12)
}
  0xc6   : > { %s7860_s28 = smov 128   ;;  %s7861_s2 = smov 8  }
  0xc7   : > { %7228 = dma.hbm_to_vmem [thread:$0]  (!%p8004_p5), %s9880_s17, 256, %s658_s29, [#allocation11], %s7860_s28, %s7860_s28, %s7861_s2  }
  0xc8   : > { %s7862_s26 = smov [#allocation15]   ;;  %s7792_s0 = scalar_lea.hbm %s9884_s21, 16 }
  0xc9   : > { %s690_s24 = sshll.u32 %s7862_s26, 4  ;;  %p7793_p2 = scmp.ne.s32.totalorder %s9884_s21, %s7792_s0  ;;  %s691_s24 = int_to_ptr.vmem [resolvable:$true] %s690_s24 }
  0xca   : > { %p7799_p0 = scmp.lt.u32.totalorder %s7792_s0, %s9884_s21 }
  0xcb   : > { %p7795_p3 = pnand %p7793_p2, %p8020_p7 }
  0xcd   : > { %p7796_p13 = pneg %p7795_p3 }
  0xcf   : > { %p7801_p1 = pnand %p7799_p0, %p7796_p13 }
  0xd1   : > { %7804 = shalt.err (!%p7801_p1)
}
  0xd2   : > { %s7805_s29 = scalar_lea.vmem %s691_s24, 16  ;;  %s7812_s27 = scalar_lea.vmem %s691_s24, 32 }
  0xd3   : > { %p7806_p4 = scmp.ne.s32.totalorder %s691_s24, %s7805_s29  ;;  %p7813_p9 = scmp.lt.s32.totalorder %s691_s24, %s691_s24 }
  0xd4   : > { %p7814_p10 = scmp.lt.s32.totalorder %s7812_s27, %s7805_s29 }
  0xd5   : > { %p7808_p6 = pnand %p7806_p4, %p8020_p7 }
  0xd6   : > { %p7815_p11 = por %p7814_p10, %p7813_p9 }
  0xd7   : > { %p7809_p8 = pneg %p7808_p6 }
  0xd9   : > { %p7816_p12 = pnand %p7815_p11, %p7809_p8 }
  0xdb   : > { %7819 = shalt.err (!%p7816_p12)
}
  0xdc   : > { %7234 = dma.hbm_to_vmem [thread:$0]  (!%p8004_p5), %s9884_s21, 16, %s691_s24, [#allocation14]  }
  0xdd   : > { %p9914_p2 = scmp.ne.s32.totalorder %s9910_s4, 0 }
  0xde   : > { %p9915_p3 = scmp.eq.s32.totalorder (!%p9914_p2), %s7987_s30, 0 }
  0xdf   : > { %716 = sbr.rel (%p9914_p2) target bundleno = 5786 (0x169a), region = 108 }
  0xe6   : > { %7825 = dma.done.wait (%p9915_p3), [#allocation3], 2048   ;;  %p9916_p7 = pmov %p9915_p3 }
  0xe7   : > { %p9917_p13 = pmov %p9915_p3 }
  0xe8   : > { %7827 = vsyncadd (%p9916_p7), [#allocation3], 4294965248 }
  0xe9   : > { %7829 = dma.done.wait (%p9917_p13), [#allocation5], 64   ;;  %p9918_p0 = pmov %p9915_p3 }
  0xeb   : > { %7831 = vsyncadd (%p9918_p0), [#allocation5], 4294967232  ;;  %p9919_p1 = pmov %p9918_p0 }
  0xec   : > { %p9920_p5 = pmov %p9918_p0 }
  0xed   : > { %7833 = dma.done.wait (%p9919_p1), [#allocation8], 64  }
  0xee   : > { %7835 = vsyncadd (%p9920_p5), [#allocation8], 4294967232  ;;  %p9921_p4 = pmov %p9918_p0 }
  0xef   : > { %p9922_p6 = pmov %p9918_p0 }
  0xf0   : > { %7837 = dma.done.wait (%p9921_p4), [#allocation11], 288  }
  0xf1   : > { %7839 = vsyncadd (%p9922_p6), [#allocation11], 4294967008  ;;  %p9923_p8 = pmov %p9918_p0 }
  0xf2   : > { %p9924_p9 = pmov %p9918_p0 }
  0xf3   : > { %7841 = dma.done.wait (%p9923_p8), [#allocation14], 48  }
  0xf4   : > { %7843 = vsyncadd (%p9924_p9), [#allocation14], 4294967248  ;;  %v7863_v0 = vmov 0.0   ;;  %vm7864_vm0 = vmmov 0   ;;  %v7279_v1 = vld [vmem:[%s9870_s7] sm:$0xff]   ;;  %v7280_v2 = vld [vmem:[%s9870_s7 + $0x8] sm:$0xff]  }
  0xf5   : > { %6829 = vmatprep.subr.bf16.mxu0 %v7863_v0  ;;  %6843 = vmatprep.mubr.msk.bf16.mxu0 %vm7864_vm0, %v7863_v0  ;;  %p811_p10 = scmp.lt.s32.totalorder %s7987_s30, 1  ;;  %v7281_v3 = vld [vmem:[%s9870_s7 + $0x10] sm:$0xff]   ;;  %v7288_v5 = vld [vmem:[%s9872_s9] ss:$12 sps:$4 sm:$0xff]   ;;  %v7282_v6 = vld [vmem:[%s9870_s7 + $0x18] sm:$0xff]   ;;  %s9925_s6 = sld [smem:[#allocation22_spill]] }
  0xf6   : > { %6830 = vmatpush3.bf16.msra.mxu0 %v7279_v1  ;;  %v7286_v4 = vld [vmem:[%s9872_s9 + $0x4] ss:$12 sps:$4 sm:$0xff]   ;;  %v7290_v7 = vld [vmem:[%s9872_s9 + $0x1c] ss:$12 sps:$4 sm:$0xff]   ;;  %v7294_v9 = vld [vmem:[%s9872_s9 + $0x34] ss:$12 sps:$4 sm:$0xff]  }
  0xf7   : > { %6831 = vmatprep.subr.bf16.mxu0 %v7863_v0  ;;  %s9939_s30 = smov (!%p811_p10, %s7987_s30), 1  ;;  %1154 = vmatprep.subr.bf16.mxu1 %v7286_v4  ;;  %v7292_v8 = vld [vmem:[%s9872_s9 + $0x18] ss:$12 sps:$4 sm:$0xff]   ;;  %v7296_v11 = vld [vmem:[%s9872_s9 + $0x30] ss:$12 sps:$4 sm:$0xff]   ;;  %v7284_v13 = vld [vmem:[%s9870_s7 + $0x28] sm:$0xff]  }
  0xf8   : > { %1155 = vmatpush1.bf16.msra.mxu1 %v7288_v5  ;;  %v7283_v10 = vld [vmem:[%s9870_s7 + $0x20] sm:$0xff]   ;;  %s5835_s1 = sshll.u32 %s9939_s30, 3  ;;  %v7298_v12 = vld [vmem:[%s9872_s9 + $0x4c] ss:$12 sps:$4 sm:$0xff]   ;;  %vm888_vm1 = vcmask 1041408   ;;  %vm884_vm2 = vcmask 818176  }
  0xf9   : > { %1156 = vmatprep.subr.bf16.mxu1 %v7290_v7  ;;  %v7300_v14 = vld [vmem:[%s9872_s9 + $0x48] ss:$12 sps:$4 sm:$0xff]   ;;  %v7285_v15 = vld [vmem:[%s9870_s7 + $0x30] ss:$0 sps:$4 sm:$0x33]   ;;  %v7865_v35 = vmov 0  }
  0xfa   : > { %6832 = vmatpush3.bf16.msra.mxu0 %v7280_v2  ;;  %v7302_v16 = vld [vmem:[%s9872_s9 + $0x64] ss:$12 sps:$4 sm:$0xff]   ;;  %v7304_v18 = vld [vmem:[%s9872_s9 + $0x60] ss:$12 sps:$4 sm:$0xff]   ;;  %v7306_v19 = vld [vmem:[%s9872_s9 + $0x7c] ss:$12 sps:$4 sm:$0xff]   ;;  %1186 = vmatprep.mubr.bf16.mxu1 %v7865_v35 }
  0xfb   : > { %6833 = vmatprep.subr.bf16.mxu0 %v7863_v0  ;;  %s814_s25 = scalar_lea.vmem %s9925_s6, %s5835_s1  ;;  %v890_v20 = vsel %vm888_vm1, %v7285_v15, 0  ;;  %v7289_v21 = vld [vmem:[%s9872_s9 + $0x8] ss:$12 sps:$4 sm:$0xff]   ;;  %v7308_v22 = vld [vmem:[%s9872_s9 + $0x78] ss:$12 sps:$4 sm:$0xff]   ;;  %s9926_s4 = sld [smem:[#allocation24_spill]] }
  0xfc   : > { %1157 = vmatpush1.bf16.msra.mxu1 %v7292_v8  ;;  %v823_v17 = vld [vmem:[%s814_s25] sm:$0xff]  ;;  %v7301_v26 = vld [vmem:[%s9872_s9 + $0x50] ss:$12 sps:$4 sm:$0xff]   ;;  %v7305_v27 = vld [vmem:[%s9872_s9 + $0x68] ss:$12 sps:$4 sm:$0xff]   ;;  %s9927_s26 = sld [smem:[#allocation25_spill]] }
  0xfd   : > { %1158 = vmatprep.subr.bf16.mxu1 %v7294_v9  ;;  %v824_v23 = vpack.c.bf16 %v823_v17, %v823_v17  ;;  %v7293_v24 = vld [vmem:[%s9872_s9 + $0x20] ss:$12 sps:$4 sm:$0xff]   ;;  %v7297_v25 = vld [vmem:[%s9872_s9 + $0x38] ss:$12 sps:$4 sm:$0xff]   ;;  %v7312_v30 = vld [vmem:[%s9872_s9 + $0x90] ss:$12 sps:$4 sm:$0xff]  }
  0xfe   : > { %6834 = vmatpush3.bf16.msra.mxu0 %v7281_v3  ;;  %v7309_v28 = vld [vmem:[%s9872_s9 + $0x80] ss:$12 sps:$4 sm:$0xff]   ;;  %v7313_v31 = vld [vmem:[%s9872_s9 + $0x98] ss:$12 sps:$4 sm:$0xff]   ;;  %v7316_v33 = vld [vmem:[%s9872_s9 + $0xa8] ss:$12 sps:$4 sm:$0xff]  }
  0xff   : > { %6835 = vmatprep.subr.bf16.mxu0 %v7863_v0  ;;  %v7310_v29 = vld [vmem:[%s9872_s9 + $0x94] ss:$12 sps:$4 sm:$0xff]   ;;  %v7314_v32 = vld [vmem:[%s9872_s9 + $0xac] ss:$12 sps:$4 sm:$0xff]   ;;  %v7317_v34 = vld [vmem:[%s9872_s9 + $0xb0] ss:$12 sps:$4 sm:$0xff]  }
 0x100   : > { %1159 = vmatpush1.bf16.msra.mxu1 %v7296_v11  ;;  %v5837_v36 = vld [vmem:[%s9871_s8] ss:$0 sm:$0xff]  ;;  %vm1267_vm3 = vcmask 64512   ;;  %s9928_s22 = sld [smem:[#allocation26_spill]]  ;;  %s9929_s6 = sld [smem:[#allocation27_spill]]  ;;  %vm5660_vm4 = vcmask 56320  }
 0x101   : > { %1160 = vmatprep.subr.bf16.mxu1 %v7298_v12  ;;  %v933_v40 = vld [vmem:[%s9926_s4] sm:$0xff]  ;;  %s9930_s28 = sld [smem:[#allocation28_spill]]  ;;  %s9931_s0 = sld [smem:[#allocation23_spill]] }
 0x102   : > { %6836 = vmatpush3.bf16.msra.mxu0 %v7282_v6  ;;  %v936_v54 = vld [vmem:[%s9927_s26] sm:$0xff]  ;;  %s9932_s29 = sld [smem:[#allocation29_spill]]  ;;  %s9933_s18 = sld [smem:[#allocation30_spill]] }
 0x103   : > { %6837 = vmatprep.subr.bf16.mxu0 %v7863_v0  ;;  %s9934_s3 = sld [smem:[#allocation31_spill]]  ;;  %s9936_s27 = sld [smem:[#allocation32_spill]] }
 0x104   : > { %1161 = vmatpush1.bf16.msra.mxu1 %v7300_v14 }
 0x105   : > { %1162 = vmatprep.subr.bf16.mxu1 %v7302_v16 }
 0x106   : > { %6838 = vmatpush3.bf16.msra.mxu0 %v7283_v10  ;;  %v937_v8 = vld [vmem:[%s9928_s22] sm:$0xff]  ;;  %v938_v9 = vld [vmem:[%s9928_s22 + $0x8] sm:$0xff]  ;;  %v939_v10 = vld [vmem:[%s9928_s22 + $0x10] sm:$0xff] }
 0x107   : > { %6839 = vmatprep.subr.bf16.mxu0 %v7863_v0  ;;  %v940_v11 = vld [vmem:[%s9928_s22 + $0x18] sm:$0xff]  ;;  %v941_v12 = vld [vmem:[%s9928_s22 + $0x20] sm:$0xff]  ;;  %v943_v14 = vld [vmem:[%s9928_s22 + $0x30] sm:$0xff]  ;;  %s8586_s5 = scalar_lea.vmem %s9931_s0, %s9939_s30 }
 0x108   : > { %1163 = vmatpush1.bf16.msra.mxu1 %v7304_v18  ;;  %v944_v15 = vld [vmem:[%s9928_s22 + $0x38] sm:$0xff]  ;;  %v945_v16 = vld [vmem:[%s9928_s22 + $0x40] sm:$0xff]  ;;  %v946_v17 = vld [vmem:[%s9928_s22 + $0x48] sm:$0xff] }
 0x109   : > { %1164 = vmatprep.subr.bf16.mxu1 %v7306_v19  ;;  %v947_v18 = vld [vmem:[%s9928_s22 + $0x50] sm:$0xff]  ;;  %v948_v19 = vld [vmem:[%s9928_s22 + $0x58] sm:$0xff]  ;;  %s9935_s4 = smov %s9934_s3 }
 0x10a   : > { %6840 = vmatpush3.bf16.msra.mxu0 %v7284_v13  ;;  %v942_v13 = vld [vmem:[%s9928_s22 + $0x28] sm:$0xff] }
 0x10b   : > { %6841 = vmatprep.subr.bf16.mxu0 %v7863_v0 }
 0x10c   : > { %1165 = vmatpush1.bf16.msra.mxu1 %v7308_v22  ;;  %v951_v22 = vld [vmem:[%s9928_s22 + $0x70] sm:$0xff] }
 0x10d   : > { %1166 = vmatprep.subr.bf16.mxu1 %v7310_v29 }
 0x10e   : > { %6842 = vmatpush3.bf16.msra.mxu0 %v890_v20  ;;  %v949_v20 = vld [vmem:[%s9928_s22 + $0x60] sm:$0xff] }
 0x10f   : > { %6847 = vmatprep.subr.bf16.mxu0 %v7863_v0 }
 0x110   : > { %1167 = vmatpush1.bf16.msra.mxu1 %v7312_v30 }
 0x111   : > { %6844 = vmatmul.mubr.msk.bf16.vlgmr.msra.gmra.mrb[0].mxu0 %vm884_vm2, %v824_v23  ;;  %1168 = vmatprep.subr.bf16.mxu1 %v7314_v32  ;;  %v952_v23 = vld [vmem:[%s9928_s22 + $0x78] sm:$0xff]  ;;  %v955_v32 = vld [vmem:[%s9929_s6 + $0x10] sm:$0xff] }
 0x112   : > { %6848 = vmatpush3.bf16.msra.mxu0 %v7289_v21  ;;  %6863 = vmatprep.mubr.msk.bf16.mxu0 %vm7864_vm0, %v7863_v0  ;;  %v950_v21 = vld [vmem:[%s9928_s22 + $0x68] sm:$0xff] }
 0x113   : > { %6849 = vmatprep.subr.bf16.mxu0 %v7863_v0 }
 0x114   : > { %1169 = vmatpush1.bf16.msra.mxu1 %v7316_v33 }
 0x115   : > { %6867 = vmatprep.subr.mxu1 %v936_v54 }
 0x116   : > { %6850 = vmatpush3.bf16.msra.mxu0 %v7293_v24  ;;  %v954_v24 = vld [vmem:[%s9929_s6 + $0x8] sm:$0xff] }
 0x117   : > { %6851 = vmatprep.subr.bf16.mxu0 %v7863_v0 }
 0x11a   : > { %6852 = vmatpush3.bf16.msra.mxu0 %v7297_v25  ;;  %v953_v25 = vld [vmem:[%s9929_s6] sm:$0xff] }
 0x11b   : > { %6853 = vmatprep.subr.bf16.mxu0 %v7863_v0 }
 0x11e   : > { %6854 = vmatpush3.bf16.msra.mxu0 %v7301_v26 }
 0x11f   : > { %6855 = vmatprep.subr.bf16.mxu0 %v7863_v0 }
 0x122   : > { %6856 = vmatpush3.bf16.msra.mxu0 %v7305_v27 }
 0x123   : > { %6857 = vmatprep.subr.bf16.mxu0 %v7863_v0 }
 0x126   : > { %6858 = vmatpush3.bf16.msra.mxu0 %v7309_v28 }
 0x127   : > { %6859 = vmatprep.subr.bf16.mxu0 %v7863_v0 }
 0x12a   : > { %6860 = vmatpush3.bf16.msra.mxu0 %v7313_v31  ;;  %v956_v31 = vld [vmem:[%s9929_s6 + $0x18] sm:$0xff] }
 0x12b   : > { %6861 = vmatprep.subr.bf16.mxu0 %v7863_v0 }
 0x12e   : > { %6862 = vmatpush3.bf16.msra.mxu0 %v7317_v34 }
 0x1e4   : > { %v926_v37 = vpop.f32.mrb[0].mxu0 }
 0x1e5   : > { %v927_v38 = vadd.f32 %v5837_v36, %v926_v37  ;;  %v6845_v39 = vpop.f32.mrb[1].mxu0 }
 0x1e6   : > { %v929_v41 = vpop.f32.mrb[2].mxu0  ;;  %v958_v39 = vld [vmem:[%s9929_s6 + $0x28] sm:$0xff] }
 0x1e7   : > { %v932_v42 = vmul.f32 2.0, %v927_v38  ;;  %v6846_v43 = vpop.f32.mrb[3].mxu0 }
 0x1e9   : > { %v8372_v44 = vadd.f32 %v933_v40, %v932_v42  ;;  %v957_v40 = vld [vmem:[%s9929_s6 + $0x20] sm:$0xff] }
 0x1eb   : > { %v993_v45 = vpack.c.bf16 %v8372_v44, %v8372_v44 }
 0x1ed   : > { %1187 = vmatmul.mubr.bf16.vlgmr.msra.gmra.mrb[0].mxu1 %v993_v45  ;;  %6864 = vmatmul.mubr.bf16.vlgmr.msra.gmra.mrb[4].mxu0 %v993_v45 }
 0x1ee   : > { %6868 = vmatpush3.msra.mxu1 %v936_v54  ;;  %6915 = vmatprep.mubr.msk.f32.mxu0 %vm1267_vm3, %v937_v8 }
 0x1ef   : > { %6893 = vmatprep.subr.bf16.mxu1 %v7863_v0 }
 0x2c0   : > { %v8376_v46 = vpop.f32.mrb[0].mxu1  ;;  %v1229_v47 = vpop.f32.mrb[4].mxu0 }
 0x2c1   : > { %v1190_v48 = vpop.f32.mrb[1].mxu1  ;;  %v6865_v49 = vpop.f32.mrb[5].mxu0  ;;  %6913 = vmatprep.subr.mxu0 %v1229_v47 }
 0x2c2   : > { %1235 = vxpose.xlu0.b32.start.end [1/1] (short) %v1190_v48, 128  ;;  %v1192_v50 = vpop.f32.mrb[2].mxu1  ;;  %v1232_v51 = vpop.f32.mrb[6].mxu0  ;;  %6914 = vmatpush3.msra.mxu0 %v1229_v47  ;;  %v960_v48 = vld [vmem:[%s9929_s6 + $0x38] sm:$0xff]  ;;  %v959_v49 = vld [vmem:[%s9929_s6 + $0x30] sm:$0xff] }
 0x2c3   : > { %v1193_v52 = vpop.f32.mrb[3].mxu1  ;;  %v6866_v53 = vpop.f32.mrb[7].mxu0  ;;  %6939 = vmatprep.subr.bf16.mxu0 %v7863_v0  ;;  %6916 = vmatmul.mubr.msk.f32.vlgmr.msra.gmra.mrb[8].mxu0 %vm1267_vm3, %v938_v9 }
 0x2c4   : > { %6918 = vmatprep.mubr.msk.f32.mxu0 %vm1267_vm3, %v939_v10 }
 0x2c7   : > { %6919 = vmatmul.mubr.msk.f32.gmra.mrb[10].mxu0 %vm1267_vm3, %v940_v11 }
 0x2c8   : > { %6921 = vmatprep.mubr.msk.f32.mxu0 %vm1267_vm3, %v941_v12 }
 0x2cb   : > { %6922 = vmatmul.mubr.msk.f32.gmra.mrb[12].mxu0 %vm1267_vm3, %v942_v13  ;;  %v968_v13 = vld [vmem:[%s9929_s6 + $0x78] sm:$0xff] }
 0x2cc   : > { %6924 = vmatprep.mubr.msk.f32.mxu0 %vm1267_vm3, %v943_v14  ;;  %v967_v14 = vld [vmem:[%s9929_s6 + $0x70] sm:$0xff] }
 0x2cf   : > { %6925 = vmatmul.mubr.msk.f32.gmra.mrb[14].mxu0 %vm1267_vm3, %v944_v15 }
 0x2d0   : > { %6927 = vmatprep.mubr.msk.f32.mxu0 %vm1267_vm3, %v945_v16 }
 0x2d3   : > { %6928 = vmatmul.mubr.msk.f32.gmra.mrb[16].mxu0 %vm1267_vm3, %v946_v17 }
 0x2d4   : > { %6930 = vmatprep.mubr.msk.f32.mxu0 %vm1267_vm3, %v947_v18 }
 0x2d7   : > { %6931 = vmatmul.mubr.msk.f32.gmra.mrb[18].mxu0 %vm1267_vm3, %v948_v19 }
 0x2d8   : > { %6933 = vmatprep.mubr.msk.f32.mxu0 %vm1267_vm3, %v949_v20  ;;  %v1485_v20 = vpack.c.bf16 %v8376_v46, %v8376_v46  ;;  %v972_v46 = vld [vmem:[%s9930_s28 + $0x18] sm:$0xff] }
 0x2db   : > { %6934 = vmatmul.mubr.msk.f32.gmra.mrb[20].mxu0 %vm1267_vm3, %v950_v21  ;;  %v970_v21 = vld [vmem:[%s9930_s28 + $0x8] sm:$0xff] }
 0x2dc   : > { %6936 = vmatprep.mubr.msk.f32.mxu0 %vm1267_vm3, %v951_v22 }
 0x2df   : > { %6937 = vmatmul.mubr.msk.f32.gmra.mrb[22].mxu0 %vm1267_vm3, %v952_v23  ;;  %v969_v23 = vld [vmem:[%s9930_s28] sm:$0xff] }
 0x2e0   : > { %6955 = vmatprep.mubr.msk.bf16.mxu0 %vm7864_vm0, %v7863_v0 }
 0x342   : > { %v1251_v55 = vpop.trf.xlu0 }
 0x343   : > { %6869 = vmatprep.mubr.msk.f32.mxu1 %vm1267_vm3, %v1251_v55  ;;  %v962_v55 = vld [vmem:[%s9929_s6 + $0x48] sm:$0xff] }
 0x346   : > { %v1252_v56 = vpop.trf.xlu0 }
 0x347   : > { %6870 = vmatmul.mubr.msk.f32.vlgmr.msra.gmra.mrb[4].mxu1 %vm1267_vm3, %v1252_v56  ;;  %v961_v56 = vld [vmem:[%s9929_s6 + $0x40] sm:$0xff] }
 0x34a   : > { %v1253_v57 = vpop.trf.xlu0 }
 0x34b   : > { %6872 = vmatprep.mubr.msk.f32.mxu1 %vm1267_vm3, %v1253_v57 }
 0x34e   : > { %v1254_v58 = vpop.trf.xlu0 }
 0x34f   : > { %6873 = vmatmul.mubr.msk.f32.gmra.mrb[6].mxu1 %vm1267_vm3, %v1254_v58 }
 0x352   : > { %v1255_v59 = vpop.trf.xlu0 }
 0x353   : > { %6875 = vmatprep.mubr.msk.f32.mxu1 %vm1267_vm3, %v1255_v59 }
 0x356   : > { %v1256_v60 = vpop.trf.xlu0 }
 0x357   : > { %6876 = vmatmul.mubr.msk.f32.gmra.mrb[8].mxu1 %vm1267_vm3, %v1256_v60 }
 0x35a   : > { %v1257_v61 = vpop.trf.xlu0 }
 0x35b   : > { %6878 = vmatprep.mubr.msk.f32.mxu1 %vm1267_vm3, %v1257_v61 }
 0x35e   : > { %v1258_v62 = vpop.trf.xlu0 }
 0x35f   : > { %6879 = vmatmul.mubr.msk.f32.gmra.mrb[10].mxu1 %vm1267_vm3, %v1258_v62  ;;  %v964_v62 = vld [vmem:[%s9929_s6 + $0x58] sm:$0xff] }
 0x362   : > { %v1259_v63 = vpop.trf.xlu0 }
 0x363   : > { %6881 = vmatprep.mubr.msk.f32.mxu1 %vm1267_vm3, %v1259_v63  ;;  %v963_v63 = vld [vmem:[%s9929_s6 + $0x50] sm:$0xff] }
 0x366   : > { %v1260_v1 = vpop.trf.xlu0 }
 0x367   : > { %6882 = vmatmul.mubr.msk.f32.gmra.mrb[12].mxu1 %vm1267_vm3, %v1260_v1 }
 0x36a   : > { %v1261_v2 = vpop.trf.xlu0 }
 0x36b   : > { %6884 = vmatprep.mubr.msk.f32.mxu1 %vm1267_vm3, %v1261_v2 }
 0x36e   : > { %v1262_v3 = vpop.trf.xlu0 }
 0x36f   : > { %6885 = vmatmul.mubr.msk.f32.gmra.mrb[14].mxu1 %vm1267_vm3, %v1262_v3 }
 0x372   : > { %v1263_v4 = vpop.trf.xlu0 }
 0x373   : > { %6887 = vmatprep.mubr.msk.f32.mxu1 %vm1267_vm3, %v1263_v4 }
 0x376   : > { %v1264_v5 = vpop.trf.xlu0 }
 0x377   : > { %6888 = vmatmul.mubr.msk.f32.gmra.mrb[16].mxu1 %vm1267_vm3, %v1264_v5 }
 0x37a   : > { %v1265_v6 = vpop.trf.xlu0 }
 0x37b   : > { %6890 = vmatprep.mubr.msk.f32.mxu1 %vm1267_vm3, %v1265_v6  ;;  %v966_v6 = vld [vmem:[%s9929_s6 + $0x68] sm:$0xff] }
 0x37e   : > { %v1266_v7 = vpop.trf.xlu0 }
 0x37f   : > { %6891 = vmatmul.mubr.msk.f32.gmra.mrb[18].mxu1 %vm1267_vm3, %v1266_v7  ;;  %v965_v7 = vld [vmem:[%s9929_s6 + $0x60] sm:$0xff] }
 0x380   : > { %6909 = vmatprep.mubr.msk.bf16.mxu1 %vm7864_vm0, %v7863_v0 }
 0x396   : > { %v6917_v22 = vpop.f32.mrb[8].mxu0 }
 0x41a   : > { %v6871_v26 = vpop.f32.mrb[4].mxu1 }
 0x41b   : > { %v1462_v27 = vmul.f32 %v6871_v26, %v954_v24  ;;  %v1382_v28 = vpop.f32.mrb[5].mxu1  ;;  %v1732_v24 = vmul.f32 %v6917_v22, %v970_v21  ;;  %v1652_v26 = vpop.f32.mrb[9].mxu0 }
 0x41c   : > { %v1461_v29 = vmul.f32 %v1382_v28, %v953_v25  ;;  %v8533_v25 = vpack.c.bf16 %v970_v21, %v969_v23  ;;  %v971_v28 = vld [vmem:[%s9930_s28 + $0x10] sm:$0xff] }
 0x41e   : > { %v1477_v30 = vpack.c.bf16 %v1462_v27, %v1461_v29  ;;  %v1731_v27 = vmul.f32 %v1652_v26, %v969_v23  ;;  %v6920_v29 = vpop.f32.mrb[10].mxu0  ;;  %v984_v23 = vld [vmem:[%s9930_s28 + $0x78] sm:$0xff] }
 0x420   : > { %6894 = vmatpush3.bf16.msra.mxu1 %v1477_v30  ;;  %v8541_v30 = vpack.c.bf16 %v972_v46, %v971_v28 }
 0x421   : > { %6895 = vmatprep.subr.bf16.mxu1 %v7863_v0 }
 0x422   : > { %v6874_v33 = vpop.f32.mrb[6].mxu1 }
 0x423   : > { %v1464_v34 = vmul.f32 %v6874_v33, %v956_v31  ;;  %v1392_v36 = vpop.f32.mrb[7].mxu1  ;;  %v1747_v31 = vpack.c.bf16 %v1732_v24, %v1731_v27  ;;  %v1662_v33 = vpop.f32.mrb[11].mxu0  ;;  %v983_v24 = vld [vmem:[%s9930_s28 + $0x70] sm:$0xff] }
 0x424   : > { %v1463_v37 = vmul.f32 %v1392_v36, %v955_v32  ;;  %v1734_v32 = vmul.f32 %v6920_v29, %v972_v46  ;;  %v974_v36 = vld [vmem:[%s9930_s28 + $0x28] sm:$0xff] }
 0x425   : > { %6940 = vmatpush3.bf16.msra.mxu0 %v1747_v31 }
 0x426   : > { %v1478_v38 = vpack.c.bf16 %v1464_v34, %v1463_v37  ;;  %v1733_v34 = vmul.f32 %v1662_v33, %v971_v28  ;;  %v973_v37 = vld [vmem:[%s9930_s28 + $0x20] sm:$0xff]  ;;  %6941 = vmatprep.subr.bf16.mxu0 %v7863_v0  ;;  %v8617_v28 = vpack.c.bf16 %v984_v23, %v983_v24 }
 0x428   : > { %6896 = vmatpush3.bf16.msra.mxu1 %v1478_v38  ;;  %v1748_v38 = vpack.c.bf16 %v1734_v32, %v1733_v34 }
 0x429   : > { %6897 = vmatprep.subr.bf16.mxu1 %v7863_v0 }
 0x42a   : > { %v6877_v41 = vpop.f32.mrb[8].mxu1  ;;  %6942 = vmatpush3.bf16.msra.mxu0 %v1748_v38  ;;  %v7319_v38 = vld [vmem:[#allocation2 + $0x8] sm:$0xff]  }
 0x42b   : > { %v1466_v42 = vmul.f32 %v6877_v41, %v958_v39  ;;  %v1402_v43 = vpop.f32.mrb[9].mxu1  ;;  %v6923_v39 = vpop.f32.mrb[12].mxu0  ;;  %6943 = vmatprep.subr.bf16.mxu0 %v7863_v0 }
 0x42c   : > { %v1465_v45 = vmul.f32 %v1402_v43, %v957_v40  ;;  %v8551_v40 = vpack.c.bf16 %v974_v36, %v973_v37  ;;  %v1736_v41 = vmul.f32 %v6923_v39, %v974_v36  ;;  %v7318_v36 = vld [vmem:[#allocation2] sm:$0xff]   ;;  %v7320_v39 = vld [vmem:[#allocation2 + $0x10] sm:$0xff]  }
 0x42e   : > { %v1479_v47 = vpack.c.bf16 %v1466_v42, %v1465_v45  ;;  %v1672_v42 = vpop.f32.mrb[13].mxu0  ;;  %v976_v45 = vld [vmem:[%s9930_s28 + $0x38] sm:$0xff] }
 0x42f   : > { %v1735_v43 = vmul.f32 %v1672_v42, %v973_v37  ;;  %v7322_v42 = vld [vmem:[#allocation2 + $0x20] sm:$0xff]  }
 0x430   : > { %6898 = vmatpush3.bf16.msra.mxu1 %v1479_v47  ;;  %v975_v47 = vld [vmem:[%s9930_s28 + $0x30] sm:$0xff] }
 0x431   : > { %6899 = vmatprep.subr.bf16.mxu1 %v7863_v0 }
 0x432   : > { %v6880_v50 = vpop.f32.mrb[10].mxu1 }
 0x433   : > { %v1468_v51 = vmul.f32 %v6880_v50, %v960_v48  ;;  %v1412_v52 = vpop.f32.mrb[11].mxu1  ;;  %v1749_v48 = vpack.c.bf16 %v1736_v41, %v1735_v43  ;;  %v8562_v50 = vpack.c.bf16 %v976_v45, %v975_v47  ;;  %v7321_v41 = vld [vmem:[#allocation2 + $0x18] sm:$0xff]   ;;  %v7323_v43 = vld [vmem:[#allocation2 + $0x28] sm:$0xff]  }
 0x434   : > { %v1467_v53 = vmul.f32 %v1412_v52, %v959_v49  ;;  %v6926_v49 = vpop.f32.mrb[14].mxu0 }
 0x435   : > { %v1682_v52 = vpop.f32.mrb[15].mxu0  ;;  %6944 = vmatpush3.bf16.msra.mxu0 %v1749_v48 }
 0x436   : > { %v1480_v54 = vpack.c.bf16 %v1468_v51, %v1467_v53  ;;  %v1738_v51 = vmul.f32 %v6926_v49, %v976_v45  ;;  %v1737_v53 = vmul.f32 %v1682_v52, %v975_v47  ;;  %6945 = vmatprep.subr.bf16.mxu0 %v7863_v0  ;;  %v7324_v45 = vld [vmem:[#allocation2 + $0x30] sm:$0xff]   ;;  %v7325_v47 = vld [vmem:[#allocation2 + $0x38] sm:$0xff]  }
 0x438   : > { %6900 = vmatpush3.bf16.msra.mxu1 %v1480_v54  ;;  %v978_v54 = vld [vmem:[%s9930_s28 + $0x48] sm:$0xff] }
 0x439   : > { %6901 = vmatprep.subr.bf16.mxu1 %v7863_v0 }
 0x43a   : > { %v6883_v57 = vpop.f32.mrb[12].mxu1 }
 0x43b   : > { %v1470_v58 = vmul.f32 %v6883_v57, %v962_v55  ;;  %v1422_v59 = vpop.f32.mrb[13].mxu1  ;;  %v977_v55 = vld [vmem:[%s9930_s28 + $0x40] sm:$0xff]  ;;  %v6929_v57 = vpop.f32.mrb[16].mxu0 }
 0x43c   : > { %v1469_v60 = vmul.f32 %v1422_v59, %v961_v56  ;;  %v1750_v56 = vpack.c.bf16 %v1738_v51, %v1737_v53  ;;  %v1740_v59 = vmul.f32 %v6929_v57, %v978_v54 }
 0x43e   : > { %v1481_v61 = vpack.c.bf16 %v1470_v58, %v1469_v60  ;;  %v8573_v58 = vpack.c.bf16 %v978_v54, %v977_v55  ;;  %v1692_v60 = vpop.f32.mrb[17].mxu0  ;;  %6946 = vmatpush3.bf16.msra.mxu0 %v1750_v56 }
 0x43f   : > { %6947 = vmatprep.subr.bf16.mxu0 %v7863_v0 }
 0x440   : > { %6902 = vmatpush3.bf16.msra.mxu1 %v1481_v61  ;;  %v1739_v61 = vmul.f32 %v1692_v60, %v977_v55 }
 0x441   : > { %6903 = vmatprep.subr.bf16.mxu1 %v7863_v0 }
 0x442   : > { %v6886_v1 = vpop.f32.mrb[14].mxu1 }
 0x443   : > { %v1472_v2 = vmul.f32 %v6886_v1, %v964_v62  ;;  %v1432_v3 = vpop.f32.mrb[15].mxu1  ;;  %v1751_v62 = vpack.c.bf16 %v1740_v59, %v1739_v61 }
 0x444   : > { %v1471_v4 = vmul.f32 %v1432_v3, %v963_v63  ;;  %v5886_v63 = vld [vmem:[%s8586_s5] ss:$0 sm:$0xff] }
 0x445   : > { %6948 = vmatpush3.bf16.msra.mxu0 %v1751_v62  ;;  %v5903_v62 = vld [vmem:[#allocation4] ss:$0 sm:$0xff] }
 0x446   : > { %v1482_v5 = vpack.c.bf16 %v1472_v2, %v1471_v4  ;;  %6949 = vmatprep.subr.bf16.mxu0 %v7863_v0 }
 0x448   : > { %6904 = vmatpush3.bf16.msra.mxu1 %v1482_v5 }
 0x449   : > { %6905 = vmatprep.subr.bf16.mxu1 %v7863_v0 }
 0x44a   : > { %v6889_v8 = vpop.f32.mrb[16].mxu1 }
 0x44b   : > { %v1474_v9 = vmul.f32 %v6889_v8, %v966_v6  ;;  %v1442_v10 = vpop.f32.mrb[17].mxu1  ;;  %v6932_v6 = vpop.f32.mrb[18].mxu0  ;;  %v979_v8 = vld [vmem:[%s9930_s28 + $0x50] sm:$0xff] }
 0x44c   : > { %v1473_v11 = vmul.f32 %v1442_v10, %v965_v7  ;;  %v980_v7 = vld [vmem:[%s9930_s28 + $0x58] sm:$0xff] }
 0x44d   : > { %v1742_v10 = vmul.f32 %v6932_v6, %v980_v7  ;;  %v1980_v6 = vld [vmem:[%s9932_s29] sm:$0xff] }
 0x44e   : > { %v1483_v12 = vpack.c.bf16 %v1474_v9, %v1473_v11  ;;  %v1702_v9 = vpop.f32.mrb[19].mxu0 }
 0x44f   : > { %v1741_v11 = vmul.f32 %v1702_v9, %v979_v8 }
 0x450   : > { %6906 = vmatpush3.bf16.msra.mxu1 %v1483_v12  ;;  %v8595_v12 = vpack.c.bf16 %v980_v7, %v979_v8  ;;  %v1984_v7 = vld [vmem:[%s9932_s29 + $0x20] sm:$0xff]  ;;  %v1981_v8 = vld [vmem:[%s9932_s29 + $0x8] sm:$0xff] }
 0x451   : > { %6907 = vmatprep.subr.bf16.mxu1 %v7863_v0  ;;  %v5914_v9 = vcombine.low %v1980_v6, %v1984_v7 }
 0x452   : > { %v6892_v15 = vpop.f32.mrb[18].mxu1 }
 0x453   : > { %v1476_v16 = vmul.f32 %v6892_v15, %v968_v13  ;;  %v1452_v17 = vpop.f32.mrb[19].mxu1  ;;  %v1752_v13 = vpack.c.bf16 %v1742_v10, %v1741_v11  ;;  %v982_v15 = vld [vmem:[%s9930_s28 + $0x68] sm:$0xff]  ;;  %v5915_v10 = vcombine.high %v1980_v6, %v1984_v7 }
 0x454   : > { %v1475_v18 = vmul.f32 %v1452_v17, %v967_v14  ;;  %v6935_v14 = vpop.f32.mrb[20].mxu0  ;;  %v1985_v11 = vld [vmem:[%s9932_s29 + $0x28] sm:$0xff] }
 0x455   : > { %v1712_v17 = vpop.f32.mrb[21].mxu0  ;;  %6950 = vmatpush3.bf16.msra.mxu0 %v1752_v13  ;;  %v1992_v13 = vld [vmem:[%s9932_s29 + $0x60] sm:$0xff]  ;;  %v2029_v6 = vld [vmem:[%s9932_s29 + $0x188] sm:$0xff] }
 0x456   : > { %v1484_v19 = vpack.c.bf16 %v1476_v16, %v1475_v18  ;;  %v981_v16 = vld [vmem:[%s9930_s28 + $0x60] sm:$0xff]  ;;  %v1744_v18 = vmul.f32 %v6935_v14, %v982_v15  ;;  %6951 = vmatprep.subr.bf16.mxu0 %v7863_v0  ;;  %v6938_v22 = vpop.f32.mrb[22].mxu0  ;;  %v5916_v14 = vcombine.low %v1981_v8, %v1985_v11 }
 0x457   : > { %v1722_v26 = vpop.f32.mrb[23].mxu0  ;;  %v1746_v46 = vmul.f32 %v6938_v22, %v984_v23  ;;  %v2000_v22 = vld [vmem:[%s9932_s29 + $0xa0] sm:$0xff]  ;;  %v1997_v23 = vld [vmem:[%s9932_s29 + $0x88] sm:$0xff] }
 0x458   : > { %6908 = vmatpush3.bf16.msra.mxu1 %v1484_v19  ;;  %v1743_v19 = vmul.f32 %v1712_v17, %v981_v16  ;;  %v1745_v27 = vmul.f32 %v1722_v26, %v983_v24  ;;  %v1989_v17 = vld [vmem:[%s9932_s29 + $0x48] sm:$0xff] }
 0x459   : > { %6959 = vmatprep.subr.bf16.mxu1 %v7863_v0  ;;  %v2001_v24 = vld [vmem:[%s9932_s29 + $0xa8] sm:$0xff] }
 0x45a   : > { %v1753_v21 = vpack.c.bf16 %v1744_v18, %v1743_v19  ;;  %v1754_v29 = vpack.c.bf16 %v1746_v46, %v1745_v27  ;;  %v1993_v18 = vld [vmem:[%s9932_s29 + $0x68] sm:$0xff]  ;;  %v1996_v19 = vld [vmem:[%s9932_s29 + $0x80] sm:$0xff] }
 0x45b   : > { %6910 = vmatmul.mubr.bf16.vlgmr.msra.gmra.mrb[20].mxu1 %v1485_v20  ;;  %v8606_v20 = vpack.c.bf16 %v982_v15, %v981_v16  ;;  %v5917_v15 = vcombine.high %v1981_v8, %v1985_v11  ;;  %v5924_v46 = vcombine.low %v1989_v17, %v1993_v18  ;;  %v5931_v27 = vcombine.high %v1996_v19, %v2000_v22  ;;  %v2033_v8 = vld [vmem:[%s9932_s29 + $0x1a8] sm:$0xff] }
 0x45c   : > { %6975 = vmatprep.mubr.msk.bf16.mxu1 %vm7864_vm0, %v7863_v0  ;;  %6960 = vmatpush3.bf16.msra.mxu1 %v8533_v25  ;;  %v5965_v11 = vcombine.high %v2029_v6, %v2033_v8 }
 0x45d   : > { %6961 = vmatprep.subr.bf16.mxu1 %v7863_v0  ;;  %6952 = vmatpush3.bf16.msra.mxu0 %v1753_v21  ;;  %v5925_v21 = vcombine.high %v1989_v17, %v1993_v18  ;;  %v2041_v17 = vld [vmem:[%s9932_s29 + $0x1e8] sm:$0xff]  ;;  %v1982_v18 = vld [vmem:[%s9932_s29 + $0x10] sm:$0xff] }
 0x45e   : > { %6953 = vmatprep.subr.bf16.mxu0 %v7863_v0 }
 0x460   : > { %6962 = vmatpush3.bf16.msra.mxu1 %v8541_v30 }
 0x461   : > { %6963 = vmatprep.subr.bf16.mxu1 %v7863_v0  ;;  %6954 = vmatpush3.bf16.msra.mxu0 %v1754_v29  ;;  %v5933_v29 = vcombine.high %v1997_v23, %v2001_v24 }
 0x462   : > { %6979 = vmatprep.subr.bf16.mxu0 %v7863_v0 }
 0x464   : > { %6964 = vmatpush3.bf16.msra.mxu1 %v8551_v40 }
 0x465   : > { %6965 = vmatprep.subr.bf16.mxu1 %v7863_v0 }
 0x468   : > { %6966 = vmatpush3.bf16.msra.mxu1 %v8562_v50 }
 0x469   : > { %6967 = vmatprep.subr.bf16.mxu1 %v7863_v0 }
 0x46c   : > { %6968 = vmatpush3.bf16.msra.mxu1 %v8573_v58 }
 0x46d   : > { %6969 = vmatprep.subr.bf16.mxu1 %v7863_v0 }
 0x470   : > { %6970 = vmatpush3.bf16.msra.mxu1 %v8595_v12 }
 0x471   : > { %6971 = vmatprep.subr.bf16.mxu1 %v7863_v0 }
 0x474   : > { %6972 = vmatpush3.bf16.msra.mxu1 %v8606_v20 }
 0x475   : > { %6973 = vmatprep.subr.bf16.mxu1 %v7863_v0 }
 0x478   : > { %6974 = vmatpush3.bf16.msra.mxu1 %v8617_v28 }
 0x479   : > { %2406 = vmatprep.subr.bf16.mxu1 %v5915_v10  ;;  %v5964_v10 = vcombine.low %v2029_v6, %v2033_v8  ;;  %v2014_v6 = vld [vmem:[%s9932_s29 + $0x110] sm:$0xff]  ;;  %v2015_v8 = vld [vmem:[%s9932_s29 + $0x118] sm:$0xff] }
 0x52e   : > { %v1526_v1 = vpop.f32.mrb[20].mxu1 }
 0x52f   : > { %v1527_v2 = vadd.f32 %v5886_v63, %v1526_v1  ;;  %v6911_v3 = vpop.f32.mrb[21].mxu1 }
 0x530   : > { %v1529_v4 = vpop.f32.mrb[22].mxu1 }
 0x531   : > { %1532 = vmax.xlane.f32.xlu0 %v1527_v2  ;;  %v6912_v5 = vpop.f32.mrb[23].mxu1 }
 0x5be   : > { %v1533_v31 = vpop.xlane.xlu0 %1532 }
 0x5bf   : > { %v1534_v32 = vsub.f32 %v1527_v2, %v1533_v31  ;;  %v5930_v31 = vcombine.low %v1996_v19, %v2000_v22  ;;  %v1986_v19 = vld [vmem:[%s9932_s29 + $0x30] sm:$0xff] }
 0x5c1   : > { %v1535_v33 = vmul.f32 1.442695, %v1534_v32  ;;  %v5932_v32 = vcombine.low %v1997_v23, %v2001_v24  ;;  %v5918_v23 = vcombine.low %v1982_v18, %v1986_v19  ;;  %v5919_v24 = vcombine.high %v1982_v18, %v1986_v19 }
 0x5c3   : > { %7502 = vpow2.f32 %v1535_v33 }
 0x5cd   : > { %v7503_v34 = vpop.eup %7502 }
 0x5ce   : > { %v1537_v37 = vpack.c.bf16 %v7503_v34, %v7503_v34 }
 0x5d0   : > { %6956 = vmatmul.mubr.bf16.vlgmr.msra.gmra.mrb[24].mxu0 %v1537_v37  ;;  %6976 = vmatmul.mubr.bf16.vlgmr.msra.gmra.mrb[24].mxu1 %v1537_v37 }
 0x5d1   : > { %6980 = vmatpush3.bf16.msra.mxu0 %v7318_v36  ;;  %6995 = vmatprep.mubr.msk.bf16.mxu0 %vm7864_vm0, %v7863_v0 }
 0x5d2   : > { %6981 = vmatprep.subr.bf16.mxu0 %v7863_v0  ;;  %2438 = vmatprep.mubr.bf16.mxu1 %v7865_v35 }
 0x5d3   : > { %2407 = vmatpush1.bf16.msra.mxu1 %v5914_v9 }
 0x5d5   : > { %6982 = vmatpush3.bf16.msra.mxu0 %v7319_v38  ;;  %v2004_v38 = vld [vmem:[%s9932_s29 + $0xc0] sm:$0xff] }
 0x5d6   : > { %6983 = vmatprep.subr.bf16.mxu0 %v7863_v0 }
 0x5d9   : > { %6984 = vmatpush3.bf16.msra.mxu0 %v7320_v39  ;;  %v2008_v39 = vld [vmem:[%s9932_s29 + $0xe0] sm:$0xff] }
 0x5da   : > { %6985 = vmatprep.subr.bf16.mxu0 %v7863_v0 }
 0x5dd   : > { %6986 = vmatpush3.bf16.msra.mxu0 %v7321_v41  ;;  %v2005_v41 = vld [vmem:[%s9932_s29 + $0xc8] sm:$0xff] }
 0x5de   : > { %6987 = vmatprep.subr.bf16.mxu0 %v7863_v0 }
 0x5e1   : > { %6988 = vmatpush3.bf16.msra.mxu0 %v7322_v42  ;;  %v5939_v42 = vcombine.high %v2004_v38, %v2008_v39 }
 0x5e2   : > { %6989 = vmatprep.subr.bf16.mxu0 %v7863_v0 }
 0x5e5   : > { %6990 = vmatpush3.bf16.msra.mxu0 %v7323_v43  ;;  %v2009_v43 = vld [vmem:[%s9932_s29 + $0xe8] sm:$0xff] }
 0x5e6   : > { %6991 = vmatprep.subr.bf16.mxu0 %v7863_v0 }
 0x5e9   : > { %6992 = vmatpush3.bf16.msra.mxu0 %v7324_v45  ;;  %v5938_v45 = vcombine.low %v2004_v38, %v2008_v39  ;;  %v5913_v39 = vld [vmem:[#allocation7] ss:$0 sm:$0xff] }
 0x5ea   : > { %6993 = vmatprep.subr.bf16.mxu0 %v7863_v0 }
 0x5ed   : > { %6994 = vmatpush3.bf16.msra.mxu0 %v7325_v47  ;;  %v5940_v47 = vcombine.low %v2005_v41, %v2009_v43 }
 0x5ee   : > { %2447 = vmatprep.subr.bf16.mxu0 %v5917_v15 }
 0x6a3   : > { %v1789_v48 = vpop.f32.mrb[24].mxu0  ;;  %v1829_v49 = vpop.f32.mrb[24].mxu1 }
 0x6a4   : > { %v1835_v51 = vmax.f32 %v1829_v49, 1e-20  ;;  %v6957_v52 = vpop.f32.mrb[25].mxu0  ;;  %v6977_v53 = vpop.f32.mrb[25].mxu1  ;;  %v2012_v49 = vld [vmem:[%s9932_s29 + $0x100] sm:$0xff] }
 0x6a5   : > { %v1792_v54 = vpop.f32.mrb[26].mxu0  ;;  %v1832_v55 = vpop.f32.mrb[26].mxu1  ;;  %v2013_v52 = vld [vmem:[%s9932_s29 + $0x108] sm:$0xff] }
 0x6a6   : > { %7504 = vrcp.f32 %v1835_v51  ;;  %v6958_v56 = vpop.f32.mrb[27].mxu0  ;;  %v6978_v57 = vpop.f32.mrb[27].mxu1  ;;  %v2016_v51 = vld [vmem:[%s9932_s29 + $0x120] sm:$0xff]  ;;  %v2017_v54 = vld [vmem:[%s9932_s29 + $0x128] sm:$0xff] }
 0x6a7   : > { %v5947_v53 = vcombine.high %v2012_v49, %v2016_v51  ;;  %v5946_v55 = vcombine.low %v2012_v49, %v2016_v51  ;;  %v5948_v56 = vcombine.low %v2013_v52, %v2017_v54  ;;  %v5949_v57 = vcombine.high %v2013_v52, %v2017_v54  ;;  %v1998_v52 = vld [vmem:[%s9932_s29 + $0x90] sm:$0xff]  ;;  %v1999_v54 = vld [vmem:[%s9932_s29 + $0x98] sm:$0xff] }
 0x6b0   : > { %v7505_v59 = vpop.eup %7504 }
 0x6b1   : > { %v1837_v60 = vmul.f32 %v7505_v59, %v1789_v48  ;;  %v5941_v48 = vcombine.high %v2005_v41, %v2009_v43  ;;  %v2020_v59 = vld [vmem:[%s9932_s29 + $0x140] sm:$0xff]  ;;  %v1994_v43 = vld [vmem:[%s9932_s29 + $0x70] sm:$0xff] }
 0x6b3   : > { %v1838_v61 = vpack.c.bf16 %v1837_v60, %v1837_v60  ;;  %v2024_v60 = vld [vmem:[%s9932_s29 + $0x160] sm:$0xff] }
 0x6b5   : > { %6996 = vmatmul.mubr.bf16.vlgmr.msra.gmra.mrb[28].mxu0 %v1838_v61  ;;  %v2021_v61 = vld [vmem:[%s9932_s29 + $0x148] sm:$0xff] }
 0x6b6   : > { %2479 = vmatprep.mubr.bf16.mxu0 %v7865_v35  ;;  %2448 = vmatpush1.bf16.msra.mxu0 %v5916_v14  ;;  %v2037_v14 = vld [vmem:[%s9932_s29 + $0x1c8] sm:$0xff] }
 0x6b7   : > { %2449 = vmatprep.subr.bf16.mxu0 %v5925_v21  ;;  %v5972_v21 = vcombine.low %v2037_v14, %v2041_v17  ;;  %v5973_v22 = vcombine.high %v2037_v14, %v2041_v17  ;;  %v2022_v14 = vld [vmem:[%s9932_s29 + $0x150] sm:$0xff]  ;;  %v2027_v17 = vld [vmem:[%s9932_s29 + $0x178] sm:$0xff] }
 0x6ba   : > { %2450 = vmatpush1.bf16.msra.mxu0 %v5924_v46  ;;  %v1987_v46 = vld [vmem:[%s9932_s29 + $0x38] sm:$0xff] }
 0x6bb   : > { %2451 = vmatprep.subr.bf16.mxu0 %v5933_v29 }
 0x6be   : > { %2452 = vmatpush1.bf16.msra.mxu0 %v5932_v32 }
 0x6bf   : > { %2453 = vmatprep.subr.bf16.mxu0 %v5941_v48 }
 0x6c2   : > { %2454 = vmatpush1.bf16.msra.mxu0 %v5940_v47  ;;  %v1995_v47 = vld [vmem:[%s9932_s29 + $0x78] sm:$0xff] }
 0x6c3   : > { %2455 = vmatprep.subr.bf16.mxu0 %v5949_v57 }
 0x6c6   : > { %2456 = vmatpush1.bf16.msra.mxu0 %v5948_v56 }
 0x788   : > { %v1944_v63 = vpop.f32.mrb[28].mxu0 }
 0x789   : > { %v1945_v1 = vadd.f32 %v5903_v62, %v1944_v63  ;;  %v6997_v2 = vpop.f32.mrb[29].mxu0  ;;  %v5955_v62 = vcombine.high %v2020_v59, %v2024_v60  ;;  %v2025_v63 = vld [vmem:[%s9932_s29 + $0x168] sm:$0xff] }
 0x78a   : > { %v1947_v3 = vpop.f32.mrb[30].mxu0  ;;  %v5956_v2 = vcombine.low %v2021_v61, %v2025_v63 }
 0x78b   : > { %v6998_v4 = vpop.f32.mrb[31].mxu0  ;;  %v1950_v5 = vadd.f32 %v1945_v1, %v8372_v44  ;;  %v1988_v44 = vld [vmem:[%s9932_s29 + $0x40] sm:$0xff]  ;;  %v5954_v1 = vcombine.low %v2020_v59, %v2024_v60  ;;  %v5957_v3 = vcombine.high %v2021_v61, %v2025_v63  ;;  %v2006_v61 = vld [vmem:[%s9932_s29 + $0xd0] sm:$0xff]  ;;  %v2007_v63 = vld [vmem:[%s9932_s29 + $0xd8] sm:$0xff] }
 0x78c   : > { %v5923_v16 = vcombine.high %v1988_v44, %v1992_v13  ;;  %v5922_v26 = vcombine.low %v1988_v44, %v1992_v13  ;;  %v2028_v4 = vld [vmem:[%s9932_s29 + $0x180] sm:$0xff] }
 0x78d   : > { %1953 = vadd.xlane.f32.xlu1 %v1950_v5  ;;  %2457 = vmatprep.subr.bf16.mxu0 %v5957_v3  ;;  %v2036_v44 = vld [vmem:[%s9932_s29 + $0x1c0] sm:$0xff] }
 0x78e   : > { %2408 = vmatprep.subr.bf16.mxu1 %v5923_v16  ;;  %2458 = vmatpush1.bf16.msra.mxu0 %v5956_v2  ;;  %v2040_v13 = vld [vmem:[%s9932_s29 + $0x1e0] sm:$0xff] }
 0x78f   : > { %2409 = vmatpush1.bf16.msra.mxu1 %v5922_v26  ;;  %2459 = vmatprep.subr.bf16.mxu0 %v5965_v11  ;;  %v5970_v15 = vcombine.low %v2036_v44, %v2040_v13  ;;  %v5971_v16 = vcombine.high %v2036_v44, %v2040_v13  ;;  %v1983_v26 = vld [vmem:[%s9932_s29 + $0x18] sm:$0xff] }
 0x790   : > { %2410 = vmatprep.subr.bf16.mxu1 %v5931_v27  ;;  %v5920_v27 = vcombine.low %v1983_v26, %v1987_v46  ;;  %v5921_v29 = vcombine.high %v1983_v26, %v1987_v46  ;;  %v2031_v26 = vld [vmem:[%s9932_s29 + $0x198] sm:$0xff] }
 0x791   : > { %v2035_v46 = vld [vmem:[%s9932_s29 + $0x1b8] sm:$0xff] }
 0x792   : > { %2460 = vmatpush1.bf16.msra.mxu0 %v5964_v10 }
 0x793   : > { %2411 = vmatpush1.bf16.msra.mxu1 %v5930_v31  ;;  %2461 = vmatprep.subr.bf16.mxu0 %v5973_v22 }
 0x794   : > { %2412 = vmatprep.subr.bf16.mxu1 %v5939_v42  ;;  %v1990_v42 = vld [vmem:[%s9932_s29 + $0x50] sm:$0xff] }
 0x795   : > { %v5927_v49 = vcombine.high %v1990_v42, %v1994_v43  ;;  %v5926_v56 = vcombine.low %v1990_v42, %v1994_v43 }
 0x796   : > { %2462 = vmatpush1.bf16.msra.mxu0 %v5972_v21 }
 0x797   : > { %2413 = vmatpush1.bf16.msra.mxu1 %v5938_v45  ;;  %2529 = vmatprep.subr.bf16.mxu0 %v5921_v29  ;;  %v1991_v45 = vld [vmem:[%s9932_s29 + $0x58] sm:$0xff] }
 0x798   : > { %2414 = vmatprep.subr.bf16.mxu1 %v5947_v53  ;;  %v5929_v51 = vcombine.high %v1991_v45, %v1995_v47  ;;  %v2002_v53 = vld [vmem:[%s9932_s29 + $0xb0] sm:$0xff]  ;;  %v5928_v57 = vcombine.low %v1991_v45, %v1995_v47 }
 0x799   : > { %v5935_v59 = vcombine.high %v1998_v52, %v2002_v53  ;;  %v5934_v2 = vcombine.low %v1998_v52, %v2002_v53  ;;  %v7328_v52 = vld [vmem:[%s9933_s18] sm:$0xff]  }
 0x79a   : > { %v7329_v53 = vld [vmem:[%s9933_s18 + $0x80] sm:$0xff]  }
 0x79b   : > { %2415 = vmatpush1.bf16.msra.mxu1 %v5946_v55  ;;  %v2003_v55 = vld [vmem:[%s9932_s29 + $0xb8] sm:$0xff] }
 0x79c   : > { %2416 = vmatprep.subr.bf16.mxu1 %v5955_v62  ;;  %v5937_v60 = vcombine.high %v1999_v54, %v2003_v55  ;;  %v2010_v62 = vld [vmem:[%s9932_s29 + $0xf0] sm:$0xff]  ;;  %v5936_v3 = vcombine.low %v1999_v54, %v2003_v55  ;;  %v7330_v54 = vld [vmem:[%s9933_s18 + $0x48] sm:$0xff]  }
 0x79d   : > { %v5942_v10 = vcombine.low %v2006_v61, %v2010_v62  ;;  %v7331_v55 = vld [vmem:[%s9933_s18 + $0xc8] sm:$0xff]  }
 0x79f   : > { %2417 = vmatpush1.bf16.msra.mxu1 %v5954_v1  ;;  %v2011_v1 = vld [vmem:[%s9932_s29 + $0xf8] sm:$0xff] }
 0x7a0   : > { %v5944_v11 = vcombine.low %v2007_v63, %v2011_v1 }
 0x81a   : > { %v1954_v33 = vpop.xlane.xlu1 %1953 }
 0x81b   : > { %v1956_v34 = vmul.f32 0.0078125, %v1954_v33 }
 0x81d   : > { %v8669_v36 = vsub.f32 %v1950_v5, %v1956_v34  ;;  %v2032_v5 = vld [vmem:[%s9932_s29 + $0x1a0] sm:$0xff] }
 0x81e   : > { %v5963_v7 = vcombine.high %v2028_v4, %v2032_v5  ;;  %v5962_v9 = vcombine.low %v2028_v4, %v2032_v5  ;;  %v5943_v4 = vcombine.high %v2006_v61, %v2010_v62  ;;  %v5945_v5 = vcombine.high %v2007_v63, %v2011_v1  ;;  %v7337_v61 = vld [vmem:[%s9933_s18 + $0x90] sm:$0xff]   ;;  %v7338_v62 = vld [vmem:[%s9933_s18 + $0x58] sm:$0xff]  }
 0x81f   : > { %v1958_v37 = vmul.f32 %v8669_v36, %v8669_v36  ;;  %v7339_v63 = vld [vmem:[%s9933_s18 + $0xd8] sm:$0xff]  }
 0x820   : > { %2418 = vmatprep.subr.bf16.mxu1 %v5963_v7  ;;  %v2018_v7 = vld [vmem:[%s9932_s29 + $0x130] sm:$0xff]  ;;  %v7340_v1 = vld [vmem:[%s9933_s18 + $0x18] sm:$0xff]  }
 0x821   : > { %1959 = vadd.xlane.f32.xlu1 %v1958_v37  ;;  %2419 = vmatpush1.bf16.msra.mxu1 %v5962_v9  ;;  %v5912_v37 = vld [vmem:[#allocation6] ss:$0 sm:$0xff]  ;;  %v2019_v9 = vld [vmem:[%s9932_s29 + $0x138] sm:$0xff]  ;;  %v5951_v44 = vcombine.high %v2014_v6, %v2018_v7  ;;  %v5950_v18 = vcombine.low %v2014_v6, %v2018_v7  ;;  %v7346_v7 = vld [vmem:[%s9933_s18 + $0x68] sm:$0xff]  }
 0x822   : > { %2420 = vmatprep.subr.bf16.mxu1 %v5971_v16  ;;  %v5953_v13 = vcombine.high %v2015_v8, %v2019_v9  ;;  %v2023_v16 = vld [vmem:[%s9932_s29 + $0x158] sm:$0xff]  ;;  %v5952_v19 = vcombine.low %v2015_v8, %v2019_v9  ;;  %v7345_v6 = vld [vmem:[%s9933_s18 + $0xa0] sm:$0xff]   ;;  %v7347_v8 = vld [vmem:[%s9933_s18 + $0xe8] sm:$0xff]  }
 0x823   : > { %v5961_v22 = vcombine.high %v2023_v16, %v2027_v17  ;;  %v5960_v29 = vcombine.low %v2023_v16, %v2027_v17  ;;  %v7348_v9 = vld [vmem:[%s9933_s18 + $0x28] sm:$0xff]   ;;  %v7355_v16 = vld [vmem:[%s9933_s18 + $0xf8] sm:$0xff]  }
 0x824   : > { %v7356_v17 = vld [vmem:[%s9933_s18 + $0x38] sm:$0xff]  }
 0x825   : > { %2421 = vmatpush1.bf16.msra.mxu1 %v5970_v15  ;;  %v2026_v15 = vld [vmem:[%s9932_s29 + $0x170] sm:$0xff] }
 0x826   : > { %2488 = vmatprep.subr.bf16.mxu1 %v5919_v24  ;;  %v5959_v21 = vcombine.high %v2022_v14, %v2026_v15  ;;  %v2034_v24 = vld [vmem:[%s9932_s29 + $0x1b0] sm:$0xff] }
 0x8ae   : > { %v1960_v31 = vpop.xlane.xlu1 %1959 }
 0x8af   : > { %v1961_v32 = vmul.f32 0.0078125, %v1960_v31 }
 0x8b1   : > { %v1962_v33 = vadd.f32 1e-05, %v1961_v32  ;;  %v5969_v32 = vcombine.high %v2031_v26, %v2035_v46 }
 0x8b3   : > { %7506 = vrsqrt.f32 %v1962_v33  ;;  %v2038_v33 = vld [vmem:[%s9932_s29 + $0x1d0] sm:$0xff] }
 0x8bd   : > { %v7507_v34 = vpop.eup %7506 }
 0x8be   : > { %v1964_v38 = vmul.f32 %v7507_v34, %v8669_v36  ;;  %v2042_v34 = vld [vmem:[%s9932_s29 + $0x1f0] sm:$0xff] }
 0x8bf   : > { %v5975_v42 = vcombine.high %v2038_v33, %v2042_v34  ;;  %v5974_v45 = vcombine.low %v2038_v33, %v2042_v34 }
 0x8c0   : > { %v1971_v41 = vmul.f32 %v5912_v37, %v1964_v38  ;;  %v2039_v37 = vld [vmem:[%s9932_s29 + $0x1d8] sm:$0xff] }
 0x8c1   : > { %v2043_v38 = vld [vmem:[%s9932_s29 + $0x1f8] sm:$0xff] }
 0x8c2   : > { %v8758_v48 = vadd.f32 %v5913_v39, %v1971_v41  ;;  %v5968_v41 = vcombine.low %v2031_v26, %v2035_v46  ;;  %v5977_v43 = vcombine.high %v2039_v37, %v2043_v38  ;;  %v5976_v47 = vcombine.low %v2039_v37, %v2043_v38  ;;  %v8948_v46 = vld [vmem:[#allocation12] sm:$0xff] }
 0x8c4   : > { %v8762_v36 = vpack.c.bf16 %v8758_v48, %v8758_v48 }
 0x8c6   : > { %2439 = vmatmul.mubr.bf16.vlgmr.msra.gmra.mrb[28].mxu1 %v8762_v36  ;;  %2480 = vmatmul.mubr.bf16.vlgmr.msra.gmra.mrb[32].mxu0 %v8762_v36 }
 0x8c7   : > { %2489 = vmatpush1.bf16.msra.mxu1 %v5918_v23  ;;  %2530 = vmatpush1.bf16.msra.mxu0 %v5920_v27  ;;  %v2030_v23 = vld [vmem:[%s9932_s29 + $0x190] sm:$0xff]  ;;  %v5958_v27 = vcombine.low %v2022_v14, %v2026_v15  ;;  %v7354_v15 = vld [vmem:[%s9933_s18 + $0x78] sm:$0xff]  }
 0x8c8   : > { %2490 = vmatprep.subr.bf16.mxu1 %v5927_v49  ;;  %2531 = vmatprep.subr.bf16.mxu0 %v5929_v51  ;;  %v5967_v31 = vcombine.high %v2030_v23, %v2034_v24  ;;  %v5966_v39 = vcombine.low %v2030_v23, %v2034_v24  ;;  %v7326_v49 = vld [vmem:[%s9933_s18 + $0x40] sm:$0xff]   ;;  %v7353_v14 = vld [vmem:[%s9933_s18 + $0xb0] sm:$0xff]  }
 0x8c9   : > { %2520 = vmatprep.mubr.bf16.mxu1 %v7865_v35  ;;  %2561 = vmatprep.mubr.bf16.mxu0 %v7865_v35  ;;  %v7327_v51 = vld [vmem:[%s9933_s18 + $0xc0] sm:$0xff]  }
 0x8cb   : > { %2491 = vmatpush1.bf16.msra.mxu1 %v5926_v56  ;;  %2532 = vmatpush1.bf16.msra.mxu0 %v5928_v57  ;;  %v7332_v56 = vld [vmem:[%s9933_s18 + $0x8] sm:$0xff]  }
 0x8cc   : > { %2492 = vmatprep.subr.bf16.mxu1 %v5935_v59  ;;  %2533 = vmatprep.subr.bf16.mxu0 %v5937_v60  ;;  %v7333_v57 = vld [vmem:[%s9933_s18 + $0x88] sm:$0xff]   ;;  %v7334_v59 = vld [vmem:[%s9933_s18 + $0x50] sm:$0xff]  }
 0x8cd   : > { %v7336_v60 = vld [vmem:[%s9933_s18 + $0x10] sm:$0xff]  }
 0x8cf   : > { %2493 = vmatpush1.bf16.msra.mxu1 %v5934_v2  ;;  %2534 = vmatpush1.bf16.msra.mxu0 %v5936_v3  ;;  %v7341_v2 = vld [vmem:[%s9933_s18 + $0x98] sm:$0xff]   ;;  %v7342_v3 = vld [vmem:[%s9933_s18 + $0x60] sm:$0xff]  }
 0x8d0   : > { %2494 = vmatprep.subr.bf16.mxu1 %v5943_v4  ;;  %2535 = vmatprep.subr.bf16.mxu0 %v5945_v5  ;;  %v7343_v4 = vld [vmem:[%s9933_s18 + $0xe0] sm:$0xff]  }
 0x8d1   : > { %v7344_v5 = vld [vmem:[%s9933_s18 + $0x20] sm:$0xff]  }
 0x8d3   : > { %2495 = vmatpush1.bf16.msra.mxu1 %v5942_v10  ;;  %2536 = vmatpush1.bf16.msra.mxu0 %v5944_v11  ;;  %v7349_v10 = vld [vmem:[%s9933_s18 + $0xa8] sm:$0xff]   ;;  %v7350_v11 = vld [vmem:[%s9933_s18 + $0x70] sm:$0xff]  }
 0x8d4   : > { %2496 = vmatprep.subr.bf16.mxu1 %v5951_v44  ;;  %2537 = vmatprep.subr.bf16.mxu0 %v5953_v13  ;;  %v7351_v44 = vld [vmem:[%s9933_s18 + $0xf0] sm:$0xff]  }
 0x8d5   : > { %v7352_v13 = vld [vmem:[%s9933_s18 + $0x30] sm:$0xff]  }
 0x8d7   : > { %2497 = vmatpush1.bf16.msra.mxu1 %v5950_v18  ;;  %2538 = vmatpush1.bf16.msra.mxu0 %v5952_v19  ;;  %v7357_v18 = vld [vmem:[%s9933_s18 + $0xb8] sm:$0xff]   ;;  %v7358_v19 = vld [vmem:[%s9933_s18 + $0x140] sm:$0xff]  }
 0x8d8   : > { %2498 = vmatprep.subr.bf16.mxu1 %v5959_v21  ;;  %2539 = vmatprep.subr.bf16.mxu0 %v5961_v22  ;;  %v7359_v21 = vld [vmem:[%s9933_s18 + $0x1c0] sm:$0xff]   ;;  %v2046_v22 = vlaneseq }
 0x8da   : > { %v8944_v23 = vshrl.u32 %v2046_v22, 7  ;;  %v7380_v22 = vld [vmem:[%s9933_s18 + $0x128] sm:$0xff]  }
 0x8db   : > { %2499 = vmatpush1.bf16.msra.mxu1 %v5958_v27  ;;  %2540 = vmatpush1.bf16.msra.mxu0 %v5960_v29 }
 0x8dc   : > { %2500 = vmatprep.subr.bf16.mxu1 %v5967_v31  ;;  %2541 = vmatprep.subr.bf16.mxu0 %v5969_v32  ;;  %v2048_v24 = vsub.s32 0, %v8944_v23  ;;  %v2056_v26 = vsub.s32 2, %v8944_v23  ;;  %v2052_v27 = vsub.s32 1, %v8944_v23  ;;  %v2060_v29 = vsub.s32 3, %v8944_v23 }
 0x8de   : > { %v2049_v31 = vrot.slane %v8948_v46, %v2048_v24  ;;  %v2057_v32 = vrot.slane %v8948_v46, %v2056_v26  ;;  %v2053_v33 = vrot.slane %v8948_v46, %v2052_v27  ;;  %v2061_v34 = vrot.slane %v8948_v46, %v2060_v29 }
 0x8df   : > { %2501 = vmatpush1.bf16.msra.mxu1 %v5966_v39  ;;  %2542 = vmatpush1.bf16.msra.mxu0 %v5968_v41 }
 0x8e0   : > { %2502 = vmatprep.subr.bf16.mxu1 %v5975_v42  ;;  %2543 = vmatprep.subr.bf16.mxu0 %v5977_v43 }
 0x8e3   : > { %2503 = vmatpush1.bf16.msra.mxu1 %v5974_v45  ;;  %2544 = vmatpush1.bf16.msra.mxu0 %v5976_v47 }
 0x8e4   : > { %6565 = vmatprep.subr.bf16.mxu1 %v7326_v49  ;;  %6587 = vmatprep.subr.bf16.mxu0 %v7327_v51 }
 0x8e6   : > { %2521 = vmatmul.mubr.bf16.vlgmr.msra.gmra.mrb[32].mxu1 %v8762_v36  ;;  %2562 = vmatmul.mubr.bf16.vlgmr.msra.gmra.mrb[36].mxu0 %v8762_v36  ;;  %v7335_v36 = vld [vmem:[%s9933_s18 + $0xd0] sm:$0xff]  }
 0x8e7   : > { %6566 = vmatpush3.bf16.msra.mxu1 %v7328_v52  ;;  %6588 = vmatpush3.bf16.msra.mxu0 %v7329_v53 }
 0x8e8   : > { %6567 = vmatprep.subr.bf16.mxu1 %v7330_v54  ;;  %6589 = vmatprep.subr.bf16.mxu0 %v7331_v55 }
 0x8eb   : > { %6568 = vmatpush3.bf16.msra.mxu1 %v7332_v56  ;;  %6590 = vmatpush3.bf16.msra.mxu0 %v7333_v57 }
 0x8ec   : > { %6569 = vmatprep.subr.bf16.mxu1 %v7334_v59  ;;  %6591 = vmatprep.subr.bf16.mxu0 %v7335_v36 }
 0x8ef   : > { %6570 = vmatpush3.bf16.msra.mxu1 %v7336_v60  ;;  %6592 = vmatpush3.bf16.msra.mxu0 %v7337_v61  ;;  %v7360_v60 = vld [vmem:[%s9933_s18 + $0x100] sm:$0xff]  }
 0x8f0   : > { %6571 = vmatprep.subr.bf16.mxu1 %v7338_v62  ;;  %6593 = vmatprep.subr.bf16.mxu0 %v7339_v63  ;;  %v7361_v61 = vld [vmem:[%s9933_s18 + $0x180] sm:$0xff]  }
 0x8f3   : > { %6572 = vmatpush3.bf16.msra.mxu1 %v7340_v1  ;;  %6594 = vmatpush3.bf16.msra.mxu0 %v7341_v2  ;;  %v7362_v1 = vld [vmem:[%s9933_s18 + $0x148] sm:$0xff]  }
 0x8f4   : > { %6573 = vmatprep.subr.bf16.mxu1 %v7342_v3  ;;  %6595 = vmatprep.subr.bf16.mxu0 %v7343_v4  ;;  %v7363_v2 = vld [vmem:[%s9933_s18 + $0x1c8] sm:$0xff]  }
 0x8f5   : > { %v7364_v3 = vld [vmem:[%s9933_s18 + $0x108] sm:$0xff]  }
 0x8f6   : > { %v7365_v4 = vld [vmem:[%s9933_s18 + $0x188] sm:$0xff]  }
 0x8f7   : > { %6574 = vmatpush3.bf16.msra.mxu1 %v7344_v5  ;;  %6596 = vmatpush3.bf16.msra.mxu0 %v7345_v6  ;;  %v7366_v5 = vld [vmem:[%s9933_s18 + $0x150] sm:$0xff]  }
 0x8f8   : > { %6575 = vmatprep.subr.bf16.mxu1 %v7346_v7  ;;  %6597 = vmatprep.subr.bf16.mxu0 %v7347_v8  ;;  %v7367_v6 = vld [vmem:[%s9933_s18 + $0x1d0] sm:$0xff]  }
 0x8f9   : > { %v7368_v7 = vld [vmem:[%s9933_s18 + $0x110] sm:$0xff]  }
 0x8fa   : > { %v7369_v8 = vld [vmem:[%s9933_s18 + $0x190] sm:$0xff]  }
 0x8fb   : > { %6576 = vmatpush3.bf16.msra.mxu1 %v7348_v9  ;;  %6598 = vmatpush3.bf16.msra.mxu0 %v7349_v10  ;;  %v7370_v9 = vld [vmem:[%s9933_s18 + $0x158] sm:$0xff]  }
 0x8fc   : > { %6577 = vmatprep.subr.bf16.mxu1 %v7350_v11  ;;  %6599 = vmatprep.subr.bf16.mxu0 %v7351_v44  ;;  %v7371_v10 = vld [vmem:[%s9933_s18 + $0x1d8] sm:$0xff]  }
 0x8fd   : > { %v7372_v11 = vld [vmem:[%s9933_s18 + $0x118] sm:$0xff]  }
 0x8fe   : > { %v7373_v44 = vld [vmem:[%s9933_s18 + $0x198] sm:$0xff]  }
 0x8ff   : > { %6578 = vmatpush3.bf16.msra.mxu1 %v7352_v13  ;;  %6600 = vmatpush3.bf16.msra.mxu0 %v7353_v14  ;;  %v7374_v13 = vld [vmem:[%s9933_s18 + $0x160] sm:$0xff]  }
 0x900   : > { %6579 = vmatprep.subr.bf16.mxu1 %v7354_v15  ;;  %6601 = vmatprep.subr.bf16.mxu0 %v7355_v16  ;;  %v7375_v14 = vld [vmem:[%s9933_s18 + $0x1e0] sm:$0xff]  }
 0x901   : > { %v7376_v15 = vld [vmem:[%s9933_s18 + $0x120] sm:$0xff]  }
 0x902   : > { %v7377_v16 = vld [vmem:[%s9933_s18 + $0x1a0] sm:$0xff]  }
 0x903   : > { %6580 = vmatpush3.bf16.msra.mxu1 %v7356_v17  ;;  %6602 = vmatpush3.bf16.msra.mxu0 %v7357_v18  ;;  %v7378_v17 = vld [vmem:[%s9933_s18 + $0x168] sm:$0xff]  }
 0x904   : > { %6609 = vmatprep.subr.bf16.mxu1 %v7358_v19  ;;  %6631 = vmatprep.subr.bf16.mxu0 %v7359_v21  ;;  %v7379_v18 = vld [vmem:[%s9933_s18 + $0x1e8] sm:$0xff]   ;;  %v2064_v19 = vsub.s32 4, %v8944_v23  ;;  %v2072_v21 = vsub.s32 6, %v8944_v23 }
 0x999   : > { %v2440_v37 = vpop.f32.mrb[28].mxu1  ;;  %v2481_v38 = vpop.f32.mrb[32].mxu0 }
 0x99a   : > { %v2441_v39 = vadd.f32 %v2440_v37, %v2049_v31  ;;  %v2482_v41 = vadd.f32 %v2481_v38, %v2057_v32  ;;  %v2442_v42 = vpop.f32.mrb[29].mxu1  ;;  %v2483_v43 = vpop.f32.mrb[33].mxu0  ;;  %v7381_v31 = vld [vmem:[%s9933_s18 + $0x1a8] sm:$0xff]   ;;  %v2068_v32 = vsub.s32 5, %v8944_v23  ;;  %v7383_v37 = vld [vmem:[%s9933_s18 + $0x1f0] sm:$0xff]   ;;  %v2065_v38 = vrot.slane %v8948_v46, %v2064_v19 }
 0x99b   : > { %v2443_v45 = vadd.f32 %v2442_v42, %v2053_v33  ;;  %v2484_v47 = vadd.f32 %v2483_v43, %v2061_v34  ;;  %v2444_v49 = vpop.f32.mrb[30].mxu1  ;;  %v2485_v51 = vpop.f32.mrb[34].mxu0  ;;  %v2076_v33 = vsub.s32 7, %v8944_v23  ;;  %v7382_v34 = vld [vmem:[%s9933_s18 + $0x170] sm:$0xff]   ;;  %v7491_v23 = vld [vmem:[%s9933_s18 + $0x3f8] sm:$0xff]  }
 0x99c   : > { %v2570_v52 = vmax.f32 %v2441_v39, 0.0  ;;  %v2572_v53 = vmax.f32 %v2482_v41, 0.0  ;;  %v2445_v54 = vpop.f32.mrb[31].mxu1  ;;  %v2486_v55 = vpop.f32.mrb[35].mxu0  ;;  %v2073_v39 = vrot.slane %v8948_v46, %v2072_v21  ;;  %v2069_v41 = vrot.slane %v8948_v46, %v2068_v32  ;;  %v7384_v43 = vld [vmem:[%s9933_s18 + $0x130] sm:$0xff]   ;;  %v7387_v49 = vld [vmem:[%s9933_s18 + $0x1f8] sm:$0xff]  }
 0x99d   : > { %v2571_v56 = vmax.f32 %v2443_v45, 0.0  ;;  %v2573_v57 = vmax.f32 %v2484_v47, 0.0  ;;  %v2077_v42 = vrot.slane %v8948_v46, %v2076_v33  ;;  %v7385_v45 = vld [vmem:[%s9933_s18 + $0x1b0] sm:$0xff]   ;;  %v7386_v47 = vld [vmem:[%s9933_s18 + $0x178] sm:$0xff]  }
 0x99e   : > { %v2578_v62 = vpack.c.bf16 %v2570_v52, %v2570_v52  ;;  %v2580_v63 = vpack.c.bf16 %v2572_v53, %v2572_v53 }
 0x99f   : > { %v2579_v59 = vpack.c.bf16 %v2571_v56, %v2571_v56  ;;  %v2581_v36 = vpack.c.bf16 %v2573_v57, %v2573_v57 }
 0x9a1   : > { %3137 = vmatprep.mubr.bf16.mxu1 %v2579_v59  ;;  %3177 = vmatprep.mubr.bf16.mxu0 %v2581_v36 }
 0x9a2   : > { %3138 = vmatmul.mubr.bf16.vlgmr.msra.gmra.mrb[36].mxu1 %v2578_v62  ;;  %3178 = vmatmul.mubr.bf16.vlgmr.msra.gmra.mrb[40].mxu0 %v2580_v63 }
 0x9a3   : > { %6610 = vmatpush3.bf16.msra.mxu1 %v7360_v60  ;;  %6632 = vmatpush3.bf16.msra.mxu0 %v7361_v61  ;;  %v7388_v60 = vld [vmem:[%s9933_s18 + $0x138] sm:$0xff]  }
 0x9a4   : > { %6611 = vmatprep.subr.bf16.mxu1 %v7362_v1  ;;  %6633 = vmatprep.subr.bf16.mxu0 %v7363_v2  ;;  %v7389_v61 = vld [vmem:[%s9933_s18 + $0x1b8] sm:$0xff]  }
 0x9a7   : > { %6612 = vmatpush3.bf16.msra.mxu1 %v7364_v3  ;;  %6634 = vmatpush3.bf16.msra.mxu0 %v7365_v4 }
 0x9a8   : > { %6613 = vmatprep.subr.bf16.mxu1 %v7366_v5  ;;  %6635 = vmatprep.subr.bf16.mxu0 %v7367_v6 }
 0x9ab   : > { %6614 = vmatpush3.bf16.msra.mxu1 %v7368_v7  ;;  %6636 = vmatpush3.bf16.msra.mxu0 %v7369_v8 }
 0x9ac   : > { %6615 = vmatprep.subr.bf16.mxu1 %v7370_v9  ;;  %6637 = vmatprep.subr.bf16.mxu0 %v7371_v10 }
 0x9af   : > { %6616 = vmatpush3.bf16.msra.mxu1 %v7372_v11  ;;  %6638 = vmatpush3.bf16.msra.mxu0 %v7373_v44  ;;  %v5978_v11 = vld [vmem:[#allocation13] ss:$0 sm:$0xff] }
 0x9b0   : > { %6617 = vmatprep.subr.bf16.mxu1 %v7374_v13  ;;  %6639 = vmatprep.subr.bf16.mxu0 %v7375_v14 }
 0x9b3   : > { %6618 = vmatpush3.bf16.msra.mxu1 %v7376_v15  ;;  %6640 = vmatpush3.bf16.msra.mxu0 %v7377_v16 }
 0x9b4   : > { %6619 = vmatprep.subr.bf16.mxu1 %v7378_v17  ;;  %6641 = vmatprep.subr.bf16.mxu0 %v7379_v18 }
 0x9b7   : > { %6620 = vmatpush3.bf16.msra.mxu1 %v7380_v22  ;;  %6642 = vmatpush3.bf16.msra.mxu0 %v7381_v31 }
 0x9b8   : > { %6621 = vmatprep.subr.bf16.mxu1 %v7382_v34  ;;  %6643 = vmatprep.subr.bf16.mxu0 %v7383_v37 }
 0x9b9   : > { %v2522_v51 = vpop.f32.mrb[32].mxu1  ;;  %v2563_v46 = vpop.f32.mrb[36].mxu0 }
 0x9ba   : > { %v2523_v52 = vadd.f32 %v2522_v51, %v2065_v38  ;;  %v2564_v53 = vadd.f32 %v2563_v46, %v2073_v39  ;;  %v2524_v54 = vpop.f32.mrb[33].mxu1  ;;  %v2565_v55 = vpop.f32.mrb[37].mxu0 }
 0x9bb   : > { %v2525_v56 = vadd.f32 %v2524_v54, %v2069_v41  ;;  %v2566_v57 = vadd.f32 %v2565_v55, %v2077_v42  ;;  %v2526_v59 = vpop.f32.mrb[34].mxu1  ;;  %v2567_v36 = vpop.f32.mrb[38].mxu0  ;;  %6622 = vmatpush3.bf16.msra.mxu1 %v7384_v43  ;;  %6644 = vmatpush3.bf16.msra.mxu0 %v7385_v45  ;;  %v7390_v54 = vld [vmem:[%s9872_s9 + $0xc0] ss:$12 sps:$4 sm:$0xff]   ;;  %v7392_v55 = vld [vmem:[%s9872_s9 + $0xc4] ss:$12 sps:$4 sm:$0xff]  }
 0x9bc   : > { %v2574_v62 = vmax.f32 %v2523_v52, 0.0  ;;  %v2576_v63 = vmax.f32 %v2564_v53, 0.0  ;;  %v2527_v1 = vpop.f32.mrb[35].mxu1  ;;  %v2568_v2 = vpop.f32.mrb[39].mxu0  ;;  %6623 = vmatprep.subr.bf16.mxu1 %v7386_v47  ;;  %6645 = vmatprep.subr.bf16.mxu0 %v7387_v49  ;;  %v7394_v59 = vld [vmem:[%s9872_s9 + $0xd8] ss:$12 sps:$4 sm:$0xff]  }
 0x9bd   : > { %v2575_v3 = vmax.f32 %v2525_v56, 0.0  ;;  %v2577_v4 = vmax.f32 %v2566_v57, 0.0  ;;  %v7393_v56 = vld [vmem:[%s9872_s9 + $0xc8] ss:$12 sps:$4 sm:$0xff]   ;;  %v7401_v2 = vld [vmem:[%s9872_s9 + $0xf8] ss:$12 sps:$4 sm:$0xff]  }
 0x9be   : > { %v2582_v7 = vpack.c.bf16 %v2574_v62, %v2574_v62  ;;  %v2584_v8 = vpack.c.bf16 %v2576_v63, %v2576_v63  ;;  %v7396_v57 = vld [vmem:[%s9872_s9 + $0xdc] ss:$12 sps:$4 sm:$0xff]   ;;  %v7400_v36 = vld [vmem:[%s9872_s9 + $0xf4] ss:$12 sps:$4 sm:$0xff]  }
 0x9bf   : > { %v2583_v5 = vpack.c.bf16 %v2575_v3, %v2575_v3  ;;  %v2585_v6 = vpack.c.bf16 %v2577_v4, %v2577_v4  ;;  %6624 = vmatpush3.bf16.msra.mxu1 %v7388_v60  ;;  %6646 = vmatpush3.bf16.msra.mxu0 %v7389_v61  ;;  %v7398_v60 = vld [vmem:[%s9872_s9 + $0xf0] ss:$12 sps:$4 sm:$0xff]   ;;  %v7404_v3 = vld [vmem:[%s9872_s9 + $0x10c] ss:$12 sps:$4 sm:$0xff]   ;;  %v7402_v4 = vld [vmem:[%s9872_s9 + $0x108] ss:$12 sps:$4 sm:$0xff]  }
 0x9c0   : > { %6999 = vmatprep.subr.bf16.mxu0 %v7863_v0  ;;  %3455 = vmatprep.subr.bf16.mxu1 %v7392_v55 }
 0x9c1   : > { %3217 = vmatprep.mubr.bf16.mxu1 %v2583_v5  ;;  %3257 = vmatprep.mubr.bf16.mxu0 %v2585_v6  ;;  %v7405_v5 = vld [vmem:[%s9872_s9 + $0x110] ss:$12 sps:$4 sm:$0xff]  }
 0x9c2   : > { %3218 = vmatmul.mubr.bf16.vlgmr.msra.gmra.mrb[40].mxu1 %v2582_v7  ;;  %3258 = vmatmul.mubr.bf16.vlgmr.msra.gmra.mrb[44].mxu0 %v2584_v8  ;;  %v7408_v6 = vld [vmem:[%s9872_s9 + $0x124] ss:$12 sps:$4 sm:$0xff]   ;;  %v7406_v7 = vld [vmem:[%s9872_s9 + $0x120] ss:$12 sps:$4 sm:$0xff]   ;;  %v7409_v8 = vld [vmem:[%s9872_s9 + $0x128] ss:$12 sps:$4 sm:$0xff]  }
 0x9c3   : > { %3487 = vmatprep.mubr.bf16.mxu1 %v7865_v35  ;;  %7015 = vmatprep.mubr.msk.bf16.mxu0 %vm7864_vm0, %v7863_v0 }
 0x9c4   : > { %7000 = vmatpush3.bf16.msra.mxu0 %v7393_v56  ;;  %3456 = vmatpush1.bf16.msra.mxu1 %v7390_v54 }
 0x9c5   : > { %7001 = vmatprep.subr.bf16.mxu0 %v7863_v0  ;;  %3457 = vmatprep.subr.bf16.mxu1 %v7396_v57  ;;  %v7520_v57 = vld [vmem:[%s9928_s22 + $0x8] sm:$0xff] }
 0x9c8   : > { %3458 = vmatpush1.bf16.msra.mxu1 %v7394_v59  ;;  %v7522_v59 = vld [vmem:[%s9928_s22 + $0x18] sm:$0xff] }
 0x9c9   : > { %3459 = vmatprep.subr.bf16.mxu1 %v7400_v36  ;;  %v7523_v36 = vld [vmem:[%s9928_s22 + $0x20] sm:$0xff] }
 0x9cc   : > { %3460 = vmatpush1.bf16.msra.mxu1 %v7398_v60  ;;  %v7524_v60 = vld [vmem:[%s9928_s22 + $0x28] sm:$0xff] }
 0x9cd   : > { %3461 = vmatprep.subr.bf16.mxu1 %v7404_v3  ;;  %v7530_v3 = vld [vmem:[%s9928_s22 + $0x58] sm:$0xff] }
 0x9d0   : > { %3462 = vmatpush1.bf16.msra.mxu1 %v7402_v4  ;;  %v7531_v4 = vld [vmem:[%s9928_s22 + $0x60] sm:$0xff] }
 0x9d1   : > { %3463 = vmatprep.subr.bf16.mxu1 %v7408_v6  ;;  %v7533_v6 = vld [vmem:[%s9928_s22 + $0x70] sm:$0xff] }
 0x9d4   : > { %3464 = vmatpush1.bf16.msra.mxu1 %v7406_v7  ;;  %v7534_v7 = vld [vmem:[%s9928_s22 + $0x78] sm:$0xff] }
 0xa75   : > { %v6581_v9 = vpop.f32.mrb[36].mxu1  ;;  %v6603_v10 = vpop.f32.mrb[40].mxu0 }
 0xa76   : > { %v6582_v44 = vpop.f32.mrb[37].mxu1  ;;  %v6604_v13 = vpop.f32.mrb[41].mxu0 }
 0xa77   : > { %v6583_v14 = vadd.f32 %v6582_v44, %v6581_v9  ;;  %v6605_v15 = vadd.f32 %v6604_v13, %v6603_v10  ;;  %v6584_v16 = vpop.f32.mrb[38].mxu1  ;;  %v6606_v17 = vpop.f32.mrb[42].mxu0  ;;  %v7412_v9 = vld [vmem:[%s9872_s9 + $0x13c] ss:$12 sps:$4 sm:$0xff]   ;;  %v7410_v10 = vld [vmem:[%s9872_s9 + $0x138] ss:$12 sps:$4 sm:$0xff]  }
 0xa78   : > { %v6585_v18 = vpop.f32.mrb[39].mxu1  ;;  %v6607_v22 = vpop.f32.mrb[43].mxu0  ;;  %3465 = vmatprep.subr.bf16.mxu1 %v7412_v9  ;;  %v7416_v44 = vld [vmem:[%s9872_s9 + $0x154] ss:$12 sps:$4 sm:$0xff]   ;;  %v7414_v13 = vld [vmem:[%s9872_s9 + $0x150] ss:$12 sps:$4 sm:$0xff]  }
 0xa79   : > { %v3140_v31 = vadd.f32 %v6583_v14, %v5978_v11  ;;  %v7413_v11 = vld [vmem:[%s9872_s9 + $0x140] ss:$12 sps:$4 sm:$0xff]   ;;  %3466 = vmatpush1.bf16.msra.mxu1 %v7410_v10  ;;  %v7417_v14 = vld [vmem:[%s9872_s9 + $0x158] ss:$12 sps:$4 sm:$0xff]   ;;  %v7418_v16 = vld [vmem:[%s9872_s9 + $0x168] ss:$12 sps:$4 sm:$0xff]  }
 0xa7a   : > { %3467 = vmatprep.subr.bf16.mxu1 %v7416_v44  ;;  %v7421_v17 = vld [vmem:[%s9872_s9 + $0x170] ss:$12 sps:$4 sm:$0xff]   ;;  %v7518_v18 = vld [vmem:[%s9927_s26] sm:$0xff] }
 0xa7b   : > { %v3180_v34 = vadd.f32 %v6605_v15, %v3140_v31  ;;  %v7420_v15 = vld [vmem:[%s9872_s9 + $0x16c] ss:$12 sps:$4 sm:$0xff]  }
 0xa7d   : > { %3468 = vmatpush1.bf16.msra.mxu1 %v7414_v13 }
 0xa7e   : > { %3469 = vmatprep.subr.bf16.mxu1 %v7420_v15 }
 0xa81   : > { %3470 = vmatpush1.bf16.msra.mxu1 %v7418_v16 }
 0xa82   : > { %7019 = vmatprep.subr.mxu1 %v7518_v18 }
 0xa95   : > { %v6625_v37 = vpop.f32.mrb[40].mxu1  ;;  %v6647_v38 = vpop.f32.mrb[44].mxu0 }
 0xa96   : > { %v6626_v39 = vpop.f32.mrb[41].mxu1  ;;  %v6648_v41 = vpop.f32.mrb[45].mxu0 }
 0xa97   : > { %v6627_v42 = vadd.f32 %v6626_v39, %v6625_v37  ;;  %v6649_v43 = vadd.f32 %v6648_v41, %v6647_v38  ;;  %v6628_v45 = vpop.f32.mrb[42].mxu1  ;;  %v6650_v47 = vpop.f32.mrb[46].mxu0  ;;  %v6043_v38 = vld [vmem:[#allocation9] ss:$0 sm:$0xff]  ;;  %v6044_v41 = vld [vmem:[#allocation10] ss:$0 sm:$0xff] }
 0xa98   : > { %v6629_v49 = vpop.f32.mrb[43].mxu1  ;;  %v6651_v51 = vpop.f32.mrb[47].mxu0  ;;  %v7519_v47 = vld [vmem:[%s9928_s22] sm:$0xff] }
 0xa99   : > { %v3220_v46 = vadd.f32 %v6627_v42, %v3180_v34 }
 0xa9b   : > { %v3260_v52 = vadd.f32 %v6649_v43, %v3220_v46 }
 0xa9d   : > { %v3265_v53 = vadd.f32 %v3260_v52, %v8758_v48  ;;  %v7397_v48 = vld [vmem:[%s9872_s9 + $0xe0] ss:$12 sps:$4 sm:$0xff]  }
 0xa9e   : > { %7002 = vmatpush3.bf16.msra.mxu0 %v7397_v48  ;;  %v7521_v48 = vld [vmem:[%s9928_s22 + $0x10] sm:$0xff] }
 0xa9f   : > { %3268 = vadd.xlane.f32.xlu1 %v3265_v53  ;;  %7003 = vmatprep.subr.bf16.mxu0 %v7863_v0 }
 0xaa2   : > { %7004 = vmatpush3.bf16.msra.mxu0 %v7401_v2  ;;  %v7529_v2 = vld [vmem:[%s9928_s22 + $0x50] sm:$0xff] }
 0xaa3   : > { %7005 = vmatprep.subr.bf16.mxu0 %v7863_v0 }
 0xaa6   : > { %7006 = vmatpush3.bf16.msra.mxu0 %v7405_v5  ;;  %v7532_v5 = vld [vmem:[%s9928_s22 + $0x68] sm:$0xff] }
 0xaa7   : > { %7007 = vmatprep.subr.bf16.mxu0 %v7863_v0 }
 0xaaa   : > { %7008 = vmatpush3.bf16.msra.mxu0 %v7409_v8 }
 0xaab   : > { %7009 = vmatprep.subr.bf16.mxu0 %v7863_v0 }
 0xaae   : > { %7010 = vmatpush3.bf16.msra.mxu0 %v7413_v11 }
 0xaaf   : > { %7011 = vmatprep.subr.bf16.mxu0 %v7863_v0 }
 0xab2   : > { %7012 = vmatpush3.bf16.msra.mxu0 %v7417_v14 }
 0xab3   : > { %7013 = vmatprep.subr.bf16.mxu0 %v7863_v0 }
 0xab6   : > { %7014 = vmatpush3.bf16.msra.mxu0 %v7421_v17 }
 0xb2c   : > { %v3269_v61 = vpop.xlane.xlu1 %3268 }
 0xb2d   : > { %v3270_v62 = vmul.f32 0.0078125, %v3269_v61  ;;  %v7525_v61 = vld [vmem:[%s9928_s22 + $0x30] sm:$0xff] }
 0xb2f   : > { %v3271_v63 = vsub.f32 %v3265_v53, %v3270_v62  ;;  %v7526_v62 = vld [vmem:[%s9928_s22 + $0x38] sm:$0xff] }
 0xb31   : > { %v3272_v1 = vmul.f32 %v3271_v63, %v3271_v63 }
 0xb33   : > { %3273 = vadd.xlane.f32.xlu1 %v3272_v1  ;;  %v7528_v1 = vld [vmem:[%s9928_s22 + $0x48] sm:$0xff] }
 0xbc0   : > { %v3274_v22 = vpop.xlane.xlu1 %3273 }
 0xbc1   : > { %v3275_v31 = vmul.f32 0.0078125, %v3274_v22 }
 0xbc3   : > { %v3276_v34 = vadd.f32 1e-05, %v3275_v31 }
 0xbc5   : > { %7508 = vrsqrt.f32 %v3276_v34 }
 0xbcf   : > { %v7509_v37 = vpop.eup %7508 }
 0xbd0   : > { %v3278_v39 = vmul.f32 %v7509_v37, %v3271_v63  ;;  %v7527_v63 = vld [vmem:[%s9928_s22 + $0x40] sm:$0xff] }
 0xbd2   : > { %v3285_v42 = vmul.f32 %v6043_v38, %v3278_v39 }
 0xbd4   : > { %v9157_v43 = vadd.f32 %v6044_v41, %v3285_v42  ;;  %v7535_v41 = vld [vmem:[%s9929_s6 + $0x8] sm:$0xff] }
 0xbd6   : > { %v3293_v45 = vpack.c.bf16 %v9157_v43, %v9157_v43 }
 0xbd8   : > { %3488 = vmatmul.mubr.bf16.vlgmr.msra.gmra.mrb[44].mxu1 %v3293_v45  ;;  %7016 = vmatmul.mubr.bf16.vlgmr.msra.gmra.mrb[48].mxu0 %v3293_v45 }
 0xbd9   : > { %7020 = vmatpush3.msra.mxu1 %v7518_v18  ;;  %7067 = vmatprep.mubr.msk.f32.mxu0 %vm1267_vm3, %v7519_v47  ;;  %v7536_v47 = vld [vmem:[%s9929_s6] sm:$0xff] }
 0xbda   : > { %7045 = vmatprep.subr.bf16.mxu1 %v7863_v0 }
 0xcab   : > { %v9166_v49 = vpop.f32.mrb[44].mxu1  ;;  %v3530_v51 = vpop.f32.mrb[48].mxu0 }
 0xcac   : > { %v3491_v46 = vpop.f32.mrb[45].mxu1  ;;  %v7017_v52 = vpop.f32.mrb[49].mxu0  ;;  %7065 = vmatprep.subr.mxu0 %v3530_v51 }
 0xcad   : > { %v3533_v53 = vpop.f32.mrb[50].mxu0  ;;  %7066 = vmatpush3.msra.mxu0 %v3530_v51  ;;  %3536 = vxpose.xlu1.b32.start.end [1/1] (short) %v3491_v46, 128  ;;  %v3493_v54 = vpop.f32.mrb[46].mxu1 }
 0xcae   : > { %v3494_v55 = vpop.f32.mrb[47].mxu1  ;;  %v7018_v56 = vpop.f32.mrb[51].mxu0  ;;  %7068 = vmatmul.mubr.msk.f32.vlgmr.msra.gmra.mrb[52].mxu0 %vm1267_vm3, %v7520_v57  ;;  %7091 = vmatprep.subr.bf16.mxu0 %v7863_v0  ;;  %v7537_v53 = vld [vmem:[%s9929_s6 + $0x18] sm:$0xff] }
 0xcaf   : > { %7070 = vmatprep.mubr.msk.f32.mxu0 %vm1267_vm3, %v7521_v48  ;;  %v7538_v56 = vld [vmem:[%s9929_s6 + $0x10] sm:$0xff] }
 0xcb2   : > { %7071 = vmatmul.mubr.msk.f32.gmra.mrb[54].mxu0 %vm1267_vm3, %v7522_v59 }
 0xcb3   : > { %7073 = vmatprep.mubr.msk.f32.mxu0 %vm1267_vm3, %v7523_v36  ;;  %v7539_v36 = vld [vmem:[%s9929_s6 + $0x28] sm:$0xff] }
 0xcb6   : > { %7074 = vmatmul.mubr.msk.f32.gmra.mrb[56].mxu0 %vm1267_vm3, %v7524_v60 }
 0xcb7   : > { %7076 = vmatprep.mubr.msk.f32.mxu0 %vm1267_vm3, %v7525_v61 }
 0xcba   : > { %7077 = vmatmul.mubr.msk.f32.gmra.mrb[58].mxu0 %vm1267_vm3, %v7526_v62  ;;  %v7540_v62 = vld [vmem:[%s9929_s6 + $0x20] sm:$0xff] }
 0xcbb   : > { %7079 = vmatprep.mubr.msk.f32.mxu0 %vm1267_vm3, %v7527_v63 }
 0xcbe   : > { %7080 = vmatmul.mubr.msk.f32.gmra.mrb[60].mxu0 %vm1267_vm3, %v7528_v1 }
 0xcbf   : > { %7082 = vmatprep.mubr.msk.f32.mxu0 %vm1267_vm3, %v7529_v2 }
 0xcc2   : > { %7083 = vmatmul.mubr.msk.f32.gmra.mrb[62].mxu0 %vm1267_vm3, %v7530_v3  ;;  %v7541_v3 = vld [vmem:[%s9929_s6 + $0x38] sm:$0xff] }
 0xcc3   : > { %7085 = vmatprep.mubr.msk.f32.mxu0 %vm1267_vm3, %v7531_v4 }
 0xcc6   : > { %7086 = vmatmul.mubr.msk.f32.gmra.mrb[64].mxu0 %vm1267_vm3, %v7532_v5 }
 0xcc7   : > { %7088 = vmatprep.mubr.msk.f32.mxu0 %vm1267_vm3, %v7533_v6  ;;  %v7542_v6 = vld [vmem:[%s9929_s6 + $0x30] sm:$0xff] }
 0xcca   : > { %7089 = vmatmul.mubr.msk.f32.gmra.mrb[66].mxu0 %vm1267_vm3, %v7534_v7 }
 0xccb   : > { %7107 = vmatprep.mubr.msk.bf16.mxu0 %vm7864_vm0, %v7863_v0 }
 0xd2d   : > { %v3552_v8 = vpop.trf.xlu1 }
 0xd2e   : > { %7021 = vmatprep.mubr.msk.f32.mxu1 %vm1267_vm3, %v3552_v8 }
 0xd31   : > { %v3553_v9 = vpop.trf.xlu1 }
 0xd32   : > { %7022 = vmatmul.mubr.msk.f32.vlgmr.msra.gmra.mrb[48].mxu1 %vm1267_vm3, %v3553_v9 }
 0xd35   : > { %v3554_v10 = vpop.trf.xlu1 }
 0xd36   : > { %7024 = vmatprep.mubr.msk.f32.mxu1 %vm1267_vm3, %v3554_v10  ;;  %v7543_v10 = vld [vmem:[%s9929_s6 + $0x48] sm:$0xff] }
 0xd39   : > { %v3555_v11 = vpop.trf.xlu1 }
 0xd3a   : > { %7025 = vmatmul.mubr.msk.f32.gmra.mrb[50].mxu1 %vm1267_vm3, %v3555_v11 }
 0xd3d   : > { %v3556_v44 = vpop.trf.xlu1 }
 0xd3e   : > { %7027 = vmatprep.mubr.msk.f32.mxu1 %vm1267_vm3, %v3556_v44 }
 0xd41   : > { %v3557_v13 = vpop.trf.xlu1 }
 0xd42   : > { %7028 = vmatmul.mubr.msk.f32.gmra.mrb[52].mxu1 %vm1267_vm3, %v3557_v13  ;;  %v7544_v13 = vld [vmem:[%s9929_s6 + $0x40] sm:$0xff] }
 0xd45   : > { %v3558_v14 = vpop.trf.xlu1 }
 0xd46   : > { %7030 = vmatprep.mubr.msk.f32.mxu1 %vm1267_vm3, %v3558_v14 }
 0xd49   : > { %v3559_v15 = vpop.trf.xlu1 }
 0xd4a   : > { %7031 = vmatmul.mubr.msk.f32.gmra.mrb[54].mxu1 %vm1267_vm3, %v3559_v15 }
 0xd4d   : > { %v3560_v16 = vpop.trf.xlu1 }
 0xd4e   : > { %7033 = vmatprep.mubr.msk.f32.mxu1 %vm1267_vm3, %v3560_v16 }
 0xd51   : > { %v3561_v17 = vpop.trf.xlu1 }
 0xd52   : > { %7034 = vmatmul.mubr.msk.f32.gmra.mrb[56].mxu1 %vm1267_vm3, %v3561_v17  ;;  %v7545_v17 = vld [vmem:[%s9929_s6 + $0x58] sm:$0xff] }
 0xd55   : > { %v3562_v18 = vpop.trf.xlu1 }
 0xd56   : > { %7036 = vmatprep.mubr.msk.f32.mxu1 %vm1267_vm3, %v3562_v18 }
 0xd59   : > { %v3563_v22 = vpop.trf.xlu1 }
 0xd5a   : > { %7037 = vmatmul.mubr.msk.f32.gmra.mrb[58].mxu1 %vm1267_vm3, %v3563_v22 }
 0xd5d   : > { %v3564_v31 = vpop.trf.xlu1 }
 0xd5e   : > { %7039 = vmatprep.mubr.msk.f32.mxu1 %vm1267_vm3, %v3564_v31  ;;  %v7546_v31 = vld [vmem:[%s9929_s6 + $0x50] sm:$0xff] }
 0xd61   : > { %v3565_v34 = vpop.trf.xlu1 }
 0xd62   : > { %7040 = vmatmul.mubr.msk.f32.gmra.mrb[60].mxu1 %vm1267_vm3, %v3565_v34 }
 0xd65   : > { %v3566_v37 = vpop.trf.xlu1 }
 0xd66   : > { %7042 = vmatprep.mubr.msk.f32.mxu1 %vm1267_vm3, %v3566_v37 }
 0xd69   : > { %v3567_v38 = vpop.trf.xlu1 }
 0xd6a   : > { %7043 = vmatmul.mubr.msk.f32.gmra.mrb[62].mxu1 %vm1267_vm3, %v3567_v38 }
 0xd6b   : > { %7061 = vmatprep.mubr.msk.bf16.mxu1 %vm7864_vm0, %v7863_v0 }
 0xe05   : > { %v7023_v39 = vpop.f32.mrb[48].mxu1 }
 0xe06   : > { %v3762_v42 = vmul.f32 %v7535_v41, %v7023_v39  ;;  %v3682_v45 = vpop.f32.mrb[49].mxu1  ;;  %v7547_v39 = vld [vmem:[%s9929_s6 + $0x68] sm:$0xff] }
 0xe07   : > { %v3761_v51 = vmul.f32 %v7536_v47, %v3682_v45  ;;  %v7548_v45 = vld [vmem:[%s9929_s6 + $0x60] sm:$0xff] }
 0xe09   : > { %v3777_v46 = vpack.c.bf16 %v3762_v42, %v3761_v51 }
 0xe0b   : > { %7046 = vmatpush3.bf16.msra.mxu1 %v3777_v46 }
 0xe0c   : > { %7047 = vmatprep.subr.bf16.mxu1 %v7863_v0 }
 0xe0d   : > { %v7026_v52 = vpop.f32.mrb[50].mxu1 }
 0xe0e   : > { %v3764_v54 = vmul.f32 %v7537_v53, %v7026_v52  ;;  %v3692_v55 = vpop.f32.mrb[51].mxu1  ;;  %v7549_v52 = vld [vmem:[%s9929_s6 + $0x78] sm:$0xff] }
 0xe0f   : > { %v3763_v57 = vmul.f32 %v7538_v56, %v3692_v55  ;;  %v7550_v55 = vld [vmem:[%s9929_s6 + $0x70] sm:$0xff] }
 0xe11   : > { %v3778_v48 = vpack.c.bf16 %v3764_v54, %v3763_v57 }
 0xe13   : > { %7048 = vmatpush3.bf16.msra.mxu1 %v3778_v48  ;;  %v3785_v48 = vpack.c.bf16 %v9166_v49, %v9166_v49 }
 0xe14   : > { %7049 = vmatprep.subr.bf16.mxu1 %v7863_v0 }
 0xe15   : > { %v7029_v59 = vpop.f32.mrb[52].mxu1 }
 0xe16   : > { %v3766_v60 = vmul.f32 %v7539_v36, %v7029_v59  ;;  %v3702_v61 = vpop.f32.mrb[53].mxu1 }
 0xe17   : > { %v3765_v63 = vmul.f32 %v7540_v62, %v3702_v61 }
 0xe19   : > { %v3779_v1 = vpack.c.bf16 %v3766_v60, %v3765_v63  ;;  %v7554_v60 = vld [vmem:[%s9930_s28 + $0x10] sm:$0xff]  ;;  %v7555_v63 = vld [vmem:[%s9930_s28 + $0x28] sm:$0xff] }
 0xe1b   : > { %7050 = vmatpush3.bf16.msra.mxu1 %v3779_v1 }
 0xe1c   : > { %7051 = vmatprep.subr.bf16.mxu1 %v7863_v0 }
 0xe1d   : > { %v7032_v2 = vpop.f32.mrb[54].mxu1 }
 0xe1e   : > { %v3768_v4 = vmul.f32 %v7541_v3, %v7032_v2  ;;  %v3712_v5 = vpop.f32.mrb[55].mxu1 }
 0xe1f   : > { %v3767_v7 = vmul.f32 %v7542_v6, %v3712_v5 }
 0xe21   : > { %v3780_v8 = vpack.c.bf16 %v3768_v4, %v3767_v7  ;;  %v7556_v4 = vld [vmem:[%s9930_s28 + $0x20] sm:$0xff]  ;;  %v7557_v7 = vld [vmem:[%s9930_s28 + $0x38] sm:$0xff] }
 0xe23   : > { %7052 = vmatpush3.bf16.msra.mxu1 %v3780_v8 }
 0xe24   : > { %7053 = vmatprep.subr.bf16.mxu1 %v7863_v0 }
 0xe25   : > { %v7035_v9 = vpop.f32.mrb[56].mxu1 }
 0xe26   : > { %v3770_v11 = vmul.f32 %v7543_v10, %v7035_v9  ;;  %v3722_v44 = vpop.f32.mrb[57].mxu1 }
 0xe27   : > { %v3769_v14 = vmul.f32 %v7544_v13, %v3722_v44 }
 0xe29   : > { %v3781_v15 = vpack.c.bf16 %v3770_v11, %v3769_v14  ;;  %v7558_v11 = vld [vmem:[%s9930_s28 + $0x30] sm:$0xff]  ;;  %v7559_v14 = vld [vmem:[%s9930_s28 + $0x48] sm:$0xff] }
 0xe2b   : > { %7054 = vmatpush3.bf16.msra.mxu1 %v3781_v15 }
 0xe2c   : > { %7055 = vmatprep.subr.bf16.mxu1 %v7863_v0 }
 0xe2d   : > { %v7038_v16 = vpop.f32.mrb[58].mxu1 }
 0xe2e   : > { %v3772_v18 = vmul.f32 %v7545_v17, %v7038_v16  ;;  %v3732_v22 = vpop.f32.mrb[59].mxu1 }
 0xe2f   : > { %v3771_v34 = vmul.f32 %v7546_v31, %v3732_v22 }
 0xe31   : > { %v3782_v37 = vpack.c.bf16 %v3772_v18, %v3771_v34  ;;  %v7560_v18 = vld [vmem:[%s9930_s28 + $0x40] sm:$0xff] }
 0xe33   : > { %7056 = vmatpush3.bf16.msra.mxu1 %v3782_v37  ;;  %v7561_v37 = vld [vmem:[%s8586_s5] ss:$0 sm:$0xff]  ;;  %s821_s5 = scalar_lea.vmem %s9936_s27, %s5835_s1 }
 0xe34   : > { %7057 = vmatprep.subr.bf16.mxu1 %v7863_v0 }
 0xe35   : > { %v7041_v38 = vpop.f32.mrb[60].mxu1 }
 0xe36   : > { %v3774_v41 = vmul.f32 %v7547_v39, %v7041_v38  ;;  %v3742_v42 = vpop.f32.mrb[61].mxu1 }
 0xe37   : > { %v3773_v47 = vmul.f32 %v7548_v45, %v3742_v42 }
 0xe39   : > { %v3783_v51 = vpack.c.bf16 %v3774_v41, %v3773_v47 }
 0xe3b   : > { %7058 = vmatpush3.bf16.msra.mxu1 %v3783_v51  ;;  %v7562_v51 = vld [vmem:[%s9930_s28 + $0x58] sm:$0xff] }
 0xe3c   : > { %7059 = vmatprep.subr.bf16.mxu1 %v7863_v0 }
 0xe3d   : > { %v7044_v46 = vpop.f32.mrb[62].mxu1 }
 0xe3e   : > { %v3776_v53 = vmul.f32 %v7549_v52, %v7044_v46  ;;  %v3752_v54 = vpop.f32.mrb[63].mxu1  ;;  %v7563_v52 = vld [vmem:[%s9930_s28 + $0x50] sm:$0xff] }
 0xe3f   : > { %v3775_v56 = vmul.f32 %v7550_v55, %v3752_v54 }
 0xe41   : > { %v3784_v57 = vpack.c.bf16 %v3776_v53, %v3775_v56 }
 0xe43   : > { %7060 = vmatpush3.bf16.msra.mxu1 %v3784_v57  ;;  %v7564_v57 = vld [vmem:[%s9930_s28 + $0x68] sm:$0xff] }
 0xe44   : > { %7111 = vmatprep.subr.bf16.mxu1 %v7863_v0 }
 0xe46   : > { %7062 = vmatmul.mubr.bf16.vlgmr.msra.gmra.mrb[64].mxu1 %v3785_v48 }
 0xe47   : > { %7112 = vmatpush3.bf16.msra.mxu1 %v8533_v25  ;;  %7127 = vmatprep.mubr.msk.bf16.mxu1 %vm7864_vm0, %v7863_v0  ;;  %v7069_v25 = vpop.f32.mrb[52].mxu0 }
 0xe48   : > { %7113 = vmatprep.subr.bf16.mxu1 %v7863_v0 }
 0xe4b   : > { %7114 = vmatpush3.bf16.msra.mxu1 %v8541_v30  ;;  %v7551_v30 = vld [vmem:[%s9930_s28 + $0x8] sm:$0xff] }
 0xe4c   : > { %7115 = vmatprep.subr.bf16.mxu1 %v7863_v0 }
 0xe4f   : > { %7116 = vmatpush3.bf16.msra.mxu1 %v8551_v40  ;;  %v3978_v40 = vmul.f32 %v7551_v30, %v7069_v25  ;;  %v7565_v25 = vld [vmem:[%s9930_s28 + $0x60] sm:$0xff] }
 0xe50   : > { %7117 = vmatprep.subr.bf16.mxu1 %v7863_v0 }
 0xe53   : > { %7118 = vmatpush3.bf16.msra.mxu1 %v8562_v50  ;;  %v3898_v50 = vpop.f32.mrb[53].mxu0 }
 0xe54   : > { %7119 = vmatprep.subr.bf16.mxu1 %v7863_v0  ;;  %v7072_v49 = vpop.f32.mrb[54].mxu0 }
 0xe55   : > { %v3908_v36 = vpop.f32.mrb[55].mxu0 }
 0xe56   : > { %v3979_v61 = vmul.f32 %v7554_v60, %v3908_v36  ;;  %v7075_v62 = vpop.f32.mrb[56].mxu0 }
 0xe57   : > { %7120 = vmatpush3.bf16.msra.mxu1 %v8573_v58  ;;  %v7552_v58 = vld [vmem:[%s9930_s28] sm:$0xff]  ;;  %v3982_v1 = vmul.f32 %v7555_v63, %v7075_v62  ;;  %v3918_v2 = vpop.f32.mrb[57].mxu0 }
 0xe58   : > { %7121 = vmatprep.subr.bf16.mxu1 %v7863_v0  ;;  %v3981_v5 = vmul.f32 %v7556_v4, %v3918_v2  ;;  %v7078_v6 = vpop.f32.mrb[58].mxu0  ;;  %v7422_v63 = vld [vmem:[#allocation2 + $0x40] sm:$0xff]   ;;  %v7423_v2 = vld [vmem:[#allocation2 + $0x48] sm:$0xff]   ;;  %v7425_v4 = vld [vmem:[#allocation2 + $0x58] sm:$0xff]  }
 0xe59   : > { %v3984_v8 = vmul.f32 %v7557_v7, %v7078_v6  ;;  %v3928_v9 = vpop.f32.mrb[59].mxu0  ;;  %v7427_v6 = vld [vmem:[#allocation2 + $0x68] sm:$0xff]   ;;  %v7428_v7 = vld [vmem:[#allocation2 + $0x70] sm:$0xff]  }
 0xe5a   : > { %v3995_v10 = vpack.c.bf16 %v3982_v1, %v3981_v5  ;;  %v3983_v44 = vmul.f32 %v7558_v11, %v3928_v9  ;;  %v7081_v13 = vpop.f32.mrb[60].mxu0  ;;  %v7426_v5 = vld [vmem:[#allocation2 + $0x60] sm:$0xff]  }
 0xe5b   : > { %7122 = vmatpush3.bf16.msra.mxu1 %v8595_v12  ;;  %v3977_v12 = vmul.f32 %v7552_v58, %v3898_v50  ;;  %v3986_v15 = vmul.f32 %v7559_v14, %v7081_v13  ;;  %v3938_v16 = vpop.f32.mrb[61].mxu0 }
 0xe5c   : > { %7123 = vmatprep.subr.bf16.mxu1 %v7863_v0  ;;  %v3996_v17 = vpack.c.bf16 %v3984_v8, %v3983_v44  ;;  %v3985_v22 = vmul.f32 %v7560_v18, %v3938_v16  ;;  %v7084_v45 = vpop.f32.mrb[62].mxu0  ;;  %v7429_v8 = vld [vmem:[#allocation2 + $0x78] sm:$0xff]  }
 0xe5d   : > { %v3948_v47 = vpop.f32.mrb[63].mxu0  ;;  %v3988_v46 = vmul.f32 %v7562_v51, %v7084_v45  ;;  %v6148_v51 = vld [vmem:[%s9932_s29 + $0x220] sm:$0xff] }
 0xe5e   : > { %v3997_v31 = vpack.c.bf16 %v3986_v15, %v3985_v22  ;;  %v3987_v53 = vmul.f32 %v7563_v52, %v3948_v47  ;;  %v7087_v55 = vpop.f32.mrb[64].mxu0  ;;  %v6144_v47 = vld [vmem:[%s9932_s29 + $0x200] sm:$0xff] }
 0xe5f   : > { %7124 = vmatpush3.bf16.msra.mxu1 %v8606_v20  ;;  %v7553_v20 = vld [vmem:[%s9930_s28 + $0x18] sm:$0xff]  ;;  %v3958_v56 = vpop.f32.mrb[65].mxu0  ;;  %v3990_v48 = vmul.f32 %v7564_v57, %v7087_v55  ;;  %v6208_v52 = vcombine.low %v6144_v47, %v6148_v51  ;;  %v6156_v55 = vld [vmem:[%s9932_s29 + $0x260] sm:$0xff] }
 0xe60   : > { %7125 = vmatprep.subr.bf16.mxu1 %v7863_v0  ;;  %v3980_v59 = vmul.f32 %v7553_v20, %v7072_v49  ;;  %v3998_v54 = vpack.c.bf16 %v3988_v46, %v3987_v53  ;;  %v3989_v30 = vmul.f32 %v7565_v25, %v3958_v56  ;;  %v7090_v50 = vpop.f32.mrb[66].mxu0  ;;  %v7567_v20 = vld [vmem:[%s9930_s28 + $0x70] sm:$0xff]  ;;  %v6145_v46 = vld [vmem:[%s9932_s29 + $0x208] sm:$0xff]  ;;  %v6209_v53 = vcombine.high %v6144_v47, %v6148_v51  ;;  %v6196_v47 = vld [vmem:[%s9932_s29 + $0x3a0] sm:$0xff] }
 0xe61   : > { %v3968_v58 = vpop.f32.mrb[67].mxu0  ;;  %v6153_v25 = vld [vmem:[%s9932_s29 + $0x248] sm:$0xff] }
 0xe62   : > { %v3994_v3 = vpack.c.bf16 %v3980_v59, %v3979_v61  ;;  %v3991_v59 = vmul.f32 %v7567_v20, %v3968_v58  ;;  %v6164_v58 = vld [vmem:[%s9932_s29 + $0x2a0] sm:$0xff]  ;;  %v6193_v51 = vld [vmem:[%s9932_s29 + $0x388] sm:$0xff] }
 0xe63   : > { %7126 = vmatpush3.bf16.msra.mxu1 %v8617_v28  ;;  %v3993_v28 = vpack.c.bf16 %v3978_v40, %v3977_v12  ;;  %v3999_v40 = vpack.c.bf16 %v3990_v48, %v3989_v30  ;;  %v7566_v12 = vld [vmem:[%s9930_s28 + $0x78] sm:$0xff]  ;;  %v6157_v30 = vld [vmem:[%s9932_s29 + $0x268] sm:$0xff] }
 0xe64   : > { %v3992_v49 = vmul.f32 %v7566_v12, %v7090_v50  ;;  %4657 = vmatprep.subr.bf16.mxu1 %v6209_v53  ;;  %v6219_v50 = vcombine.high %v6153_v25, %v6157_v30  ;;  %v6161_v12 = vld [vmem:[%s9932_s29 + $0x288] sm:$0xff] }
 0xe65   : > { %7092 = vmatpush3.bf16.msra.mxu0 %v3993_v28 }
 0xe66   : > { %7093 = vmatprep.subr.bf16.mxu0 %v7863_v0  ;;  %v4000_v36 = vpack.c.bf16 %v3992_v49, %v3991_v59  ;;  %v6165_v49 = vld [vmem:[%s9932_s29 + $0x2a8] sm:$0xff]  ;;  %v6218_v59 = vcombine.low %v6153_v25, %v6157_v30 }
 0xe67   : > { %v6205_v30 = vld [vmem:[%s9932_s29 + $0x3e8] sm:$0xff] }
 0xe69   : > { %7094 = vmatpush3.bf16.msra.mxu0 %v3994_v3  ;;  %v7424_v3 = vld [vmem:[#allocation2 + $0x50] sm:$0xff]  }
 0xe6a   : > { %7095 = vmatprep.subr.bf16.mxu0 %v7863_v0 }
 0xe6d   : > { %7096 = vmatpush3.bf16.msra.mxu0 %v3995_v10 }
 0xe6e   : > { %7097 = vmatprep.subr.bf16.mxu0 %v7863_v0 }
 0xe71   : > { %7098 = vmatpush3.bf16.msra.mxu0 %v3996_v17 }
 0xe72   : > { %7099 = vmatprep.subr.bf16.mxu0 %v7863_v0 }
 0xe75   : > { %7100 = vmatpush3.bf16.msra.mxu0 %v3997_v31 }
 0xe76   : > { %7101 = vmatprep.subr.bf16.mxu0 %v7863_v0 }
 0xe79   : > { %7102 = vmatpush3.bf16.msra.mxu0 %v3998_v54  ;;  %v6149_v54 = vld [vmem:[%s9932_s29 + $0x228] sm:$0xff] }
 0xe7a   : > { %7103 = vmatprep.subr.bf16.mxu0 %v7863_v0  ;;  %v6210_v56 = vcombine.low %v6145_v46, %v6149_v54  ;;  %v6211_v57 = vcombine.high %v6145_v46, %v6149_v54 }
 0xe7d   : > { %7104 = vmatpush3.bf16.msra.mxu0 %v3999_v40  ;;  %v6160_v40 = vld [vmem:[%s9932_s29 + $0x280] sm:$0xff] }
 0xe7e   : > { %7105 = vmatprep.subr.bf16.mxu0 %v7863_v0 }
 0xe81   : > { %7106 = vmatpush3.bf16.msra.mxu0 %v4000_v36  ;;  %v6225_v36 = vcombine.high %v6160_v40, %v6164_v58 }
 0xe82   : > { %7131 = vmatprep.subr.bf16.mxu0 %v7863_v0 }
 0xf19   : > { %v3820_v34 = vpop.f32.mrb[64].mxu1 }
 0xf1a   : > { %v3821_v38 = vadd.f32 %v7561_v37, %v3820_v34  ;;  %v7063_v39 = vpop.f32.mrb[65].mxu1  ;;  %v6133_v34 = vld [vmem:[#allocation4 + $0x1] ss:$0 sm:$0xff] }
 0xf1b   : > { %v3823_v41 = vpop.f32.mrb[66].mxu1 }
 0xf1c   : > { %3826 = vmax.xlane.f32.xlu1 %v3821_v38  ;;  %v7064_v42 = vpop.f32.mrb[67].mxu1 }
 0xfa9   : > { %v3827_v28 = vpop.xlane.xlu1 %3826 }
 0xfaa   : > { %v3828_v60 = vsub.f32 %v3821_v38, %v3827_v28  ;;  %v6227_v28 = vcombine.high %v6161_v12, %v6165_v49 }
 0xfac   : > { %v3829_v61 = vmul.f32 1.442695, %v3828_v60  ;;  %v6224_v60 = vcombine.low %v6160_v40, %v6164_v58  ;;  %v6146_v40 = vld [vmem:[%s9932_s29 + $0x210] sm:$0xff] }
 0xfae   : > { %7510 = vpow2.f32 %v3829_v61  ;;  %v6226_v61 = vcombine.low %v6161_v12, %v6165_v49 }
 0xfb8   : > { %v7511_v62 = vpop.eup %7510 }
 0xfb9   : > { %v3831_v1 = vpack.c.bf16 %v7511_v62, %v7511_v62 }
 0xfbb   : > { %7108 = vmatmul.mubr.bf16.vlgmr.msra.gmra.mrb[68].mxu0 %v3831_v1  ;;  %7128 = vmatmul.mubr.bf16.vlgmr.msra.gmra.mrb[68].mxu1 %v3831_v1 }
 0xfbc   : > { %7132 = vmatpush3.bf16.msra.mxu0 %v7422_v63  ;;  %7147 = vmatprep.mubr.msk.bf16.mxu0 %vm7864_vm0, %v7863_v0 }
 0xfbd   : > { %7133 = vmatprep.subr.bf16.mxu0 %v7863_v0  ;;  %4689 = vmatprep.mubr.bf16.mxu1 %v7865_v35 }
 0xfbe   : > { %4658 = vmatpush1.bf16.msra.mxu1 %v6208_v52  ;;  %v6197_v52 = vld [vmem:[%s9932_s29 + $0x3a8] sm:$0xff] }
 0xfbf   : > { %v6258_v54 = vcombine.low %v6193_v51, %v6197_v52 }
 0xfc0   : > { %7134 = vmatpush3.bf16.msra.mxu0 %v7423_v2 }
 0xfc1   : > { %7135 = vmatprep.subr.bf16.mxu0 %v7863_v0 }
 0xfc4   : > { %7136 = vmatpush3.bf16.msra.mxu0 %v7424_v3  ;;  %v6168_v3 = vld [vmem:[%s9932_s29 + $0x2c0] sm:$0xff] }
 0xfc5   : > { %7137 = vmatprep.subr.bf16.mxu0 %v7863_v0 }
 0xfc8   : > { %7138 = vmatpush3.bf16.msra.mxu0 %v7425_v4  ;;  %v6172_v4 = vld [vmem:[%s9932_s29 + $0x2e0] sm:$0xff] }
 0xfc9   : > { %7139 = vmatprep.subr.bf16.mxu0 %v7863_v0 }
 0xfcc   : > { %7140 = vmatpush3.bf16.msra.mxu0 %v7426_v5  ;;  %v6169_v5 = vld [vmem:[%s9932_s29 + $0x2c8] sm:$0xff] }
 0xfcd   : > { %7141 = vmatprep.subr.bf16.mxu0 %v7863_v0 }
 0xfd0   : > { %7142 = vmatpush3.bf16.msra.mxu0 %v7427_v6  ;;  %v6233_v6 = vcombine.high %v6168_v3, %v6172_v4 }
 0xfd1   : > { %7143 = vmatprep.subr.bf16.mxu0 %v7863_v0 }
 0xfd4   : > { %7144 = vmatpush3.bf16.msra.mxu0 %v7428_v7  ;;  %v6173_v7 = vld [vmem:[%s9932_s29 + $0x2e8] sm:$0xff] }
 0xfd5   : > { %7145 = vmatprep.subr.bf16.mxu0 %v7863_v0 }
 0xfd8   : > { %7146 = vmatpush3.bf16.msra.mxu0 %v7429_v8  ;;  %v6232_v8 = vcombine.low %v6168_v3, %v6172_v4  ;;  %v6142_v3 = vld [vmem:[#allocation6 + $0x1] ss:$0 sm:$0xff] }
 0xfd9   : > { %4698 = vmatprep.subr.bf16.mxu0 %v6211_v57  ;;  %v6201_v57 = vld [vmem:[%s9932_s29 + $0x3c8] sm:$0xff] }
 0xfda   : > { %v6266_v58 = vcombine.low %v6201_v57, %v6205_v30  ;;  %v6267_v12 = vcombine.high %v6201_v57, %v6205_v30  ;;  %v6186_v57 = vld [vmem:[%s9932_s29 + $0x350] sm:$0xff]  ;;  %v6191_v30 = vld [vmem:[%s9932_s29 + $0x378] sm:$0xff] }
0x108e   : > { %v4035_v9 = vpop.f32.mrb[68].mxu0  ;;  %v4075_v10 = vpop.f32.mrb[68].mxu1 }
0x108f   : > { %v4081_v11 = vmax.f32 %v4075_v10, 1e-20  ;;  %v7109_v44 = vpop.f32.mrb[69].mxu0  ;;  %v7129_v13 = vpop.f32.mrb[69].mxu1  ;;  %v6235_v10 = vcombine.high %v6169_v5, %v6173_v7 }
0x1090   : > { %v4038_v14 = vpop.f32.mrb[70].mxu0  ;;  %v4078_v15 = vpop.f32.mrb[70].mxu1  ;;  %v6180_v44 = vld [vmem:[%s9932_s29 + $0x320] sm:$0xff]  ;;  %v6177_v13 = vld [vmem:[%s9932_s29 + $0x308] sm:$0xff] }
0x1091   : > { %7512 = vrcp.f32 %v4081_v11  ;;  %v7110_v16 = vpop.f32.mrb[71].mxu0  ;;  %v7130_v17 = vpop.f32.mrb[71].mxu1  ;;  %v6176_v11 = vld [vmem:[%s9932_s29 + $0x300] sm:$0xff]  ;;  %v6181_v15 = vld [vmem:[%s9932_s29 + $0x328] sm:$0xff] }
0x1092   : > { %v6241_v14 = vcombine.high %v6176_v11, %v6180_v44  ;;  %v6240_v16 = vcombine.low %v6176_v11, %v6180_v44  ;;  %v6242_v17 = vcombine.low %v6177_v13, %v6181_v15 }
0x109b   : > { %v7513_v18 = vpop.eup %7512 }
0x109c   : > { %v4083_v22 = vmul.f32 %v7513_v18, %v4035_v9  ;;  %v6234_v9 = vcombine.low %v6169_v5, %v6173_v7  ;;  %v6243_v18 = vcombine.high %v6177_v13, %v6181_v15  ;;  %v6143_v5 = vld [vmem:[#allocation7 + $0x1] ss:$0 sm:$0xff]  ;;  %v6154_v7 = vld [vmem:[%s9932_s29 + $0x250] sm:$0xff] }
0x109d   : > { %v6166_v15 = vld [vmem:[%s9932_s29 + $0x2b0] sm:$0xff] }
0x109e   : > { %v4084_v31 = vpack.c.bf16 %v4083_v22, %v4083_v22  ;;  %v6184_v22 = vld [vmem:[%s9932_s29 + $0x340] sm:$0xff] }
0x10a0   : > { %7148 = vmatmul.mubr.bf16.vlgmr.msra.gmra.mrb[72].mxu0 %v4084_v31  ;;  %v6188_v31 = vld [vmem:[%s9932_s29 + $0x360] sm:$0xff] }
0x10a1   : > { %4730 = vmatprep.mubr.bf16.mxu0 %v7865_v35  ;;  %4699 = vmatpush1.bf16.msra.mxu0 %v6210_v56  ;;  %v6204_v56 = vld [vmem:[%s9932_s29 + $0x3e0] sm:$0xff] }
0x10a2   : > { %4700 = vmatprep.subr.bf16.mxu0 %v6219_v50  ;;  %v6150_v50 = vld [vmem:[%s9932_s29 + $0x230] sm:$0xff] }
0x10a3   : > { %v6212_v49 = vcombine.low %v6146_v40, %v6150_v50 }
0x10a5   : > { %4701 = vmatpush1.bf16.msra.mxu0 %v6218_v59  ;;  %v6147_v59 = vld [vmem:[%s9932_s29 + $0x218] sm:$0xff] }
0x10a6   : > { %4702 = vmatprep.subr.bf16.mxu0 %v6227_v28 }
0x10a9   : > { %4703 = vmatpush1.bf16.msra.mxu0 %v6226_v61 }
0x10aa   : > { %4704 = vmatprep.subr.bf16.mxu0 %v6235_v10  ;;  %v6159_v10 = vld [vmem:[%s9932_s29 + $0x278] sm:$0xff] }
0x10ad   : > { %4705 = vmatpush1.bf16.msra.mxu0 %v6234_v9  ;;  %v6155_v9 = vld [vmem:[%s9932_s29 + $0x258] sm:$0xff] }
0x10ae   : > { %4706 = vmatprep.subr.bf16.mxu0 %v6243_v18  ;;  %v6223_v13 = vcombine.high %v6155_v9, %v6159_v10 }
0x10b1   : > { %4707 = vmatpush1.bf16.msra.mxu0 %v6242_v17  ;;  %v6167_v17 = vld [vmem:[%s9932_s29 + $0x2b8] sm:$0xff] }
0x1173   : > { %v4192_v37 = vpop.f32.mrb[72].mxu0 }
0x1174   : > { %v4193_v38 = vadd.f32 %v6133_v34, %v4192_v37  ;;  %v7149_v39 = vpop.f32.mrb[73].mxu0  ;;  %v6185_v34 = vld [vmem:[%s9932_s29 + $0x348] sm:$0xff]  ;;  %v6249_v37 = vcombine.high %v6184_v22, %v6188_v31 }
0x1175   : > { %v4195_v41 = vpop.f32.mrb[74].mxu0  ;;  %v6248_v39 = vcombine.low %v6184_v22, %v6188_v31  ;;  %v6222_v22 = vcombine.low %v6155_v9, %v6159_v10 }
0x1176   : > { %v7150_v42 = vpop.f32.mrb[75].mxu0  ;;  %v4198_v45 = vadd.f32 %v4193_v38, %v9157_v43  ;;  %v6152_v43 = vld [vmem:[%s9932_s29 + $0x240] sm:$0xff]  ;;  %v6189_v38 = vld [vmem:[%s9932_s29 + $0x368] sm:$0xff] }
0x1177   : > { %v6217_v48 = vcombine.high %v6152_v43, %v6156_v55  ;;  %v6216_v20 = vcombine.low %v6152_v43, %v6156_v55  ;;  %v6250_v41 = vcombine.low %v6185_v34, %v6189_v38  ;;  %v6251_v42 = vcombine.high %v6185_v34, %v6189_v38  ;;  %v6200_v55 = vld [vmem:[%s9932_s29 + $0x3c0] sm:$0xff]  ;;  %v6174_v38 = vld [vmem:[%s9932_s29 + $0x2f0] sm:$0xff] }
0x1178   : > { %4203 = vadd.xlane.f32.xlu0 %v4198_v45  ;;  %v6259_v43 = vcombine.high %v6193_v51, %v6197_v52  ;;  %v6265_v25 = vcombine.high %v6200_v55, %v6204_v56  ;;  %v6182_v52 = vld [vmem:[%s9932_s29 + $0x330] sm:$0xff] }
0x1179   : > { %4659 = vmatprep.subr.bf16.mxu1 %v6217_v48  ;;  %4708 = vmatprep.subr.bf16.mxu0 %v6251_v42  ;;  %v6264_v48 = vcombine.low %v6200_v55, %v6204_v56 }
0x117a   : > { %4660 = vmatpush1.bf16.msra.mxu1 %v6216_v20  ;;  %4709 = vmatpush1.bf16.msra.mxu0 %v6250_v41  ;;  %v6213_v20 = vcombine.high %v6146_v40, %v6150_v50  ;;  %v6175_v41 = vld [vmem:[%s9932_s29 + $0x2f8] sm:$0xff] }
0x117b   : > { %4661 = vmatprep.subr.bf16.mxu1 %v6225_v36  ;;  %4710 = vmatprep.subr.bf16.mxu0 %v6259_v43  ;;  %v6151_v36 = vld [vmem:[%s9932_s29 + $0x238] sm:$0xff] }
0x117c   : > { %v6214_v28 = vcombine.low %v6147_v59, %v6151_v36 }
0x117e   : > { %4662 = vmatpush1.bf16.msra.mxu1 %v6224_v60  ;;  %4711 = vmatpush1.bf16.msra.mxu0 %v6258_v54  ;;  %v6215_v60 = vcombine.high %v6147_v59, %v6151_v36  ;;  %v6195_v59 = vld [vmem:[%s9932_s29 + $0x398] sm:$0xff] }
0x117f   : > { %4663 = vmatprep.subr.bf16.mxu1 %v6233_v6  ;;  %4712 = vmatprep.subr.bf16.mxu0 %v6267_v12  ;;  %v6199_v36 = vld [vmem:[%s9932_s29 + $0x3b8] sm:$0xff] }
0x1182   : > { %4664 = vmatpush1.bf16.msra.mxu1 %v6232_v8  ;;  %4713 = vmatpush1.bf16.msra.mxu0 %v6266_v58  ;;  %v6158_v8 = vld [vmem:[%s9932_s29 + $0x270] sm:$0xff] }
0x1183   : > { %4665 = vmatprep.subr.bf16.mxu1 %v6241_v14  ;;  %4780 = vmatprep.subr.bf16.mxu0 %v6215_v60  ;;  %v6221_v44 = vcombine.high %v6154_v7, %v6158_v8  ;;  %v6162_v14 = vld [vmem:[%s9932_s29 + $0x290] sm:$0xff]  ;;  %v6220_v18 = vcombine.low %v6154_v7, %v6158_v8 }
0x1184   : > { %v6229_v31 = vcombine.high %v6162_v14, %v6166_v15  ;;  %v6228_v42 = vcombine.low %v6162_v14, %v6166_v15  ;;  %v7432_v14 = vld [vmem:[%s9933_s18 + $0x200] sm:$0xff]  }
0x1185   : > { %v7433_v15 = vld [vmem:[%s9933_s18 + $0x280] sm:$0xff]  }
0x1186   : > { %4666 = vmatpush1.bf16.msra.mxu1 %v6240_v16  ;;  %v6163_v16 = vld [vmem:[%s9932_s29 + $0x298] sm:$0xff] }
0x1187   : > { %4667 = vmatprep.subr.bf16.mxu1 %v6249_v37  ;;  %v6231_v34 = vcombine.high %v6163_v16, %v6167_v17  ;;  %v6170_v37 = vld [vmem:[%s9932_s29 + $0x2d0] sm:$0xff] }
0x1188   : > { %v6236_v54 = vcombine.low %v6170_v37, %v6174_v38 }
0x118a   : > { %4668 = vmatpush1.bf16.msra.mxu1 %v6248_v39  ;;  %v6171_v39 = vld [vmem:[%s9932_s29 + $0x2d8] sm:$0xff] }
0x118b   : > { %v6239_v51 = vcombine.high %v6171_v39, %v6175_v41  ;;  %v6238_v43 = vcombine.low %v6171_v39, %v6175_v41  ;;  %v7443_v39 = vld [vmem:[%s9933_s18 + $0x2d8] sm:$0xff]  }
0x118c   : > { %v7444_v41 = vld [vmem:[%s9933_s18 + $0x218] sm:$0xff]  }
0x1205   : > { %v4204_v62 = vpop.xlane.xlu0 %4203 }
0x1206   : > { %v4205_v63 = vmul.f32 0.0078125, %v4204_v62 }
0x1208   : > { %v9429_v1 = vsub.f32 %v4198_v45, %v4205_v63  ;;  %v6192_v45 = vld [vmem:[%s9932_s29 + $0x380] sm:$0xff] }
0x1209   : > { %v6257_v46 = vcombine.high %v6192_v45, %v6196_v47  ;;  %v6256_v53 = vcombine.low %v6192_v45, %v6196_v47  ;;  %v6230_v45 = vcombine.low %v6163_v16, %v6167_v17  ;;  %v6237_v47 = vcombine.high %v6170_v37, %v6174_v38  ;;  %v7434_v16 = vld [vmem:[%s9933_s18 + $0x248] sm:$0xff]   ;;  %v7441_v37 = vld [vmem:[%s9933_s18 + $0x290] sm:$0xff]   ;;  %v7442_v38 = vld [vmem:[%s9933_s18 + $0x258] sm:$0xff]  }
0x120a   : > { %v4207_v2 = vmul.f32 %v9429_v1, %v9429_v1  ;;  %v7435_v17 = vld [vmem:[%s9933_s18 + $0x2c8] sm:$0xff]  }
0x120b   : > { %4669 = vmatprep.subr.bf16.mxu1 %v6257_v46  ;;  %v6178_v46 = vld [vmem:[%s9932_s29 + $0x310] sm:$0xff] }
0x120c   : > { %4208 = vadd.xlane.f32.xlu0 %v4207_v2  ;;  %4670 = vmatpush1.bf16.msra.mxu1 %v6256_v53  ;;  %v6183_v53 = vld [vmem:[%s9932_s29 + $0x338] sm:$0xff]  ;;  %v6245_v55 = vcombine.high %v6178_v46, %v6182_v52  ;;  %v6244_v40 = vcombine.low %v6178_v46, %v6182_v52  ;;  %v7449_v46 = vld [vmem:[%s9933_s18 + $0x2a0] sm:$0xff]   ;;  %v7450_v52 = vld [vmem:[%s9933_s18 + $0x268] sm:$0xff]  }
0x120d   : > { %4671 = vmatprep.subr.bf16.mxu1 %v6265_v25  ;;  %v6187_v25 = vld [vmem:[%s9932_s29 + $0x358] sm:$0xff] }
0x120e   : > { %v6255_v12 = vcombine.high %v6187_v25, %v6191_v30  ;;  %v6254_v60 = vcombine.low %v6187_v25, %v6191_v30  ;;  %v7459_v25 = vld [vmem:[%s9933_s18 + $0x2f8] sm:$0xff]  }
0x120f   : > { %v7460_v30 = vld [vmem:[%s9933_s18 + $0x238] sm:$0xff]  }
0x1210   : > { %4672 = vmatpush1.bf16.msra.mxu1 %v6264_v48  ;;  %v6190_v48 = vld [vmem:[%s9932_s29 + $0x370] sm:$0xff] }
0x1211   : > { %4739 = vmatprep.subr.bf16.mxu1 %v6213_v20  ;;  %v6253_v58 = vcombine.high %v6186_v57, %v6190_v48  ;;  %v6198_v20 = vld [vmem:[%s9932_s29 + $0x3b0] sm:$0xff] }
0x1299   : > { %v4209_v61 = vpop.xlane.xlu0 %4208 }
0x129a   : > { %v4210_v62 = vmul.f32 0.0078125, %v4209_v61 }
0x129c   : > { %v4211_v63 = vadd.f32 1e-05, %v4210_v62  ;;  %v6263_v62 = vcombine.high %v6195_v59, %v6199_v36 }
0x129e   : > { %7514 = vrsqrt.f32 %v4211_v63  ;;  %v6202_v63 = vld [vmem:[%s9932_s29 + $0x3d0] sm:$0xff] }
0x12a8   : > { %v7515_v2 = vpop.eup %7514 }
0x12a9   : > { %v4213_v4 = vmul.f32 %v7515_v2, %v9429_v1  ;;  %v6206_v2 = vld [vmem:[%s9932_s29 + $0x3f0] sm:$0xff] }
0x12aa   : > { %v6269_v7 = vcombine.high %v6202_v63, %v6206_v2  ;;  %v6268_v9 = vcombine.low %v6202_v63, %v6206_v2 }
0x12ab   : > { %v4220_v6 = vmul.f32 %v6142_v3, %v4213_v4  ;;  %v6203_v3 = vld [vmem:[%s9932_s29 + $0x3d8] sm:$0xff] }
0x12ac   : > { %v6207_v4 = vld [vmem:[%s9932_s29 + $0x3f8] sm:$0xff] }
0x12ad   : > { %v9518_v11 = vadd.f32 %v6143_v5, %v4220_v6  ;;  %v6262_v6 = vcombine.low %v6195_v59, %v6199_v36  ;;  %v6271_v8 = vcombine.high %v6203_v3, %v6207_v4  ;;  %v6270_v10 = vcombine.low %v6203_v3, %v6207_v4 }
0x12af   : > { %v9522_v1 = vpack.c.bf16 %v9518_v11, %v9518_v11 }
0x12b1   : > { %4690 = vmatmul.mubr.bf16.vlgmr.msra.gmra.mrb[72].mxu1 %v9522_v1  ;;  %4731 = vmatmul.mubr.bf16.vlgmr.msra.gmra.mrb[76].mxu0 %v9522_v1 }
0x12b2   : > { %4740 = vmatpush1.bf16.msra.mxu1 %v6212_v49  ;;  %4781 = vmatpush1.bf16.msra.mxu0 %v6214_v28  ;;  %v6194_v49 = vld [vmem:[%s9932_s29 + $0x390] sm:$0xff]  ;;  %v6252_v28 = vcombine.low %v6186_v57, %v6190_v48  ;;  %v7458_v48 = vld [vmem:[%s9933_s18 + $0x278] sm:$0xff]  }
0x12b3   : > { %4741 = vmatprep.subr.bf16.mxu1 %v6221_v44  ;;  %4782 = vmatprep.subr.bf16.mxu0 %v6223_v13  ;;  %v6261_v61 = vcombine.high %v6194_v49, %v6198_v20  ;;  %v6260_v5 = vcombine.low %v6194_v49, %v6198_v20  ;;  %v7430_v44 = vld [vmem:[%s9933_s18 + $0x240] sm:$0xff]   ;;  %v7457_v57 = vld [vmem:[%s9933_s18 + $0x2b0] sm:$0xff]  }
0x12b4   : > { %4771 = vmatprep.mubr.bf16.mxu1 %v7865_v35  ;;  %4812 = vmatprep.mubr.bf16.mxu0 %v7865_v35  ;;  %v6179_v35 = vld [vmem:[%s9932_s29 + $0x318] sm:$0xff]  ;;  %v7431_v13 = vld [vmem:[%s9933_s18 + $0x2c0] sm:$0xff]  }
0x12b5   : > { %v6247_v56 = vcombine.high %v6179_v35, %v6183_v53  ;;  %v6246_v50 = vcombine.low %v6179_v35, %v6183_v53  ;;  %v7451_v35 = vld [vmem:[%s9933_s18 + $0x2e8] sm:$0xff]  }
0x12b6   : > { %4742 = vmatpush1.bf16.msra.mxu1 %v6220_v18  ;;  %4783 = vmatpush1.bf16.msra.mxu0 %v6222_v22  ;;  %v7436_v18 = vld [vmem:[%s9933_s18 + $0x208] sm:$0xff]  }
0x12b7   : > { %4743 = vmatprep.subr.bf16.mxu1 %v6229_v31  ;;  %4784 = vmatprep.subr.bf16.mxu0 %v6231_v34  ;;  %v7437_v22 = vld [vmem:[%s9933_s18 + $0x288] sm:$0xff]   ;;  %v7438_v31 = vld [vmem:[%s9933_s18 + $0x250] sm:$0xff]  }
0x12b8   : > { %v7440_v34 = vld [vmem:[%s9933_s18 + $0x210] sm:$0xff]   ;;  %v7452_v53 = vld [vmem:[%s9933_s18 + $0x228] sm:$0xff]  }
0x12ba   : > { %4744 = vmatpush1.bf16.msra.mxu1 %v6228_v42  ;;  %4785 = vmatpush1.bf16.msra.mxu0 %v6230_v45  ;;  %v7445_v42 = vld [vmem:[%s9933_s18 + $0x298] sm:$0xff]   ;;  %v7446_v45 = vld [vmem:[%s9933_s18 + $0x260] sm:$0xff]  }
0x12bb   : > { %4745 = vmatprep.subr.bf16.mxu1 %v6237_v47  ;;  %4786 = vmatprep.subr.bf16.mxu0 %v6239_v51  ;;  %v7447_v47 = vld [vmem:[%s9933_s18 + $0x2e0] sm:$0xff]  }
0x12bc   : > { %v7448_v51 = vld [vmem:[%s9933_s18 + $0x220] sm:$0xff]  }
0x12be   : > { %4746 = vmatpush1.bf16.msra.mxu1 %v6236_v54  ;;  %4787 = vmatpush1.bf16.msra.mxu0 %v6238_v43  ;;  %v7453_v54 = vld [vmem:[%s9933_s18 + $0x2a8] sm:$0xff]   ;;  %v7454_v43 = vld [vmem:[%s9933_s18 + $0x270] sm:$0xff]  }
0x12bf   : > { %4747 = vmatprep.subr.bf16.mxu1 %v6245_v55  ;;  %4788 = vmatprep.subr.bf16.mxu0 %v6247_v56  ;;  %v7455_v55 = vld [vmem:[%s9933_s18 + $0x2f0] sm:$0xff]  }
0x12c0   : > { %v7456_v56 = vld [vmem:[%s9933_s18 + $0x230] sm:$0xff]  }
0x12c2   : > { %4748 = vmatpush1.bf16.msra.mxu1 %v6244_v40  ;;  %4789 = vmatpush1.bf16.msra.mxu0 %v6246_v50  ;;  %v7461_v40 = vld [vmem:[%s9933_s18 + $0x2b8] sm:$0xff]   ;;  %v7462_v50 = vld [vmem:[%s9933_s18 + $0x340] sm:$0xff]  }
0x12c3   : > { %4749 = vmatprep.subr.bf16.mxu1 %v6253_v58  ;;  %4790 = vmatprep.subr.bf16.mxu0 %v6255_v12  ;;  %v7463_v58 = vld [vmem:[%s9933_s18 + $0x3c0] sm:$0xff]   ;;  %v9704_v12 = vld [vmem:[#allocation12 + $0x8] sm:$0xff] }
0x12c4   : > { %v4300_v49 = vrot.slane %v9704_v12, %v2048_v24  ;;  %v4308_v20 = vrot.slane %v9704_v12, %v2056_v26  ;;  %v4304_v59 = vrot.slane %v9704_v12, %v2052_v27  ;;  %v4312_v36 = vrot.slane %v9704_v12, %v2060_v29  ;;  %v7464_v29 = vld [vmem:[%s9933_s18 + $0x300] sm:$0xff]  }
0x12c6   : > { %4750 = vmatpush1.bf16.msra.mxu1 %v6252_v28  ;;  %4791 = vmatpush1.bf16.msra.mxu0 %v6254_v60 }
0x12c7   : > { %4751 = vmatprep.subr.bf16.mxu1 %v6261_v61  ;;  %4792 = vmatprep.subr.bf16.mxu0 %v6263_v62 }
0x12ca   : > { %4752 = vmatpush1.bf16.msra.mxu1 %v6260_v5  ;;  %4793 = vmatpush1.bf16.msra.mxu0 %v6262_v6 }
0x12cb   : > { %4753 = vmatprep.subr.bf16.mxu1 %v6269_v7  ;;  %4794 = vmatprep.subr.bf16.mxu0 %v6271_v8 }
0x12ce   : > { %4754 = vmatpush1.bf16.msra.mxu1 %v6268_v9  ;;  %4795 = vmatpush1.bf16.msra.mxu0 %v6270_v10 }
0x12cf   : > { %6732 = vmatprep.subr.bf16.mxu1 %v7430_v44  ;;  %6754 = vmatprep.subr.bf16.mxu0 %v7431_v13  ;;  %v7465_v13 = vld [vmem:[%s9933_s18 + $0x380] sm:$0xff]  }
0x12d1   : > { %4772 = vmatmul.mubr.bf16.vlgmr.msra.gmra.mrb[76].mxu1 %v9522_v1  ;;  %4813 = vmatmul.mubr.bf16.vlgmr.msra.gmra.mrb[80].mxu0 %v9522_v1  ;;  %v7439_v1 = vld [vmem:[%s9933_s18 + $0x2d0] sm:$0xff]  }
0x12d2   : > { %6733 = vmatpush3.bf16.msra.mxu1 %v7432_v14  ;;  %6755 = vmatpush3.bf16.msra.mxu0 %v7433_v15 }
0x12d3   : > { %6734 = vmatprep.subr.bf16.mxu1 %v7434_v16  ;;  %6756 = vmatprep.subr.bf16.mxu0 %v7435_v17  ;;  %v7466_v16 = vld [vmem:[%s9933_s18 + $0x348] sm:$0xff]  }
0x12d4   : > { %v7467_v17 = vld [vmem:[%s9933_s18 + $0x3c8] sm:$0xff]  }
0x12d6   : > { %6735 = vmatpush3.bf16.msra.mxu1 %v7436_v18  ;;  %6757 = vmatpush3.bf16.msra.mxu0 %v7437_v22  ;;  %v7468_v18 = vld [vmem:[%s9933_s18 + $0x308] sm:$0xff]  }
0x12d7   : > { %6736 = vmatprep.subr.bf16.mxu1 %v7438_v31  ;;  %6758 = vmatprep.subr.bf16.mxu0 %v7439_v1  ;;  %v7469_v22 = vld [vmem:[%s9933_s18 + $0x388] sm:$0xff]   ;;  %v7470_v31 = vld [vmem:[%s9933_s18 + $0x350] sm:$0xff]  }
0x12d8   : > { %v7471_v1 = vld [vmem:[%s9933_s18 + $0x3d0] sm:$0xff]  }
0x12da   : > { %6737 = vmatpush3.bf16.msra.mxu1 %v7440_v34  ;;  %6759 = vmatpush3.bf16.msra.mxu0 %v7441_v37  ;;  %v7472_v34 = vld [vmem:[%s9933_s18 + $0x310] sm:$0xff]  }
0x12db   : > { %6738 = vmatprep.subr.bf16.mxu1 %v7442_v38  ;;  %6760 = vmatprep.subr.bf16.mxu0 %v7443_v39  ;;  %v7473_v37 = vld [vmem:[%s9933_s18 + $0x390] sm:$0xff]   ;;  %v7474_v38 = vld [vmem:[%s9933_s18 + $0x358] sm:$0xff]  }
0x12dc   : > { %v7475_v39 = vld [vmem:[%s9933_s18 + $0x3d8] sm:$0xff]  }
0x12de   : > { %6739 = vmatpush3.bf16.msra.mxu1 %v7444_v41  ;;  %6761 = vmatpush3.bf16.msra.mxu0 %v7445_v42  ;;  %v7476_v41 = vld [vmem:[%s9933_s18 + $0x318] sm:$0xff]  }
0x12df   : > { %6740 = vmatprep.subr.bf16.mxu1 %v7446_v45  ;;  %6762 = vmatprep.subr.bf16.mxu0 %v7447_v47  ;;  %v7477_v42 = vld [vmem:[%s9933_s18 + $0x398] sm:$0xff]   ;;  %v7478_v45 = vld [vmem:[%s9933_s18 + $0x360] sm:$0xff]  }
0x12e0   : > { %v7479_v47 = vld [vmem:[%s9933_s18 + $0x3e0] sm:$0xff]  }
0x12e2   : > { %6741 = vmatpush3.bf16.msra.mxu1 %v7448_v51  ;;  %6763 = vmatpush3.bf16.msra.mxu0 %v7449_v46  ;;  %v7480_v51 = vld [vmem:[%s9933_s18 + $0x320] sm:$0xff]  }
0x12e3   : > { %6742 = vmatprep.subr.bf16.mxu1 %v7450_v52  ;;  %6764 = vmatprep.subr.bf16.mxu0 %v7451_v35  ;;  %v7481_v46 = vld [vmem:[%s9933_s18 + $0x3a0] sm:$0xff]   ;;  %v7482_v52 = vld [vmem:[%s9933_s18 + $0x368] sm:$0xff]  }
0x12e4   : > { %v7483_v35 = vld [vmem:[%s9933_s18 + $0x3e8] sm:$0xff]  }
0x12e6   : > { %6743 = vmatpush3.bf16.msra.mxu1 %v7452_v53  ;;  %6765 = vmatpush3.bf16.msra.mxu0 %v7453_v54  ;;  %v7484_v53 = vld [vmem:[%s9933_s18 + $0x328] sm:$0xff]  }
0x12e7   : > { %6744 = vmatprep.subr.bf16.mxu1 %v7454_v43  ;;  %6766 = vmatprep.subr.bf16.mxu0 %v7455_v55  ;;  %v7485_v54 = vld [vmem:[%s9933_s18 + $0x3a8] sm:$0xff]   ;;  %v7486_v43 = vld [vmem:[%s9933_s18 + $0x370] sm:$0xff]  }
0x12e8   : > { %v7487_v55 = vld [vmem:[%s9933_s18 + $0x3f0] sm:$0xff]  }
0x12ea   : > { %6745 = vmatpush3.bf16.msra.mxu1 %v7456_v56  ;;  %6767 = vmatpush3.bf16.msra.mxu0 %v7457_v57  ;;  %v4316_v56 = vrot.slane %v9704_v12, %v2064_v19  ;;  %v4324_v57 = vrot.slane %v9704_v12, %v2072_v21  ;;  %v7489_v19 = vld [vmem:[%s9933_s18 + $0x3b0] sm:$0xff]   ;;  %v7490_v21 = vld [vmem:[%s9933_s18 + $0x378] sm:$0xff]  }
0x12eb   : > { %6746 = vmatprep.subr.bf16.mxu1 %v7458_v48  ;;  %6768 = vmatprep.subr.bf16.mxu0 %v7459_v25  ;;  %v4320_v48 = vrot.slane %v9704_v12, %v2068_v32  ;;  %v4328_v25 = vrot.slane %v9704_v12, %v2076_v33 }
0x12ee   : > { %6747 = vmatpush3.bf16.msra.mxu1 %v7460_v30  ;;  %6769 = vmatpush3.bf16.msra.mxu0 %v7461_v40  ;;  %v7488_v30 = vld [vmem:[%s9933_s18 + $0x330] sm:$0xff]  }
0x12ef   : > { %6776 = vmatprep.subr.bf16.mxu1 %v7462_v50  ;;  %6798 = vmatprep.subr.bf16.mxu0 %v7463_v58 }
0x1384   : > { %v4691_v28 = vpop.f32.mrb[72].mxu1  ;;  %v4732_v60 = vpop.f32.mrb[76].mxu0 }
0x1385   : > { %v4692_v61 = vadd.f32 %v4691_v28, %v4300_v49  ;;  %v4733_v62 = vadd.f32 %v4732_v60, %v4308_v20  ;;  %v4693_v63 = vpop.f32.mrb[73].mxu1  ;;  %v4734_v2 = vpop.f32.mrb[77].mxu0  ;;  %v7492_v28 = vld [vmem:[%s9933_s18 + $0x338] sm:$0xff]  }
0x1386   : > { %v4694_v3 = vadd.f32 %v4693_v63, %v4304_v59  ;;  %v4735_v24 = vadd.f32 %v4734_v2, %v4312_v36  ;;  %v4695_v4 = vpop.f32.mrb[74].mxu1  ;;  %v4736_v5 = vpop.f32.mrb[78].mxu0  ;;  %v7493_v60 = vld [vmem:[%s9933_s18 + $0x3b8] sm:$0xff]  }
0x1387   : > { %v4821_v6 = vmax.f32 %v4692_v61, 0.0  ;;  %v4823_v26 = vmax.f32 %v4733_v62, 0.0  ;;  %v4696_v7 = vpop.f32.mrb[75].mxu1  ;;  %v4737_v8 = vpop.f32.mrb[79].mxu0 }
0x1388   : > { %v4822_v9 = vmax.f32 %v4694_v3, 0.0  ;;  %v4824_v27 = vmax.f32 %v4735_v24, 0.0 }
0x1389   : > { %v4829_v14 = vpack.c.bf16 %v4821_v6, %v4821_v6  ;;  %v4831_v15 = vpack.c.bf16 %v4823_v26, %v4823_v26 }
0x138a   : > { %v4830_v10 = vpack.c.bf16 %v4822_v9, %v4822_v9  ;;  %v4832_v44 = vpack.c.bf16 %v4824_v27, %v4824_v27  ;;  %v6400_v9 = vld [vmem:[#allocation13 + $0x1] ss:$0 sm:$0xff] }
0x138c   : > { %5390 = vmatprep.mubr.bf16.mxu1 %v4830_v10  ;;  %5430 = vmatprep.mubr.bf16.mxu0 %v4832_v44 }
0x138d   : > { %5391 = vmatmul.mubr.bf16.vlgmr.msra.gmra.mrb[80].mxu1 %v4829_v14  ;;  %5431 = vmatmul.mubr.bf16.vlgmr.msra.gmra.mrb[84].mxu0 %v4831_v15 }
0x138e   : > { %6777 = vmatpush3.bf16.msra.mxu1 %v7464_v29  ;;  %6799 = vmatpush3.bf16.msra.mxu0 %v7465_v13 }
0x138f   : > { %6778 = vmatprep.subr.bf16.mxu1 %v7466_v16  ;;  %6800 = vmatprep.subr.bf16.mxu0 %v7467_v17 }
0x1392   : > { %6779 = vmatpush3.bf16.msra.mxu1 %v7468_v18  ;;  %6801 = vmatpush3.bf16.msra.mxu0 %v7469_v22 }
0x1393   : > { %6780 = vmatprep.subr.bf16.mxu1 %v7470_v31  ;;  %6802 = vmatprep.subr.bf16.mxu0 %v7471_v1 }
0x1396   : > { %6781 = vmatpush3.bf16.msra.mxu1 %v7472_v34  ;;  %6803 = vmatpush3.bf16.msra.mxu0 %v7473_v37 }
0x1397   : > { %6782 = vmatprep.subr.bf16.mxu1 %v7474_v38  ;;  %6804 = vmatprep.subr.bf16.mxu0 %v7475_v39 }
0x139a   : > { %6783 = vmatpush3.bf16.msra.mxu1 %v7476_v41  ;;  %6805 = vmatpush3.bf16.msra.mxu0 %v7477_v42 }
0x139b   : > { %6784 = vmatprep.subr.bf16.mxu1 %v7478_v45  ;;  %6806 = vmatprep.subr.bf16.mxu0 %v7479_v47 }
0x139e   : > { %6785 = vmatpush3.bf16.msra.mxu1 %v7480_v51  ;;  %6807 = vmatpush3.bf16.msra.mxu0 %v7481_v46 }
0x139f   : > { %6786 = vmatprep.subr.bf16.mxu1 %v7482_v52  ;;  %6808 = vmatprep.subr.bf16.mxu0 %v7483_v35  ;;  %v7494_v52 = vld [vmem:[%s9934_s3] sm:$0xff]   ;;  %v7495_v35 = vld [vmem:[%s9935_s4 + $0x8] sm:$0xff]  }
0x13a2   : > { %6787 = vmatpush3.bf16.msra.mxu1 %v7484_v53  ;;  %6809 = vmatpush3.bf16.msra.mxu0 %v7485_v54 }
0x13a3   : > { %6788 = vmatprep.subr.bf16.mxu1 %v7486_v43  ;;  %6810 = vmatprep.subr.bf16.mxu0 %v7487_v55 }
0x13a4   : > { %v4773_v32 = vpop.f32.mrb[76].mxu1  ;;  %v4814_v33 = vpop.f32.mrb[80].mxu0 }
0x13a5   : > { %v4774_v40 = vadd.f32 %v4773_v32, %v4316_v56  ;;  %v4815_v50 = vadd.f32 %v4814_v33, %v4324_v57  ;;  %v4775_v58 = vpop.f32.mrb[77].mxu1  ;;  %v4816_v12 = vpop.f32.mrb[81].mxu0  ;;  %v7497_v56 = vld [vmem:[%s9935_s4 + $0x18] sm:$0xff]   ;;  %v7498_v57 = vld [vmem:[%s9935_s4 + $0x20] sm:$0xff]  }
0x13a6   : > { %v4776_v49 = vadd.f32 %v4775_v58, %v4320_v48  ;;  %v4817_v20 = vadd.f32 %v4816_v12, %v4328_v25  ;;  %v4777_v59 = vpop.f32.mrb[78].mxu1  ;;  %v4818_v36 = vpop.f32.mrb[82].mxu0  ;;  %6789 = vmatpush3.bf16.msra.mxu1 %v7488_v30  ;;  %6811 = vmatpush3.bf16.msra.mxu0 %v7489_v19  ;;  %v7499_v48 = vld [vmem:[%s9935_s4 + $0x28] sm:$0xff]   ;;  %v7500_v25 = vld [vmem:[%s9935_s4 + $0x30] sm:$0xff]   ;;  %v7501_v30 = vld [vmem:[%s9935_s4 + $0x38] sm:$0xff]  }
0x13a7   : > { %v4825_v61 = vmax.f32 %v4774_v40, 0.0  ;;  %v4827_v62 = vmax.f32 %v4815_v50, 0.0  ;;  %v4778_v63 = vpop.f32.mrb[79].mxu1  ;;  %v4819_v2 = vpop.f32.mrb[83].mxu0  ;;  %6790 = vmatprep.subr.bf16.mxu1 %v7490_v21  ;;  %6812 = vmatprep.subr.bf16.mxu0 %v7491_v23  ;;  %v6465_v33 = vld [vmem:[#allocation9 + $0x1] ss:$0 sm:$0xff] }
0x13a8   : > { %v4826_v3 = vmax.f32 %v4776_v49, 0.0  ;;  %v4828_v24 = vmax.f32 %v4817_v20, 0.0  ;;  %v6466_v50 = vld [vmem:[#allocation10 + $0x1] ss:$0 sm:$0xff]  ;;  %v6467_v20 = vld [vmem:[#allocation15] ss:$0 sm:$0xff] }
0x13a9   : > { %v4833_v6 = vpack.c.bf16 %v4825_v61, %v4825_v61  ;;  %v4835_v26 = vpack.c.bf16 %v4827_v62, %v4827_v62 }
0x13aa   : > { %v4834_v4 = vpack.c.bf16 %v4826_v3, %v4826_v3  ;;  %v4836_v5 = vpack.c.bf16 %v4828_v24, %v4828_v24  ;;  %6791 = vmatpush3.bf16.msra.mxu1 %v7492_v28  ;;  %6813 = vmatpush3.bf16.msra.mxu0 %v7493_v60 }
0x13ab   : > { %7151 = vmatprep.subr.bf16.mxu1 %v7863_v0 }
0x13ac   : > { %5470 = vmatprep.mubr.bf16.mxu1 %v4834_v4  ;;  %5510 = vmatprep.mubr.bf16.mxu0 %v4836_v5 }
0x13ad   : > { %5471 = vmatmul.mubr.bf16.vlgmr.msra.gmra.mrb[84].mxu1 %v4833_v6  ;;  %5511 = vmatmul.mubr.bf16.vlgmr.msra.gmra.mrb[88].mxu0 %v4835_v26 }
0x13ae   : > { %7167 = vmatprep.mubr.msk.bf16.mxu1 %vm7864_vm0, %v7863_v0  ;;  %7152 = vmatpush3.bf16.msra.mxu1 %v7494_v52 }
0x13af   : > { %7153 = vmatprep.subr.bf16.mxu1 %v7863_v0 }
0x13b2   : > { %7154 = vmatpush3.bf16.msra.mxu1 %v7495_v35 }
0x13b3   : > { %7155 = vmatprep.subr.bf16.mxu1 %v7863_v0 }
0x1460   : > { %v6748_v7 = vpop.f32.mrb[80].mxu1  ;;  %v6770_v8 = vpop.f32.mrb[84].mxu0 }
0x1461   : > { %v6749_v27 = vpop.f32.mrb[81].mxu1  ;;  %v6771_v10 = vpop.f32.mrb[85].mxu0 }
0x1462   : > { %v6750_v44 = vadd.f32 %v6749_v27, %v6748_v7  ;;  %v6772_v29 = vadd.f32 %v6771_v10, %v6770_v8  ;;  %v6751_v13 = vpop.f32.mrb[82].mxu1  ;;  %v6773_v14 = vpop.f32.mrb[86].mxu0 }
0x1463   : > { %v6752_v15 = vpop.f32.mrb[83].mxu1  ;;  %v6774_v16 = vpop.f32.mrb[87].mxu0 }
0x1464   : > { %v5393_v17 = vadd.f32 %v6750_v44, %v6400_v9 }
0x1466   : > { %v5433_v18 = vadd.f32 %v6772_v29, %v5393_v17 }
0x1480   : > { %v6792_v22 = vpop.f32.mrb[84].mxu1  ;;  %v6814_v31 = vpop.f32.mrb[88].mxu0 }
0x1481   : > { %v6793_v1 = vpop.f32.mrb[85].mxu1  ;;  %v6815_v34 = vpop.f32.mrb[89].mxu0 }
0x1482   : > { %v6794_v37 = vadd.f32 %v6793_v1, %v6792_v22  ;;  %v6816_v38 = vadd.f32 %v6815_v34, %v6814_v31  ;;  %v6795_v39 = vpop.f32.mrb[86].mxu1  ;;  %v6817_v41 = vpop.f32.mrb[90].mxu0 }
0x1483   : > { %v6796_v42 = vpop.f32.mrb[87].mxu1  ;;  %v6818_v45 = vpop.f32.mrb[91].mxu0 }
0x1484   : > { %v5473_v47 = vadd.f32 %v6794_v37, %v5433_v18 }
0x1486   : > { %v5513_v51 = vadd.f32 %v6816_v38, %v5473_v47 }
0x1488   : > { %v5518_v46 = vadd.f32 %v5513_v51, %v9518_v11  ;;  %v7496_v11 = vld [vmem:[%s9935_s4 + $0x10] sm:$0xff]  }
0x1489   : > { %7156 = vmatpush3.bf16.msra.mxu1 %v7496_v11 }
0x148a   : > { %5523 = vadd.xlane.f32.xlu0 %v5518_v46  ;;  %7157 = vmatprep.subr.bf16.mxu1 %v7863_v0 }
0x148d   : > { %7158 = vmatpush3.bf16.msra.mxu1 %v7497_v56 }
0x148e   : > { %7159 = vmatprep.subr.bf16.mxu1 %v7863_v0 }
0x1491   : > { %7160 = vmatpush3.bf16.msra.mxu1 %v7498_v57 }
0x1492   : > { %7161 = vmatprep.subr.bf16.mxu1 %v7863_v0 }
0x1495   : > { %7162 = vmatpush3.bf16.msra.mxu1 %v7499_v48 }
0x1496   : > { %7163 = vmatprep.subr.bf16.mxu1 %v7863_v0 }
0x1499   : > { %7164 = vmatpush3.bf16.msra.mxu1 %v7500_v25 }
0x149a   : > { %7165 = vmatprep.subr.bf16.mxu1 %v7863_v0 }
0x149d   : > { %7166 = vmatpush3.bf16.msra.mxu1 %v7501_v30 }
0x1517   : > { %v5524_v53 = vpop.xlane.xlu0 %5523 }
0x1518   : > { %v5525_v54 = vmul.f32 0.0078125, %v5524_v53 }
0x151a   : > { %v5526_v43 = vsub.f32 %v5518_v46, %v5525_v54 }
0x151c   : > { %v5527_v55 = vmul.f32 %v5526_v43, %v5526_v43 }
0x151e   : > { %5528 = vadd.xlane.f32.xlu0 %v5527_v55 }
0x15ab   : > { %v5529_v19 = vpop.xlane.xlu0 %5528 }
0x15ac   : > { %v5530_v21 = vmul.f32 0.0078125, %v5529_v19 }
0x15ae   : > { %v5531_v23 = vadd.f32 1e-05, %v5530_v21 }
0x15b0   : > { %7516 = vrsqrt.f32 %v5531_v23 }
0x15ba   : > { %v7517_v32 = vpop.eup %7516 }
0x15bb   : > { %v5533_v40 = vmul.f32 %v7517_v32, %v5526_v43 }
0x15bd   : > { %v5540_v58 = vmul.f32 %v6465_v33, %v5533_v40 }
0x15bf   : > { %v5547_v12 = vadd.f32 %v6466_v50, %v5540_v58 }
0x15c1   : > { %v5548_v49 = vpack.c.bf16 %v5547_v12, %v5547_v12 }
0x15c3   : > { %7168 = vmatmul.mubr.bf16.vlgmr.msra.gmra.mrb[88].mxu1 %v5548_v49 }
0x1696   : > { %v5654_v0 = vpop.f32.mrb[88].mxu1 }
0x1697   : > { %v5655_v59 = vadd.f32 %v6467_v20, %v5654_v0  ;;  %v7169_v36 = vpop.f32.mrb[89].mxu1 }
0x1698   : > { %v5657_v28 = vpop.f32.mrb[90].mxu1 }
0x1699   : > { %5661 = vst.msk [vmem:[%s821_s5] sm:$0xff] %vm5660_vm4, %v5655_v59  ;;  %v7170_v60 = vpop.f32.mrb[91].mxu1 }
0x169a PF: > { %s9937_s2 = sld [smem:[#allocation21_spill]] }
0x16a0   : > { %s37_s3 = sadd.s32 1, %s9937_s2  }
0x16a1   : > { %p34_p11 = scmp.ge.s32.totalorder %s37_s3, 4  }
0x16a3   :  { %36 = sbr.rel (!%p34_p11) target bundleno = 17 (0x11), region = 189 }
0x16aa   :  { %5681 = vsyncpa [#allocation3], 1 }
0x16ab   :  { %5683 = vsyncpa [#allocation3 + $0x1], 1 }
0x16ac   :  { %5684 = vsyncpa [#allocation5], 1 }
0x16ad   :  { %5685 = vsyncpa [#allocation8], 1 }
0x16ae   :  { %5686 = vsyncpa [#allocation11], 1 }
0x16af   :  { %5687 = vsyncpa [#allocation14], 1 }

</bundles_post_ra>
